<compile_context>
chip_gen: v6e
topology: v6e:2x2x1
jax: 0.10.0
libtpu: 0.0.40
codegen_flags: <defaults>
</compile_context>

<pallas_src>
import functools
import math

import numpy as np

import jax
import jax.numpy as jnp
from jax.experimental import pallas as pl
from jax.experimental.pallas import tpu as pltpu  # noqa: F401  (TPU backend)


# ----------------------------------------------------------------------------
# Fused forward kernel (single launch, no grid: whole arrays live in VMEM)
# ----------------------------------------------------------------------------
def _shuffle_ssd_kernel(
    # activation + resampling operators (bf16)
    x_ref,                       # (Cin_pad, M0)  channels x (B*H*W)
    s0_ref,                      # (M0, M1)  stride-2  16x16 -> 8x8
    s1_ref,                      # (M1, M2)  stride-2   8x8 -> 4x4
    up_ref,                      # (M2, M1)  nearest x2 4x4 -> 8x8
    s2_ref,                      # (M1, M2)  stride-2   8x8 -> 4x4 (pyramid)
    s3_ref,                      # (M2, M3)  stride-2   4x4 -> 2x2 (pyramid)
    # base: weights bf16 (Cout, Cin), biases f32 (Cout, 1)
    w_b0_ref, b_b0_ref,
    w_mid_ref, b_mid_ref,        # 21 identical 16->16 layers, stacked
    w_b22_ref, b_b22_ref,
    w_b23_ref, b_b23_ref,
    w_b24_ref, b_b24_ref,
    # extras
    w_e0_ref, b_e0_ref,
    w_e1_ref, b_e1_ref,
    # fusion module
    w_f0_ref, b_f0_ref,
    w_f1_ref, b_f1_ref,
    w_f2_ref, b_f2_ref,
    # pyramid (BatchNorm folded into level 0; weight pre-split along concat axis)
    w_p0a_ref, w_p0b_ref, w_p0c_ref, b_p0_ref,
    w_p1_ref, b_p1_ref,
    w_p2_ref, b_p2_ref,
    # merged (class | loc) heads
    w_h0_ref, b_h0_ref,
    w_h1_ref, b_h1_ref,
    w_h2_ref, b_h2_ref,
    # outputs (f32)
    h0_ref, h1_ref, h2_ref,
):
    bf16 = jnp.bfloat16

    def dense(w, b, x, relu=True):
        # (Cout, Cin) @ (Cin, M) + (Cout, 1); bf16 operands, f32 MXU accumulation.
        y = jnp.dot(w, x.astype(bf16), preferred_element_type=jnp.float32) + b
        return jnp.maximum(y, 0.0) if relu else y

    def resample(x, op_ref):
        # stride-2 subsample / nearest-x2 upsample as a 0/1 operator on the
        # flattened-spatial (lane) axis; a pure selection is exact in bf16, so
        # keeping the result in bf16 is lossless and skips a re-cast before the
        # next MXU dot.
        y = jnp.dot(x.astype(bf16), op_ref[...], preferred_element_type=jnp.float32)
        return y.astype(bf16)

    # ---- base[0:23]  (full resolution, M0 lanes) ----
    a = dense(w_b0_ref[...], b_b0_ref[...], x_ref[...])
    for i in range(w_mid_ref.shape[0]):            # 21 identical 16->16 layers (unrolled)
        a = dense(w_mid_ref[i], b_mid_ref[i], a)
    src0 = dense(w_b22_ref[...], b_b22_ref[...], a)                  # source 0

    # ---- base[23:]  (stride 2 -> M1) ----
    src0_d = resample(src0, s0_ref)
    t = dense(w_b23_ref[...], b_b23_ref[...], src0_d)
    src1 = dense(w_b24_ref[...], b_b24_ref[...], t)                  # source 1

    # ---- extras (forward applies F.relu; stride 2 -> M2) ----
    src1_d = resample(src1, s1_ref)
    e = dense(w_e0_ref[...], b_e0_ref[...], src1_d, relu=True)
    src2 = dense(w_e1_ref[...], b_e1_ref[...], e, relu=True)         # source 2

    # ---- fusion module (linear layers) ----
    f0 = dense(w_f0_ref[...], b_f0_ref[...], src0_d, relu=False)     # (512, M1)
    f1 = dense(w_f1_ref[...], b_f1_ref[...], src1, relu=False)       # (128, M1)
    f2 = dense(w_f2_ref[...], b_f2_ref[...], src2, relu=False)       # (32,  M2)
    f2u = resample(f2, up_ref)                                       # (32,  M1)

    # ---- BatchNorm2d(672) folded into pyramid[0]; channel concat folded into a
    #      split weight, so no in-kernel concatenation is needed ----
    p0 = jnp.dot(w_p0a_ref[...], f0.astype(bf16), preferred_element_type=jnp.float32)
    p0 = p0 + jnp.dot(w_p0b_ref[...], f1.astype(bf16), preferred_element_type=jnp.float32)
    p0 = p0 + jnp.dot(w_p0c_ref[...], f2u, preferred_element_type=jnp.float32)
    p0 = jnp.maximum(p0 + b_p0_ref[...], 0.0)                        # (64, M1)

    p0_d = resample(p0, s2_ref)
    p1 = dense(w_p1_ref[...], b_p1_ref[...], p0_d)                   # (64, M2)
    p1_d = resample(p1, s3_ref)
    p2 = dense(w_p2_ref[...], b_p2_ref[...], p1_d)                   # (64, M3)

    # ---- merged (class | loc) heads ----
    h0_ref[...] = dense(w_h0_ref[...], b_h0_ref[...], p0, relu=False)
    h1_ref[...] = dense(w_h1_ref[...], b_h1_ref[...], p1, relu=False)
    h2_ref[...] = dense(w_h2_ref[...], b_h2_ref[...], p2, relu=False)


# ----------------------------------------------------------------------------
# Resampling operators (built with numpy -> become HLO constants under jit)
# ----------------------------------------------------------------------------
def _stride2_op(b, h, w, dtype):
    """(B*h*w, B*(h//2)*(w//2)) 0/1 matrix implementing x[:, :, ::2, ::2] on the
    flattened (B, h, w) axis of the channels-on-sublane layout."""
    m_in = b * h * w
    kept = (np.arange(b)[:, None, None] * (h * w)
            + (2 * np.arange(h // 2))[None, :, None] * w
            + (2 * np.arange(w // 2))[None, None, :]).reshape(-1)
    op = np.zeros((m_in, kept.size), np.float32)
    op[kept, np.arange(kept.size)] = 1.0
    return jnp.asarray(op, dtype)


def _upsample2_op(b, h, w, dtype):
    """(B*h*w, B*2h*2w) 0/1 matrix implementing nearest x2 upsampling."""
    m_in = b * h * w
    src = (np.arange(b)[:, None, None] * (h * w)
           + (np.arange(2 * h)[None, :, None] // 2) * w
           + (np.arange(2 * w)[None, None, :] // 2)).reshape(-1)
    op = np.zeros((m_in, src.size), np.float32)
    op[src, np.arange(src.size)] = 1.0
    return jnp.asarray(op, dtype)


# ----------------------------------------------------------------------------
# ShuffleSSD (synthetic instantiation) — parameters
# ----------------------------------------------------------------------------
def _make_layer(key, cin, cout):
    kw, kb = jax.random.split(key)
    w = jax.random.normal(kw, (cout, cin), jnp.float32) / jnp.sqrt(jnp.float32(cin))
    b = jax.random.normal(kb, (cout,), jnp.float32) * 0.01
    return {"w": w, "b": b}


def build_shuffle_ssd_params(key, in_channels=4, class_count=3, anchors_per_loc=4):
    keys = iter(jax.random.split(key, 64))

    # base: 25 layers; source0 after layer 22, source1 after the rest.
    base = [_make_layer(next(keys), in_channels, 16)]
    for _ in range(1, 22):
        base.append(_make_layer(next(keys), 16, 16))
    base.append(_make_layer(next(keys), 16, 32))        # 22 -> source0
    base.append(_make_layer(next(keys), 32, 48))        # 23 (stride 2)
    base.append(_make_layer(next(keys), 48, 64))        # 24 -> source1

    # extras: ReLU applied in forward() (F.relu); extras[0] has stride 2.
    extras = [_make_layer(next(keys), 64, 32), _make_layer(next(keys), 32, 32)]

    # fusion_module: maps the 3 sources to 512/128/32 channels at 8x8.
    fusion = [_make_layer(next(keys), 32, 512),          # stride 2 on source0
              _make_layer(next(keys), 64, 128),
              _make_layer(next(keys), 32, 32)]           # + nearest x2 upsample

    # BatchNorm2d(672) in eval mode: deterministic running stats + affine.
    # TODO(synk): training-mode BN (batch stats + running-stat updates) not modeled.
    c_bn = 512 + 128 + 32
    bn = {
        "gamma": 1.0 + 0.01 * jnp.arange(c_bn, dtype=jnp.float32) / c_bn,
        "beta": 0.01 * jnp.cos(jnp.arange(c_bn, dtype=jnp.float32)),
        "mean": 0.05 * jnp.sin(jnp.arange(c_bn, dtype=jnp.float32)),
        "var": 1.0 + 0.1 * (jnp.arange(c_bn, dtype=jnp.float32) % 7) / 7.0,
        "eps": 1e-5,
    }

    # pyramid_module: 3 levels (8x8 -> 4x4 -> 2x2), each output feeds a head.
    pyramid = [_make_layer(next(keys), c_bn, 64),
               _make_layer(next(keys), 64, 64),          # stride 2
               _make_layer(next(keys), 64, 64)]          # stride 2

    class_head = [_make_layer(next(keys), 64, anchors_per_loc * class_count)
                  for _ in range(3)]
    loc_head = [_make_layer(next(keys), 64, anchors_per_loc * 4) for _ in range(3)]

    return {"base": base, "extras": extras, "fusion": fusion, "bn": bn,
            "pyramid": pyramid, "class_head": class_head, "loc_head": loc_head}


def prepare_kernel_params(params):
    """BN folding, head merging, weight stacking/padding, dtype casts (done once)."""
    bf16, f32 = jnp.bfloat16, jnp.float32

    def w(layer):
        return layer["w"].astype(bf16)

    def b(layer):
        return layer["b"].reshape(-1, 1).astype(f32)

    base = params["base"]

    # pad layer-0 input channels up to a multiple of 8 (sublane friendly).
    w_b0 = base[0]["w"]
    cin = w_b0.shape[1]
    cin_pad = ((cin + 7) // 8) * 8
    w_b0 = jnp.pad(w_b0, ((0, 0), (0, cin_pad - cin)))

    kp = {
        "w_b0": w_b0.astype(bf16), "b_b0": b(base[0]),
        "w_mid": jnp.stack([w(base[i]) for i in range(1, 22)]),
        "b_mid": jnp.stack([b(base[i]) for i in range(1, 22)]),
        "w_b22": w(base[22]), "b_b22": b(base[22]),
        "w_b23": w(base[23]), "b_b23": b(base[23]),
        "w_b24": w(base[24]), "b_b24": b(base[24]),
        "w_e0": w(params["extras"][0]), "b_e0": b(params["extras"][0]),
        "w_e1": w(params["extras"][1]), "b_e1": b(params["extras"][1]),
        "w_f0": w(params["fusion"][0]), "b_f0": b(params["fusion"][0]),
        "w_f1": w(params["fusion"][1]), "b_f1": b(params["fusion"][1]),
        "w_f2": w(params["fusion"][2]), "b_f2": b(params["fusion"][2]),
    }

    # Fold eval-mode BatchNorm2d(672) into pyramid[0] (affine then 1x1 conv is linear).
    bn = params["bn"]
    bn_scale = bn["gamma"] / jnp.sqrt(bn["var"] + bn["eps"])
    bn_shift = bn["beta"] - bn["mean"] * bn_scale
    w_p0 = params["pyramid"][0]["w"]                       # (64, 672)
    b_p0 = params["pyramid"][0]["b"] + w_p0 @ bn_shift     # (64,)
    w_p0 = w_p0 * bn_scale[None, :]
    kp["w_p0a"] = w_p0[:, :512].astype(bf16)               # concat split: fusion0
    kp["w_p0b"] = w_p0[:, 512:640].astype(bf16)            # fusion1
    kp["w_p0c"] = w_p0[:, 640:].astype(bf16)               # fusion2 (upsampled)
    kp["b_p0"] = b_p0.reshape(-1, 1).astype(f32)

    kp["w_p1"] = w(params["pyramid"][1]); kp["b_p1"] = b(params["pyramid"][1])
    kp["w_p2"] = w(params["pyramid"][2]); kp["b_p2"] = b(params["pyramid"][2])

    # Merge (class | loc) head of each pyramid level into one matmul.
    for i in range(3):
        ch, lh = params["class_head"][i], params["loc_head"][i]
        kp[f"w_h{i}"] = jnp.concatenate([ch["w"], lh["w"]], axis=0).astype(bf16)
        kp[f"b_h{i}"] = jnp.concatenate([ch["b"], lh["b"]], axis=0).reshape(-1, 1).astype(f32)

    return kp


# ----------------------------------------------------------------------------
# Forward (mirrors ShuffleSSD.forward with mode='train')
# ----------------------------------------------------------------------------
@functools.partial(jax.jit, static_argnames=("class_count", "anchors_per_loc"))
def shuffle_ssd_forward(kparams, x_nchw, *, class_count, anchors_per_loc):
    B, C, H, W = x_nchw.shape
    bf16 = jnp.bfloat16

    # channels-on-sublane / spatial-on-lane layout: (Cin_pad, B*H*W)
    cin_pad = kparams["w_b0"].shape[1]
    x_cm = jnp.transpose(x_nchw, (1, 0, 2, 3)).reshape(C, B * H * W)
    x_cm = jnp.pad(x_cm, ((0, cin_pad - C), (0, 0))).astype(bf16)

    s0 = _stride2_op(B, H, W, bf16)                   # 16x16 -> 8x8
    s1 = _stride2_op(B, H // 2, W // 2, bf16)         # 8x8  -> 4x4
    up = _upsample2_op(B, H // 4, W // 4, bf16)       # 4x4  -> 8x8
    s2 = _stride2_op(B, H // 2, W // 2, bf16)         # 8x8  -> 4x4 (pyramid)
    s3 = _stride2_op(B, H // 4, W // 4, bf16)         # 4x4  -> 2x2 (pyramid)

    m1 = B * (H // 2) * (W // 2)
    m2 = B * (H // 4) * (W // 4)
    m3 = B * (H // 8) * (W // 8)
    n_head = kparams["w_h0"].shape[0]                 # anchors*(class_count + 4)

    args = [
        x_cm, s0, s1, up, s2, s3,
        kparams["w_b0"], kparams["b_b0"],
        kparams["w_mid"], kparams["b_mid"],
        kparams["w_b22"], kparams["b_b22"],
        kparams["w_b23"], kparams["b_b23"],
        kparams["w_b24"], kparams["b_b24"],
        kparams["w_e0"], kparams["b_e0"],
        kparams["w_e1"], kparams["b_e1"],
        kparams["w_f0"], kparams["b_f0"],
        kparams["w_f1"], kparams["b_f1"],
        kparams["w_f2"], kparams["b_f2"],
        kparams["w_p0a"], kparams["w_p0b"], kparams["w_p0c"], kparams["b_p0"],
        kparams["w_p1"], kparams["b_p1"],
        kparams["w_p2"], kparams["b_p2"],
        kparams["w_h0"], kparams["b_h0"],
        kparams["w_h1"], kparams["b_h1"],
        kparams["w_h2"], kparams["b_h2"],
    ]
    out_shape = (
        jax.ShapeDtypeStruct((n_head, m1), jnp.float32),
        jax.ShapeDtypeStruct((n_head, m2), jnp.float32),
        jax.ShapeDtypeStruct((n_head, m3), jnp.float32),
    )

    in_bytes = sum(int(a.size) * a.dtype.itemsize for a in args)
    out_bytes = sum(math.prod(s.shape) * jnp.dtype(s.dtype).itemsize for s in out_shape)

    # Single fused launch; whole arrays default to full VMEM blocks (no grid).
    h0, h1, h2 = pl.pallas_call(
        _shuffle_ssd_kernel,
        out_shape=out_shape,
        cost_estimate=pl.CostEstimate(
            flops=32_000_000,              # ~16M MACs x2 (rough, advisory only)
            transcendentals=0,
            bytes_accessed=int(in_bytes + out_bytes)),
    )(*args)

    # Heads: (A*C, B, h, w) -> (B, h, w, A*C) flatten, matching the reference's
    # permute(0, 2, 3, 1).contiguous().view(b, -1).
    ac = anchors_per_loc * class_count
    al = anchors_per_loc * 4
    cls_parts, loc_parts = [], []
    for h, (hh, ww) in zip((h0, h1, h2),
                           ((H // 2, W // 2), (H // 4, W // 4), (H // 8, W // 8))):
        cls_parts.append(
            jnp.transpose(h[:ac].reshape(ac, B, hh, ww), (1, 2, 3, 0)).reshape(B, -1))
        loc_parts.append(
            jnp.transpose(h[ac:].reshape(al, B, hh, ww), (1, 2, 3, 0)).reshape(B, -1))
    class_preds = jnp.concatenate(cls_parts, axis=1).reshape(B, -1, class_count)
    loc_preds = jnp.concatenate(loc_parts, axis=1).reshape(B, -1, 4)

    # TODO(synk): mode == 'test' branch (softmax + Detect NMS) not implemented;
    # this mirrors the 'train' path which returns the raw head tensors.
    return class_preds, loc_preds


# ----------------------------------------------------------------------------
# Pure-JAX/XLA reference forward (NCHW layout, natural structure) for checking
# ----------------------------------------------------------------------------
def _conv1x1_ref(layer, x, *, stride=1, relu=True):
    if stride == 2:
        x = x[:, :, ::2, ::2]
    w = layer["w"].astype(jnp.bfloat16)
    y = jnp.einsum("oi,bihw->bohw", w, x.astype(jnp.bfloat16),
                   preferred_element_type=jnp.float32)
    y = y + layer["b"][None, :, None, None]
    return jnp.maximum(y, 0.0) if relu else y


@functools.partial(jax.jit, static_argnames=("class_count",))
def shuffle_ssd_reference(params, x, *, class_count):
    B = x.shape[0]
    for i in range(22):
        x = _conv1x1_ref(params["base"][i], x)
    src0 = _conv1x1_ref(params["base"][22], x)
    t = _conv1x1_ref(params["base"][23], src0, stride=2)
    src1 = _conv1x1_ref(params["base"][24], t)
    e = _conv1x1_ref(params["extras"][0], src1, stride=2)
    src2 = _conv1x1_ref(params["extras"][1], e)

    f0 = _conv1x1_ref(params["fusion"][0], src0, stride=2, relu=False)
    f1 = _conv1x1_ref(params["fusion"][1], src1, relu=False)
    f2 = _conv1x1_ref(params["fusion"][2], src2, relu=False)
    f2 = jnp.repeat(jnp.repeat(f2, 2, axis=2), 2, axis=3)
    feats = jnp.concatenate([f0, f1, f2], axis=1)

    bn = params["bn"]
    scale = bn["gamma"] / jnp.sqrt(bn["var"] + bn["eps"])
    shift = bn["beta"] - bn["mean"] * scale
    feats = feats * scale[None, :, None, None] + shift[None, :, None, None]

    p0 = _conv1x1_ref(params["pyramid"][0], feats)
    p1 = _conv1x1_ref(params["pyramid"][1], p0, stride=2)
    p2 = _conv1x1_ref(params["pyramid"][2], p1, stride=2)

    cls_parts, loc_parts = [], []
    for i, p in enumerate((p0, p1, p2)):
        c = _conv1x1_ref(params["class_head"][i], p, relu=False)
        l = _conv1x1_ref(params["loc_head"][i], p, relu=False)
        cls_parts.append(jnp.transpose(c, (0, 2, 3, 1)).reshape(B, -1))
        loc_parts.append(jnp.transpose(l, (0, 2, 3, 1)).reshape(B, -1))
    class_preds = jnp.concatenate(cls_parts, 1).reshape(B, -1, class_count)
    loc_preds = jnp.concatenate(loc_parts, 1).reshape(B, -1, 4)
    return class_preds, loc_preds


if __name__ == "__main__":
    key = jax.random.PRNGKey(0)
    k_params, k_x = jax.random.split(key)
    class_count, anchors_per_loc = 3, 4

    params = build_shuffle_ssd_params(
        k_params, in_channels=4, class_count=class_count,
        anchors_per_loc=anchors_per_loc)
    kparams = prepare_kernel_params(params)

    # Input in PyTorch NCHW convention.
    x = jax.random.normal(k_x, (2, 4, 16, 16), jnp.float32)

    class_preds, loc_preds = shuffle_ssd_forward(
        kparams, x, class_count=class_count, anchors_per_loc=anchors_per_loc)
    jax.block_until_ready((class_preds, loc_preds))

    assert class_preds.shape == (2, 336, 3), class_preds.shape
    assert loc_preds.shape == (2, 336, 4), loc_preds.shape
    assert bool(jnp.all(jnp.isfinite(class_preds)))
    assert bool(jnp.all(jnp.isfinite(loc_preds)))

    # Correctness vs. a straightforward XLA reference (loose tolerance: the
    # kernel folds BN into bf16 weights, so a few tenths of a percent of bf16
    # rounding divergence is expected; structural bugs would be O(100%)).
    ref_cls, ref_loc = shuffle_ssd_reference(params, x, class_count=class_count)

    def _close(a, b, tol=0.05):
        scale = jnp.maximum(jnp.max(jnp.abs(b)), 1e-6)
        return bool(jnp.max(jnp.abs(a - b)) <= tol * scale + 1e-5)

    assert _close(class_preds, ref_cls), "class head mismatch vs reference"
    assert _close(loc_preds, ref_loc), "loc head mismatch vs reference"

    print("KERNEL_OK")
</pallas_src>

<mosaic_0001>
module attributes {stable_mosaic.version = 11 : i64} {
  func.func @_shuffle_ssd_kernel(%arg0: memref<8x512xbf16, #tpu.memory_space<vmem>>, %arg1: memref<512x128xbf16, #tpu.memory_space<vmem>>, %arg2: memref<128x32xbf16, #tpu.memory_space<vmem>>, %arg3: memref<32x128xbf16, #tpu.memory_space<vmem>>, %arg4: memref<128x32xbf16, #tpu.memory_space<vmem>>, %arg5: memref<32x8xbf16, #tpu.memory_space<vmem>>, %arg6: memref<16x8xbf16, #tpu.memory_space<vmem>>, %arg7: memref<16x1xf32, #tpu.memory_space<vmem>>, %arg8: memref<21x16x16xbf16, #tpu.memory_space<vmem>>, %arg9: memref<21x16x1xf32, #tpu.memory_space<vmem>>, %arg10: memref<32x16xbf16, #tpu.memory_space<vmem>>, %arg11: memref<32x1xf32, #tpu.memory_space<vmem>>, %arg12: memref<48x32xbf16, #tpu.memory_space<vmem>>, %arg13: memref<48x1xf32, #tpu.memory_space<vmem>>, %arg14: memref<64x48xbf16, #tpu.memory_space<vmem>>, %arg15: memref<64x1xf32, #tpu.memory_space<vmem>>, %arg16: memref<32x64xbf16, #tpu.memory_space<vmem>>, %arg17: memref<32x1xf32, #tpu.memory_space<vmem>>, %arg18: memref<32x32xbf16, #tpu.memory_space<vmem>>, %arg19: memref<32x1xf32, #tpu.memory_space<vmem>>, %arg20: memref<512x32xbf16, #tpu.memory_space<vmem>>, %arg21: memref<512x1xf32, #tpu.memory_space<vmem>>, %arg22: memref<128x64xbf16, #tpu.memory_space<vmem>>, %arg23: memref<128x1xf32, #tpu.memory_space<vmem>>, %arg24: memref<32x32xbf16, #tpu.memory_space<vmem>>, %arg25: memref<32x1xf32, #tpu.memory_space<vmem>>, %arg26: memref<64x512xbf16, #tpu.memory_space<vmem>>, %arg27: memref<64x128xbf16, #tpu.memory_space<vmem>>, %arg28: memref<64x32xbf16, #tpu.memory_space<vmem>>, %arg29: memref<64x1xf32, #tpu.memory_space<vmem>>, %arg30: memref<64x64xbf16, #tpu.memory_space<vmem>>, %arg31: memref<64x1xf32, #tpu.memory_space<vmem>>, %arg32: memref<64x64xbf16, #tpu.memory_space<vmem>>, %arg33: memref<64x1xf32, #tpu.memory_space<vmem>>, %arg34: memref<28x64xbf16, #tpu.memory_space<vmem>>, %arg35: memref<28x1xf32, #tpu.memory_space<vmem>>, %arg36: memref<28x64xbf16, #tpu.memory_space<vmem>>, %arg37: memref<28x1xf32, #tpu.memory_space<vmem>>, %arg38: memref<28x64xbf16, #tpu.memory_space<vmem>>, %arg39: memref<28x1xf32, #tpu.memory_space<vmem>>, %arg40: memref<28x128xf32, #tpu.memory_space<vmem>>, %arg41: memref<28x32xf32, #tpu.memory_space<vmem>>, %arg42: memref<28x8xf32, #tpu.memory_space<vmem>>) attributes {dimension_semantics = [], scalar_prefetch = 0 : i64, scratch_operands = 0 : i64, tpu.core_type = #tpu.core_type<tc>} {
    %c0 = arith.constant 0 : index
    %c0_0 = arith.constant 0 : index
    %0 = vector.load %arg6[%c0, %c0_0] : memref<16x8xbf16, #tpu.memory_space<vmem>>, vector<16x8xbf16>
    %c0_1 = arith.constant 0 : index
    %c0_2 = arith.constant 0 : index
    %1 = vector.load %arg7[%c0_1, %c0_2] : memref<16x1xf32, #tpu.memory_space<vmem>>, vector<16x1xf32>
    %c0_3 = arith.constant 0 : index
    %c0_4 = arith.constant 0 : index
    %2 = vector.load %arg0[%c0_3, %c0_4] : memref<8x512xbf16, #tpu.memory_space<vmem>>, vector<8x512xbf16>
    %cst = arith.constant dense<0.000000e+00> : vector<16x512xf32>
    %3 = tpu.matmul %0, %2, %cst {dimension_numbers = #tpu.dot_dimension_numbers<[1], [0], [0], [1], [0, 0, 1, 1], [], []>} : vector<16x8xbf16>, vector<8x512xbf16>, vector<16x512xf32> -> vector<16x512xf32>
    %4 = vector.broadcast %1 : vector<16x1xf32> to vector<16x512xf32>
    %5 = arith.addf %3, %4 : vector<16x512xf32>
    %cst_5 = arith.constant 0.000000e+00 : f32
    %6 = vector.broadcast %cst_5 : f32 to vector<16x512xf32>
    %7 = arith.maximumf %5, %6 : vector<16x512xf32>
    %c0_6 = arith.constant 0 : index
    %c0_7 = arith.constant 0 : index
    %c0_8 = arith.constant 0 : index
    %8 = vector.load %arg8[%c0_6, %c0_7, %c0_8] : memref<21x16x16xbf16, #tpu.memory_space<vmem>>, vector<1x16x16xbf16>
    %9 = vector.shape_cast %8 : vector<1x16x16xbf16> to vector<16x16xbf16>
    %c0_9 = arith.constant 0 : index
    %c0_10 = arith.constant 0 : index
    %c0_11 = arith.constant 0 : index
    %10 = vector.load %arg9[%c0_9, %c0_10, %c0_11] : memref<21x16x1xf32, #tpu.memory_space<vmem>>, vector<1x16x1xf32>
    %11 = vector.shape_cast %10 : vector<1x16x1xf32> to vector<16x1xf32>
    %12 = arith.truncf %7 : vector<16x512xf32> to vector<16x512xbf16>
    %cst_12 = arith.constant dense<0.000000e+00> : vector<16x512xf32>
    %13 = tpu.matmul %9, %12, %cst_12 {dimension_numbers = #tpu.dot_dimension_numbers<[1], [0], [0], [1], [0, 0, 1, 1], [], []>} : vector<16x16xbf16>, vector<16x512xbf16>, vector<16x512xf32> -> vector<16x512xf32>
    %14 = vector.broadcast %11 : vector<16x1xf32> to vector<16x512xf32>
    %15 = arith.addf %13, %14 : vector<16x512xf32>
    %cst_13 = arith.constant 0.000000e+00 : f32
    %16 = vector.broadcast %cst_13 : f32 to vector<16x512xf32>
    %17 = arith.maximumf %15, %16 : vector<16x512xf32>
    %c1 = arith.constant 1 : index
    %c0_14 = arith.constant 0 : index
    %c0_15 = arith.constant 0 : index
    %18 = vector.load %arg8[%c1, %c0_14, %c0_15] : memref<21x16x16xbf16, #tpu.memory_space<vmem>>, vector<1x16x16xbf16>
    %19 = vector.shape_cast %18 : vector<1x16x16xbf16> to vector<16x16xbf16>
    %c1_16 = arith.constant 1 : index
    %c0_17 = arith.constant 0 : index
    %c0_18 = arith.constant 0 : index
    %20 = vector.load %arg9[%c1_16, %c0_17, %c0_18] : memref<21x16x1xf32, #tpu.memory_space<vmem>>, vector<1x16x1xf32>
    %21 = vector.shape_cast %20 : vector<1x16x1xf32> to vector<16x1xf32>
    %22 = arith.truncf %17 : vector<16x512xf32> to vector<16x512xbf16>
    %cst_19 = arith.constant dense<0.000000e+00> : vector<16x512xf32>
    %23 = tpu.matmul %19, %22, %cst_19 {dimension_numbers = #tpu.dot_dimension_numbers<[1], [0], [0], [1], [0, 0, 1, 1], [], []>} : vector<16x16xbf16>, vector<16x512xbf16>, vector<16x512xf32> -> vector<16x512xf32>
    %24 = vector.broadcast %21 : vector<16x1xf32> to vector<16x512xf32>
    %25 = arith.addf %23, %24 : vector<16x512xf32>
    %cst_20 = arith.constant 0.000000e+00 : f32
    %26 = vector.broadcast %cst_20 : f32 to vector<16x512xf32>
    %27 = arith.maximumf %25, %26 : vector<16x512xf32>
    %c2 = arith.constant 2 : index
    %c0_21 = arith.constant 0 : index
    %c0_22 = arith.constant 0 : index
    %28 = vector.load %arg8[%c2, %c0_21, %c0_22] : memref<21x16x16xbf16, #tpu.memory_space<vmem>>, vector<1x16x16xbf16>
    %29 = vector.shape_cast %28 : vector<1x16x16xbf16> to vector<16x16xbf16>
    %c2_23 = arith.constant 2 : index
    %c0_24 = arith.constant 0 : index
    %c0_25 = arith.constant 0 : index
    %30 = vector.load %arg9[%c2_23, %c0_24, %c0_25] : memref<21x16x1xf32, #tpu.memory_space<vmem>>, vector<1x16x1xf32>
    %31 = vector.shape_cast %30 : vector<1x16x1xf32> to vector<16x1xf32>
    %32 = arith.truncf %27 : vector<16x512xf32> to vector<16x512xbf16>
    %cst_26 = arith.constant dense<0.000000e+00> : vector<16x512xf32>
    %33 = tpu.matmul %29, %32, %cst_26 {dimension_numbers = #tpu.dot_dimension_numbers<[1], [0], [0], [1], [0, 0, 1, 1], [], []>} : vector<16x16xbf16>, vector<16x512xbf16>, vector<16x512xf32> -> vector<16x512xf32>
    %34 = vector.broadcast %31 : vector<16x1xf32> to vector<16x512xf32>
    %35 = arith.addf %33, %34 : vector<16x512xf32>
    %cst_27 = arith.constant 0.000000e+00 : f32
    %36 = vector.broadcast %cst_27 : f32 to vector<16x512xf32>
    %37 = arith.maximumf %35, %36 : vector<16x512xf32>
    %c3 = arith.constant 3 : index
    %c0_28 = arith.constant 0 : index
    %c0_29 = arith.constant 0 : index
    %38 = vector.load %arg8[%c3, %c0_28, %c0_29] : memref<21x16x16xbf16, #tpu.memory_space<vmem>>, vector<1x16x16xbf16>
    %39 = vector.shape_cast %38 : vector<1x16x16xbf16> to vector<16x16xbf16>
    %c3_30 = arith.constant 3 : index
    %c0_31 = arith.constant 0 : index
    %c0_32 = arith.constant 0 : index
    %40 = vector.load %arg9[%c3_30, %c0_31, %c0_32] : memref<21x16x1xf32, #tpu.memory_space<vmem>>, vector<1x16x1xf32>
    %41 = vector.shape_cast %40 : vector<1x16x1xf32> to vector<16x1xf32>
    %42 = arith.truncf %37 : vector<16x512xf32> to vector<16x512xbf16>
    %cst_33 = arith.constant dense<0.000000e+00> : vector<16x512xf32>
    %43 = tpu.matmul %39, %42, %cst_33 {dimension_numbers = #tpu.dot_dimension_numbers<[1], [0], [0], [1], [0, 0, 1, 1], [], []>} : vector<16x16xbf16>, vector<16x512xbf16>, vector<16x512xf32> -> vector<16x512xf32>
    %44 = vector.broadcast %41 : vector<16x1xf32> to vector<16x512xf32>
    %45 = arith.addf %43, %44 : vector<16x512xf32>
    %cst_34 = arith.constant 0.000000e+00 : f32
    %46 = vector.broadcast %cst_34 : f32 to vector<16x512xf32>
    %47 = arith.maximumf %45, %46 : vector<16x512xf32>
    %c4 = arith.constant 4 : index
    %c0_35 = arith.constant 0 : index
    %c0_36 = arith.constant 0 : index
    %48 = vector.load %arg8[%c4, %c0_35, %c0_36] : memref<21x16x16xbf16, #tpu.memory_space<vmem>>, vector<1x16x16xbf16>
    %49 = vector.shape_cast %48 : vector<1x16x16xbf16> to vector<16x16xbf16>
    %c4_37 = arith.constant 4 : index
    %c0_38 = arith.constant 0 : index
    %c0_39 = arith.constant 0 : index
    %50 = vector.load %arg9[%c4_37, %c0_38, %c0_39] : memref<21x16x1xf32, #tpu.memory_space<vmem>>, vector<1x16x1xf32>
    %51 = vector.shape_cast %50 : vector<1x16x1xf32> to vector<16x1xf32>
    %52 = arith.truncf %47 : vector<16x512xf32> to vector<16x512xbf16>
    %cst_40 = arith.constant dense<0.000000e+00> : vector<16x512xf32>
    %53 = tpu.matmul %49, %52, %cst_40 {dimension_numbers = #tpu.dot_dimension_numbers<[1], [0], [0], [1], [0, 0, 1, 1], [], []>} : vector<16x16xbf16>, vector<16x512xbf16>, vector<16x512xf32> -> vector<16x512xf32>
    %54 = vector.broadcast %51 : vector<16x1xf32> to vector<16x512xf32>
    %55 = arith.addf %53, %54 : vector<16x512xf32>
    %cst_41 = arith.constant 0.000000e+00 : f32
    %56 = vector.broadcast %cst_41 : f32 to vector<16x512xf32>
    %57 = arith.maximumf %55, %56 : vector<16x512xf32>
    %c5 = arith.constant 5 : index
    %c0_42 = arith.constant 0 : index
    %c0_43 = arith.constant 0 : index
    %58 = vector.load %arg8[%c5, %c0_42, %c0_43] : memref<21x16x16xbf16, #tpu.memory_space<vmem>>, vector<1x16x16xbf16>
    %59 = vector.shape_cast %58 : vector<1x16x16xbf16> to vector<16x16xbf16>
    %c5_44 = arith.constant 5 : index
    %c0_45 = arith.constant 0 : index
    %c0_46 = arith.constant 0 : index
    %60 = vector.load %arg9[%c5_44, %c0_45, %c0_46] : memref<21x16x1xf32, #tpu.memory_space<vmem>>, vector<1x16x1xf32>
    %61 = vector.shape_cast %60 : vector<1x16x1xf32> to vector<16x1xf32>
    %62 = arith.truncf %57 : vector<16x512xf32> to vector<16x512xbf16>
    %cst_47 = arith.constant dense<0.000000e+00> : vector<16x512xf32>
    %63 = tpu.matmul %59, %62, %cst_47 {dimension_numbers = #tpu.dot_dimension_numbers<[1], [0], [0], [1], [0, 0, 1, 1], [], []>} : vector<16x16xbf16>, vector<16x512xbf16>, vector<16x512xf32> -> vector<16x512xf32>
    %64 = vector.broadcast %61 : vector<16x1xf32> to vector<16x512xf32>
    %65 = arith.addf %63, %64 : vector<16x512xf32>
    %cst_48 = arith.constant 0.000000e+00 : f32
    %66 = vector.broadcast %cst_48 : f32 to vector<16x512xf32>
    %67 = arith.maximumf %65, %66 : vector<16x512xf32>
    %c6 = arith.constant 6 : index
    %c0_49 = arith.constant 0 : index
    %c0_50 = arith.constant 0 : index
    %68 = vector.load %arg8[%c6, %c0_49, %c0_50] : memref<21x16x16xbf16, #tpu.memory_space<vmem>>, vector<1x16x16xbf16>
    %69 = vector.shape_cast %68 : vector<1x16x16xbf16> to vector<16x16xbf16>
    %c6_51 = arith.constant 6 : index
    %c0_52 = arith.constant 0 : index
    %c0_53 = arith.constant 0 : index
    %70 = vector.load %arg9[%c6_51, %c0_52, %c0_53] : memref<21x16x1xf32, #tpu.memory_space<vmem>>, vector<1x16x1xf32>
    %71 = vector.shape_cast %70 : vector<1x16x1xf32> to vector<16x1xf32>
    %72 = arith.truncf %67 : vector<16x512xf32> to vector<16x512xbf16>
    %cst_54 = arith.constant dense<0.000000e+00> : vector<16x512xf32>
    %73 = tpu.matmul %69, %72, %cst_54 {dimension_numbers = #tpu.dot_dimension_numbers<[1], [0], [0], [1], [0, 0, 1, 1], [], []>} : vector<16x16xbf16>, vector<16x512xbf16>, vector<16x512xf32> -> vector<16x512xf32>
    %74 = vector.broadcast %71 : vector<16x1xf32> to vector<16x512xf32>
    %75 = arith.addf %73, %74 : vector<16x512xf32>
    %cst_55 = arith.constant 0.000000e+00 : f32
    %76 = vector.broadcast %cst_55 : f32 to vector<16x512xf32>
    %77 = arith.maximumf %75, %76 : vector<16x512xf32>
    %c7 = arith.constant 7 : index
    %c0_56 = arith.constant 0 : index
    %c0_57 = arith.constant 0 : index
    %78 = vector.load %arg8[%c7, %c0_56, %c0_57] : memref<21x16x16xbf16, #tpu.memory_space<vmem>>, vector<1x16x16xbf16>
    %79 = vector.shape_cast %78 : vector<1x16x16xbf16> to vector<16x16xbf16>
    %c7_58 = arith.constant 7 : index
    %c0_59 = arith.constant 0 : index
    %c0_60 = arith.constant 0 : index
    %80 = vector.load %arg9[%c7_58, %c0_59, %c0_60] : memref<21x16x1xf32, #tpu.memory_space<vmem>>, vector<1x16x1xf32>
    %81 = vector.shape_cast %80 : vector<1x16x1xf32> to vector<16x1xf32>
    %82 = arith.truncf %77 : vector<16x512xf32> to vector<16x512xbf16>
    %cst_61 = arith.constant dense<0.000000e+00> : vector<16x512xf32>
    %83 = tpu.matmul %79, %82, %cst_61 {dimension_numbers = #tpu.dot_dimension_numbers<[1], [0], [0], [1], [0, 0, 1, 1], [], []>} : vector<16x16xbf16>, vector<16x512xbf16>, vector<16x512xf32> -> vector<16x512xf32>
    %84 = vector.broadcast %81 : vector<16x1xf32> to vector<16x512xf32>
    %85 = arith.addf %83, %84 : vector<16x512xf32>
    %cst_62 = arith.constant 0.000000e+00 : f32
    %86 = vector.broadcast %cst_62 : f32 to vector<16x512xf32>
    %87 = arith.maximumf %85, %86 : vector<16x512xf32>
    %c8 = arith.constant 8 : index
    %c0_63 = arith.constant 0 : index
    %c0_64 = arith.constant 0 : index
    %88 = vector.load %arg8[%c8, %c0_63, %c0_64] : memref<21x16x16xbf16, #tpu.memory_space<vmem>>, vector<1x16x16xbf16>
    %89 = vector.shape_cast %88 : vector<1x16x16xbf16> to vector<16x16xbf16>
    %c8_65 = arith.constant 8 : index
    %c0_66 = arith.constant 0 : index
    %c0_67 = arith.constant 0 : index
    %90 = vector.load %arg9[%c8_65, %c0_66, %c0_67] : memref<21x16x1xf32, #tpu.memory_space<vmem>>, vector<1x16x1xf32>
    %91 = vector.shape_cast %90 : vector<1x16x1xf32> to vector<16x1xf32>
    %92 = arith.truncf %87 : vector<16x512xf32> to vector<16x512xbf16>
    %cst_68 = arith.constant dense<0.000000e+00> : vector<16x512xf32>
    %93 = tpu.matmul %89, %92, %cst_68 {dimension_numbers = #tpu.dot_dimension_numbers<[1], [0], [0], [1], [0, 0, 1, 1], [], []>} : vector<16x16xbf16>, vector<16x512xbf16>, vector<16x512xf32> -> vector<16x512xf32>
    %94 = vector.broadcast %91 : vector<16x1xf32> to vector<16x512xf32>
    %95 = arith.addf %93, %94 : vector<16x512xf32>
    %cst_69 = arith.constant 0.000000e+00 : f32
    %96 = vector.broadcast %cst_69 : f32 to vector<16x512xf32>
    %97 = arith.maximumf %95, %96 : vector<16x512xf32>
    %c9 = arith.constant 9 : index
    %c0_70 = arith.constant 0 : index
    %c0_71 = arith.constant 0 : index
    %98 = vector.load %arg8[%c9, %c0_70, %c0_71] : memref<21x16x16xbf16, #tpu.memory_space<vmem>>, vector<1x16x16xbf16>
    %99 = vector.shape_cast %98 : vector<1x16x16xbf16> to vector<16x16xbf16>
    %c9_72 = arith.constant 9 : index
    %c0_73 = arith.constant 0 : index
    %c0_74 = arith.constant 0 : index
    %100 = vector.load %arg9[%c9_72, %c0_73, %c0_74] : memref<21x16x1xf32, #tpu.memory_space<vmem>>, vector<1x16x1xf32>
    %101 = vector.shape_cast %100 : vector<1x16x1xf32> to vector<16x1xf32>
    %102 = arith.truncf %97 : vector<16x512xf32> to vector<16x512xbf16>
    %cst_75 = arith.constant dense<0.000000e+00> : vector<16x512xf32>
    %103 = tpu.matmul %99, %102, %cst_75 {dimension_numbers = #tpu.dot_dimension_numbers<[1], [0], [0], [1], [0, 0, 1, 1], [], []>} : vector<16x16xbf16>, vector<16x512xbf16>, vector<16x512xf32> -> vector<16x512xf32>
    %104 = vector.broadcast %101 : vector<16x1xf32> to vector<16x512xf32>
    %105 = arith.addf %103, %104 : vector<16x512xf32>
    %cst_76 = arith.constant 0.000000e+00 : f32
    %106 = vector.broadcast %cst_76 : f32 to vector<16x512xf32>
    %107 = arith.maximumf %105, %106 : vector<16x512xf32>
    %c10 = arith.constant 10 : index
    %c0_77 = arith.constant 0 : index
    %c0_78 = arith.constant 0 : index
    %108 = vector.load %arg8[%c10, %c0_77, %c0_78] : memref<21x16x16xbf16, #tpu.memory_space<vmem>>, vector<1x16x16xbf16>
    %109 = vector.shape_cast %108 : vector<1x16x16xbf16> to vector<16x16xbf16>
    %c10_79 = arith.constant 10 : index
    %c0_80 = arith.constant 0 : index
    %c0_81 = arith.constant 0 : index
    %110 = vector.load %arg9[%c10_79, %c0_80, %c0_81] : memref<21x16x1xf32, #tpu.memory_space<vmem>>, vector<1x16x1xf32>
    %111 = vector.shape_cast %110 : vector<1x16x1xf32> to vector<16x1xf32>
    %112 = arith.truncf %107 : vector<16x512xf32> to vector<16x512xbf16>
    %cst_82 = arith.constant dense<0.000000e+00> : vector<16x512xf32>
    %113 = tpu.matmul %109, %112, %cst_82 {dimension_numbers = #tpu.dot_dimension_numbers<[1], [0], [0], [1], [0, 0, 1, 1], [], []>} : vector<16x16xbf16>, vector<16x512xbf16>, vector<16x512xf32> -> vector<16x512xf32>
    %114 = vector.broadcast %111 : vector<16x1xf32> to vector<16x512xf32>
    %115 = arith.addf %113, %114 : vector<16x512xf32>
    %cst_83 = arith.constant 0.000000e+00 : f32
    %116 = vector.broadcast %cst_83 : f32 to vector<16x512xf32>
    %117 = arith.maximumf %115, %116 : vector<16x512xf32>
    %c11 = arith.constant 11 : index
    %c0_84 = arith.constant 0 : index
    %c0_85 = arith.constant 0 : index
    %118 = vector.load %arg8[%c11, %c0_84, %c0_85] : memref<21x16x16xbf16, #tpu.memory_space<vmem>>, vector<1x16x16xbf16>
    %119 = vector.shape_cast %118 : vector<1x16x16xbf16> to vector<16x16xbf16>
    %c11_86 = arith.constant 11 : index
    %c0_87 = arith.constant 0 : index
    %c0_88 = arith.constant 0 : index
    %120 = vector.load %arg9[%c11_86, %c0_87, %c0_88] : memref<21x16x1xf32, #tpu.memory_space<vmem>>, vector<1x16x1xf32>
    %121 = vector.shape_cast %120 : vector<1x16x1xf32> to vector<16x1xf32>
    %122 = arith.truncf %117 : vector<16x512xf32> to vector<16x512xbf16>
    %cst_89 = arith.constant dense<0.000000e+00> : vector<16x512xf32>
    %123 = tpu.matmul %119, %122, %cst_89 {dimension_numbers = #tpu.dot_dimension_numbers<[1], [0], [0], [1], [0, 0, 1, 1], [], []>} : vector<16x16xbf16>, vector<16x512xbf16>, vector<16x512xf32> -> vector<16x512xf32>
    %124 = vector.broadcast %121 : vector<16x1xf32> to vector<16x512xf32>
    %125 = arith.addf %123, %124 : vector<16x512xf32>
    %cst_90 = arith.constant 0.000000e+00 : f32
    %126 = vector.broadcast %cst_90 : f32 to vector<16x512xf32>
    %127 = arith.maximumf %125, %126 : vector<16x512xf32>
    %c12 = arith.constant 12 : index
    %c0_91 = arith.constant 0 : index
    %c0_92 = arith.constant 0 : index
    %128 = vector.load %arg8[%c12, %c0_91, %c0_92] : memref<21x16x16xbf16, #tpu.memory_space<vmem>>, vector<1x16x16xbf16>
    %129 = vector.shape_cast %128 : vector<1x16x16xbf16> to vector<16x16xbf16>
    %c12_93 = arith.constant 12 : index
    %c0_94 = arith.constant 0 : index
    %c0_95 = arith.constant 0 : index
    %130 = vector.load %arg9[%c12_93, %c0_94, %c0_95] : memref<21x16x1xf32, #tpu.memory_space<vmem>>, vector<1x16x1xf32>
    %131 = vector.shape_cast %130 : vector<1x16x1xf32> to vector<16x1xf32>
    %132 = arith.truncf %127 : vector<16x512xf32> to vector<16x512xbf16>
    %cst_96 = arith.constant dense<0.000000e+00> : vector<16x512xf32>
    %133 = tpu.matmul %129, %132, %cst_96 {dimension_numbers = #tpu.dot_dimension_numbers<[1], [0], [0], [1], [0, 0, 1, 1], [], []>} : vector<16x16xbf16>, vector<16x512xbf16>, vector<16x512xf32> -> vector<16x512xf32>
    %134 = vector.broadcast %131 : vector<16x1xf32> to vector<16x512xf32>
    %135 = arith.addf %133, %134 : vector<16x512xf32>
    %cst_97 = arith.constant 0.000000e+00 : f32
    %136 = vector.broadcast %cst_97 : f32 to vector<16x512xf32>
    %137 = arith.maximumf %135, %136 : vector<16x512xf32>
    %c13 = arith.constant 13 : index
    %c0_98 = arith.constant 0 : index
    %c0_99 = arith.constant 0 : index
    %138 = vector.load %arg8[%c13, %c0_98, %c0_99] : memref<21x16x16xbf16, #tpu.memory_space<vmem>>, vector<1x16x16xbf16>
    %139 = vector.shape_cast %138 : vector<1x16x16xbf16> to vector<16x16xbf16>
    %c13_100 = arith.constant 13 : index
    %c0_101 = arith.constant 0 : index
    %c0_102 = arith.constant 0 : index
    %140 = vector.load %arg9[%c13_100, %c0_101, %c0_102] : memref<21x16x1xf32, #tpu.memory_space<vmem>>, vector<1x16x1xf32>
    %141 = vector.shape_cast %140 : vector<1x16x1xf32> to vector<16x1xf32>
    %142 = arith.truncf %137 : vector<16x512xf32> to vector<16x512xbf16>
    %cst_103 = arith.constant dense<0.000000e+00> : vector<16x512xf32>
    %143 = tpu.matmul %139, %142, %cst_103 {dimension_numbers = #tpu.dot_dimension_numbers<[1], [0], [0], [1], [0, 0, 1, 1], [], []>} : vector<16x16xbf16>, vector<16x512xbf16>, vector<16x512xf32> -> vector<16x512xf32>
    %144 = vector.broadcast %141 : vector<16x1xf32> to vector<16x512xf32>
    %145 = arith.addf %143, %144 : vector<16x512xf32>
    %cst_104 = arith.constant 0.000000e+00 : f32
    %146 = vector.broadcast %cst_104 : f32 to vector<16x512xf32>
    %147 = arith.maximumf %145, %146 : vector<16x512xf32>
    %c14 = arith.constant 14 : index
    %c0_105 = arith.constant 0 : index
    %c0_106 = arith.constant 0 : index
    %148 = vector.load %arg8[%c14, %c0_105, %c0_106] : memref<21x16x16xbf16, #tpu.memory_space<vmem>>, vector<1x16x16xbf16>
    %149 = vector.shape_cast %148 : vector<1x16x16xbf16> to vector<16x16xbf16>
    %c14_107 = arith.constant 14 : index
    %c0_108 = arith.constant 0 : index
    %c0_109 = arith.constant 0 : index
    %150 = vector.load %arg9[%c14_107, %c0_108, %c0_109] : memref<21x16x1xf32, #tpu.memory_space<vmem>>, vector<1x16x1xf32>
    %151 = vector.shape_cast %150 : vector<1x16x1xf32> to vector<16x1xf32>
    %152 = arith.truncf %147 : vector<16x512xf32> to vector<16x512xbf16>
    %cst_110 = arith.constant dense<0.000000e+00> : vector<16x512xf32>
    %153 = tpu.matmul %149, %152, %cst_110 {dimension_numbers = #tpu.dot_dimension_numbers<[1], [0], [0], [1], [0, 0, 1, 1], [], []>} : vector<16x16xbf16>, vector<16x512xbf16>, vector<16x512xf32> -> vector<16x512xf32>
    %154 = vector.broadcast %151 : vector<16x1xf32> to vector<16x512xf32>
    %155 = arith.addf %153, %154 : vector<16x512xf32>
    %cst_111 = arith.constant 0.000000e+00 : f32
    %156 = vector.broadcast %cst_111 : f32 to vector<16x512xf32>
    %157 = arith.maximumf %155, %156 : vector<16x512xf32>
    %c15 = arith.constant 15 : index
    %c0_112 = arith.constant 0 : index
    %c0_113 = arith.constant 0 : index
    %158 = vector.load %arg8[%c15, %c0_112, %c0_113] : memref<21x16x16xbf16, #tpu.memory_space<vmem>>, vector<1x16x16xbf16>
    %159 = vector.shape_cast %158 : vector<1x16x16xbf16> to vector<16x16xbf16>
    %c15_114 = arith.constant 15 : index
    %c0_115 = arith.constant 0 : index
    %c0_116 = arith.constant 0 : index
    %160 = vector.load %arg9[%c15_114, %c0_115, %c0_116] : memref<21x16x1xf32, #tpu.memory_space<vmem>>, vector<1x16x1xf32>
    %161 = vector.shape_cast %160 : vector<1x16x1xf32> to vector<16x1xf32>
    %162 = arith.truncf %157 : vector<16x512xf32> to vector<16x512xbf16>
    %cst_117 = arith.constant dense<0.000000e+00> : vector<16x512xf32>
    %163 = tpu.matmul %159, %162, %cst_117 {dimension_numbers = #tpu.dot_dimension_numbers<[1], [0], [0], [1], [0, 0, 1, 1], [], []>} : vector<16x16xbf16>, vector<16x512xbf16>, vector<16x512xf32> -> vector<16x512xf32>
    %164 = vector.broadcast %161 : vector<16x1xf32> to vector<16x512xf32>
    %165 = arith.addf %163, %164 : vector<16x512xf32>
    %cst_118 = arith.constant 0.000000e+00 : f32
    %166 = vector.broadcast %cst_118 : f32 to vector<16x512xf32>
    %167 = arith.maximumf %165, %166 : vector<16x512xf32>
    %c16 = arith.constant 16 : index
    %c0_119 = arith.constant 0 : index
    %c0_120 = arith.constant 0 : index
    %168 = vector.load %arg8[%c16, %c0_119, %c0_120] : memref<21x16x16xbf16, #tpu.memory_space<vmem>>, vector<1x16x16xbf16>
    %169 = vector.shape_cast %168 : vector<1x16x16xbf16> to vector<16x16xbf16>
    %c16_121 = arith.constant 16 : index
    %c0_122 = arith.constant 0 : index
    %c0_123 = arith.constant 0 : index
    %170 = vector.load %arg9[%c16_121, %c0_122, %c0_123] : memref<21x16x1xf32, #tpu.memory_space<vmem>>, vector<1x16x1xf32>
    %171 = vector.shape_cast %170 : vector<1x16x1xf32> to vector<16x1xf32>
    %172 = arith.truncf %167 : vector<16x512xf32> to vector<16x512xbf16>
    %cst_124 = arith.constant dense<0.000000e+00> : vector<16x512xf32>
    %173 = tpu.matmul %169, %172, %cst_124 {dimension_numbers = #tpu.dot_dimension_numbers<[1], [0], [0], [1], [0, 0, 1, 1], [], []>} : vector<16x16xbf16>, vector<16x512xbf16>, vector<16x512xf32> -> vector<16x512xf32>
    %174 = vector.broadcast %171 : vector<16x1xf32> to vector<16x512xf32>
    %175 = arith.addf %173, %174 : vector<16x512xf32>
    %cst_125 = arith.constant 0.000000e+00 : f32
    %176 = vector.broadcast %cst_125 : f32 to vector<16x512xf32>
    %177 = arith.maximumf %175, %176 : vector<16x512xf32>
    %c17 = arith.constant 17 : index
    %c0_126 = arith.constant 0 : index
    %c0_127 = arith.constant 0 : index
    %178 = vector.load %arg8[%c17, %c0_126, %c0_127] : memref<21x16x16xbf16, #tpu.memory_space<vmem>>, vector<1x16x16xbf16>
    %179 = vector.shape_cast %178 : vector<1x16x16xbf16> to vector<16x16xbf16>
    %c17_128 = arith.constant 17 : index
    %c0_129 = arith.constant 0 : index
    %c0_130 = arith.constant 0 : index
    %180 = vector.load %arg9[%c17_128, %c0_129, %c0_130] : memref<21x16x1xf32, #tpu.memory_space<vmem>>, vector<1x16x1xf32>
    %181 = vector.shape_cast %180 : vector<1x16x1xf32> to vector<16x1xf32>
    %182 = arith.truncf %177 : vector<16x512xf32> to vector<16x512xbf16>
    %cst_131 = arith.constant dense<0.000000e+00> : vector<16x512xf32>
    %183 = tpu.matmul %179, %182, %cst_131 {dimension_numbers = #tpu.dot_dimension_numbers<[1], [0], [0], [1], [0, 0, 1, 1], [], []>} : vector<16x16xbf16>, vector<16x512xbf16>, vector<16x512xf32> -> vector<16x512xf32>
    %184 = vector.broadcast %181 : vector<16x1xf32> to vector<16x512xf32>
    %185 = arith.addf %183, %184 : vector<16x512xf32>
    %cst_132 = arith.constant 0.000000e+00 : f32
    %186 = vector.broadcast %cst_132 : f32 to vector<16x512xf32>
    %187 = arith.maximumf %185, %186 : vector<16x512xf32>
    %c18 = arith.constant 18 : index
    %c0_133 = arith.constant 0 : index
    %c0_134 = arith.constant 0 : index
    %188 = vector.load %arg8[%c18, %c0_133, %c0_134] : memref<21x16x16xbf16, #tpu.memory_space<vmem>>, vector<1x16x16xbf16>
    %189 = vector.shape_cast %188 : vector<1x16x16xbf16> to vector<16x16xbf16>
    %c18_135 = arith.constant 18 : index
    %c0_136 = arith.constant 0 : index
    %c0_137 = arith.constant 0 : index
    %190 = vector.load %arg9[%c18_135, %c0_136, %c0_137] : memref<21x16x1xf32, #tpu.memory_space<vmem>>, vector<1x16x1xf32>
    %191 = vector.shape_cast %190 : vector<1x16x1xf32> to vector<16x1xf32>
    %192 = arith.truncf %187 : vector<16x512xf32> to vector<16x512xbf16>
    %cst_138 = arith.constant dense<0.000000e+00> : vector<16x512xf32>
    %193 = tpu.matmul %189, %192, %cst_138 {dimension_numbers = #tpu.dot_dimension_numbers<[1], [0], [0], [1], [0, 0, 1, 1], [], []>} : vector<16x16xbf16>, vector<16x512xbf16>, vector<16x512xf32> -> vector<16x512xf32>
    %194 = vector.broadcast %191 : vector<16x1xf32> to vector<16x512xf32>
    %195 = arith.addf %193, %194 : vector<16x512xf32>
    %cst_139 = arith.constant 0.000000e+00 : f32
    %196 = vector.broadcast %cst_139 : f32 to vector<16x512xf32>
    %197 = arith.maximumf %195, %196 : vector<16x512xf32>
    %c19 = arith.constant 19 : index
    %c0_140 = arith.constant 0 : index
    %c0_141 = arith.constant 0 : index
    %198 = vector.load %arg8[%c19, %c0_140, %c0_141] : memref<21x16x16xbf16, #tpu.memory_space<vmem>>, vector<1x16x16xbf16>
    %199 = vector.shape_cast %198 : vector<1x16x16xbf16> to vector<16x16xbf16>
    %c19_142 = arith.constant 19 : index
    %c0_143 = arith.constant 0 : index
    %c0_144 = arith.constant 0 : index
    %200 = vector.load %arg9[%c19_142, %c0_143, %c0_144] : memref<21x16x1xf32, #tpu.memory_space<vmem>>, vector<1x16x1xf32>
    %201 = vector.shape_cast %200 : vector<1x16x1xf32> to vector<16x1xf32>
    %202 = arith.truncf %197 : vector<16x512xf32> to vector<16x512xbf16>
    %cst_145 = arith.constant dense<0.000000e+00> : vector<16x512xf32>
    %203 = tpu.matmul %199, %202, %cst_145 {dimension_numbers = #tpu.dot_dimension_numbers<[1], [0], [0], [1], [0, 0, 1, 1], [], []>} : vector<16x16xbf16>, vector<16x512xbf16>, vector<16x512xf32> -> vector<16x512xf32>
    %204 = vector.broadcast %201 : vector<16x1xf32> to vector<16x512xf32>
    %205 = arith.addf %203, %204 : vector<16x512xf32>
    %cst_146 = arith.constant 0.000000e+00 : f32
    %206 = vector.broadcast %cst_146 : f32 to vector<16x512xf32>
    %207 = arith.maximumf %205, %206 : vector<16x512xf32>
    %c20 = arith.constant 20 : index
    %c0_147 = arith.constant 0 : index
    %c0_148 = arith.constant 0 : index
    %208 = vector.load %arg8[%c20, %c0_147, %c0_148] : memref<21x16x16xbf16, #tpu.memory_space<vmem>>, vector<1x16x16xbf16>
    %209 = vector.shape_cast %208 : vector<1x16x16xbf16> to vector<16x16xbf16>
    %c20_149 = arith.constant 20 : index
    %c0_150 = arith.constant 0 : index
    %c0_151 = arith.constant 0 : index
    %210 = vector.load %arg9[%c20_149, %c0_150, %c0_151] : memref<21x16x1xf32, #tpu.memory_space<vmem>>, vector<1x16x1xf32>
    %211 = vector.shape_cast %210 : vector<1x16x1xf32> to vector<16x1xf32>
    %212 = arith.truncf %207 : vector<16x512xf32> to vector<16x512xbf16>
    %cst_152 = arith.constant dense<0.000000e+00> : vector<16x512xf32>
    %213 = tpu.matmul %209, %212, %cst_152 {dimension_numbers = #tpu.dot_dimension_numbers<[1], [0], [0], [1], [0, 0, 1, 1], [], []>} : vector<16x16xbf16>, vector<16x512xbf16>, vector<16x512xf32> -> vector<16x512xf32>
    %214 = vector.broadcast %211 : vector<16x1xf32> to vector<16x512xf32>
    %215 = arith.addf %213, %214 : vector<16x512xf32>
    %cst_153 = arith.constant 0.000000e+00 : f32
    %216 = vector.broadcast %cst_153 : f32 to vector<16x512xf32>
    %217 = arith.maximumf %215, %216 : vector<16x512xf32>
    %c0_154 = arith.constant 0 : index
    %c0_155 = arith.constant 0 : index
    %218 = vector.load %arg10[%c0_154, %c0_155] : memref<32x16xbf16, #tpu.memory_space<vmem>>, vector<32x16xbf16>
    %c0_156 = arith.constant 0 : index
    %c0_157 = arith.constant 0 : index
    %219 = vector.load %arg11[%c0_156, %c0_157] : memref<32x1xf32, #tpu.memory_space<vmem>>, vector<32x1xf32>
    %220 = arith.truncf %217 : vector<16x512xf32> to vector<16x512xbf16>
    %cst_158 = arith.constant dense<0.000000e+00> : vector<32x512xf32>
    %221 = tpu.matmul %218, %220, %cst_158 {dimension_numbers = #tpu.dot_dimension_numbers<[1], [0], [0], [1], [0, 0, 1, 1], [], []>} : vector<32x16xbf16>, vector<16x512xbf16>, vector<32x512xf32> -> vector<32x512xf32>
    %222 = vector.broadcast %219 : vector<32x1xf32> to vector<32x512xf32>
    %223 = arith.addf %221, %222 : vector<32x512xf32>
    %cst_159 = arith.constant 0.000000e+00 : f32
    %224 = vector.broadcast %cst_159 : f32 to vector<32x512xf32>
    %225 = arith.maximumf %223, %224 : vector<32x512xf32>
    %226 = arith.truncf %225 : vector<32x512xf32> to vector<32x512xbf16>
    %c0_160 = arith.constant 0 : index
    %c0_161 = arith.constant 0 : index
    %227 = vector.load %arg1[%c0_160, %c0_161] : memref<512x128xbf16, #tpu.memory_space<vmem>>, vector<512x128xbf16>
    %cst_162 = arith.constant dense<0.000000e+00> : vector<32x128xf32>
    %228 = tpu.matmul %226, %227, %cst_162 {dimension_numbers = #tpu.dot_dimension_numbers<[1], [0], [0], [1], [0, 0, 1, 1], [], []>} : vector<32x512xbf16>, vector<512x128xbf16>, vector<32x128xf32> -> vector<32x128xf32>
    %229 = arith.truncf %228 : vector<32x128xf32> to vector<32x128xbf16>
    %c0_163 = arith.constant 0 : index
    %c0_164 = arith.constant 0 : index
    %230 = vector.load %arg12[%c0_163, %c0_164] : memref<48x32xbf16, #tpu.memory_space<vmem>>, vector<48x32xbf16>
    %c0_165 = arith.constant 0 : index
    %c0_166 = arith.constant 0 : index
    %231 = vector.load %arg13[%c0_165, %c0_166] : memref<48x1xf32, #tpu.memory_space<vmem>>, vector<48x1xf32>
    %cst_167 = arith.constant dense<0.000000e+00> : vector<48x128xf32>
    %232 = tpu.matmul %230, %229, %cst_167 {dimension_numbers = #tpu.dot_dimension_numbers<[1], [0], [0], [1], [0, 0, 1, 1], [], []>} : vector<48x32xbf16>, vector<32x128xbf16>, vector<48x128xf32> -> vector<48x128xf32>
    %233 = vector.broadcast %231 : vector<48x1xf32> to vector<48x128xf32>
    %234 = arith.addf %232, %233 : vector<48x128xf32>
    %cst_168 = arith.constant 0.000000e+00 : f32
    %235 = vector.broadcast %cst_168 : f32 to vector<48x128xf32>
    %236 = arith.maximumf %234, %235 : vector<48x128xf32>
    %c0_169 = arith.constant 0 : index
    %c0_170 = arith.constant 0 : index
    %237 = vector.load %arg14[%c0_169, %c0_170] : memref<64x48xbf16, #tpu.memory_space<vmem>>, vector<64x48xbf16>
    %c0_171 = arith.constant 0 : index
    %c0_172 = arith.constant 0 : index
    %238 = vector.load %arg15[%c0_171, %c0_172] : memref<64x1xf32, #tpu.memory_space<vmem>>, vector<64x1xf32>
    %239 = arith.truncf %236 : vector<48x128xf32> to vector<48x128xbf16>
    %cst_173 = arith.constant dense<0.000000e+00> : vector<64x128xf32>
    %240 = tpu.matmul %237, %239, %cst_173 {dimension_numbers = #tpu.dot_dimension_numbers<[1], [0], [0], [1], [0, 0, 1, 1], [], []>} : vector<64x48xbf16>, vector<48x128xbf16>, vector<64x128xf32> -> vector<64x128xf32>
    %241 = vector.broadcast %238 : vector<64x1xf32> to vector<64x128xf32>
    %242 = arith.addf %240, %241 : vector<64x128xf32>
    %cst_174 = arith.constant 0.000000e+00 : f32
    %243 = vector.broadcast %cst_174 : f32 to vector<64x128xf32>
    %244 = arith.maximumf %242, %243 : vector<64x128xf32>
    %245 = arith.truncf %244 : vector<64x128xf32> to vector<64x128xbf16>
    %c0_175 = arith.constant 0 : index
    %c0_176 = arith.constant 0 : index
    %246 = vector.load %arg2[%c0_175, %c0_176] : memref<128x32xbf16, #tpu.memory_space<vmem>>, vector<128x32xbf16>
    %cst_177 = arith.constant dense<0.000000e+00> : vector<64x32xf32>
    %247 = tpu.matmul %245, %246, %cst_177 {dimension_numbers = #tpu.dot_dimension_numbers<[1], [0], [0], [1], [0, 0, 1, 1], [], []>} : vector<64x128xbf16>, vector<128x32xbf16>, vector<64x32xf32> -> vector<64x32xf32>
    %248 = arith.truncf %247 : vector<64x32xf32> to vector<64x32xbf16>
    %c0_178 = arith.constant 0 : index
    %c0_179 = arith.constant 0 : index
    %249 = vector.load %arg16[%c0_178, %c0_179] : memref<32x64xbf16, #tpu.memory_space<vmem>>, vector<32x64xbf16>
    %c0_180 = arith.constant 0 : index
    %c0_181 = arith.constant 0 : index
    %250 = vector.load %arg17[%c0_180, %c0_181] : memref<32x1xf32, #tpu.memory_space<vmem>>, vector<32x1xf32>
    %cst_182 = arith.constant dense<0.000000e+00> : vector<32x32xf32>
    %251 = tpu.matmul %249, %248, %cst_182 {dimension_numbers = #tpu.dot_dimension_numbers<[1], [0], [0], [1], [0, 0, 1, 1], [], []>} : vector<32x64xbf16>, vector<64x32xbf16>, vector<32x32xf32> -> vector<32x32xf32>
    %252 = vector.broadcast %250 : vector<32x1xf32> to vector<32x32xf32>
    %253 = arith.addf %251, %252 : vector<32x32xf32>
    %cst_183 = arith.constant 0.000000e+00 : f32
    %254 = vector.broadcast %cst_183 : f32 to vector<32x32xf32>
    %255 = arith.maximumf %253, %254 : vector<32x32xf32>
    %c0_184 = arith.constant 0 : index
    %c0_185 = arith.constant 0 : index
    %256 = vector.load %arg18[%c0_184, %c0_185] : memref<32x32xbf16, #tpu.memory_space<vmem>>, vector<32x32xbf16>
    %c0_186 = arith.constant 0 : index
    %c0_187 = arith.constant 0 : index
    %257 = vector.load %arg19[%c0_186, %c0_187] : memref<32x1xf32, #tpu.memory_space<vmem>>, vector<32x1xf32>
    %258 = arith.truncf %255 : vector<32x32xf32> to vector<32x32xbf16>
    %cst_188 = arith.constant dense<0.000000e+00> : vector<32x32xf32>
    %259 = tpu.matmul %256, %258, %cst_188 {dimension_numbers = #tpu.dot_dimension_numbers<[1], [0], [0], [1], [0, 0, 1, 1], [], []>} : vector<32x32xbf16>, vector<32x32xbf16>, vector<32x32xf32> -> vector<32x32xf32>
    %260 = vector.broadcast %257 : vector<32x1xf32> to vector<32x32xf32>
    %261 = arith.addf %259, %260 : vector<32x32xf32>
    %cst_189 = arith.constant 0.000000e+00 : f32
    %262 = vector.broadcast %cst_189 : f32 to vector<32x32xf32>
    %263 = arith.maximumf %261, %262 : vector<32x32xf32>
    %c0_190 = arith.constant 0 : index
    %c0_191 = arith.constant 0 : index
    %264 = vector.load %arg20[%c0_190, %c0_191] : memref<512x32xbf16, #tpu.memory_space<vmem>>, vector<512x32xbf16>
    %c0_192 = arith.constant 0 : index
    %c0_193 = arith.constant 0 : index
    %265 = vector.load %arg21[%c0_192, %c0_193] : memref<512x1xf32, #tpu.memory_space<vmem>>, vector<512x1xf32>
    %cst_194 = arith.constant dense<0.000000e+00> : vector<512x128xf32>
    %266 = tpu.matmul %264, %229, %cst_194 {dimension_numbers = #tpu.dot_dimension_numbers<[1], [0], [0], [1], [0, 0, 1, 1], [], []>} : vector<512x32xbf16>, vector<32x128xbf16>, vector<512x128xf32> -> vector<512x128xf32>
    %267 = vector.broadcast %265 : vector<512x1xf32> to vector<512x128xf32>
    %268 = arith.addf %266, %267 : vector<512x128xf32>
    %c0_195 = arith.constant 0 : index
    %c0_196 = arith.constant 0 : index
    %269 = vector.load %arg22[%c0_195, %c0_196] : memref<128x64xbf16, #tpu.memory_space<vmem>>, vector<128x64xbf16>
    %c0_197 = arith.constant 0 : index
    %c0_198 = arith.constant 0 : index
    %270 = vector.load %arg23[%c0_197, %c0_198] : memref<128x1xf32, #tpu.memory_space<vmem>>, vector<128x1xf32>
    %271 = arith.truncf %244 : vector<64x128xf32> to vector<64x128xbf16>
    %cst_199 = arith.constant dense<0.000000e+00> : vector<128x128xf32>
    %272 = tpu.matmul %269, %271, %cst_199 {dimension_numbers = #tpu.dot_dimension_numbers<[1], [0], [0], [1], [0, 0, 1, 1], [], []>} : vector<128x64xbf16>, vector<64x128xbf16>, vector<128x128xf32> -> vector<128x128xf32>
    %273 = vector.broadcast %270 : vector<128x1xf32> to vector<128x128xf32>
    %274 = arith.addf %272, %273 : vector<128x128xf32>
    %c0_200 = arith.constant 0 : index
    %c0_201 = arith.constant 0 : index
    %275 = vector.load %arg24[%c0_200, %c0_201] : memref<32x32xbf16, #tpu.memory_space<vmem>>, vector<32x32xbf16>
    %c0_202 = arith.constant 0 : index
    %c0_203 = arith.constant 0 : index
    %276 = vector.load %arg25[%c0_202, %c0_203] : memref<32x1xf32, #tpu.memory_space<vmem>>, vector<32x1xf32>
    %277 = arith.truncf %263 : vector<32x32xf32> to vector<32x32xbf16>
    %cst_204 = arith.constant dense<0.000000e+00> : vector<32x32xf32>
    %278 = tpu.matmul %275, %277, %cst_204 {dimension_numbers = #tpu.dot_dimension_numbers<[1], [0], [0], [1], [0, 0, 1, 1], [], []>} : vector<32x32xbf16>, vector<32x32xbf16>, vector<32x32xf32> -> vector<32x32xf32>
    %279 = vector.broadcast %276 : vector<32x1xf32> to vector<32x32xf32>
    %280 = arith.addf %278, %279 : vector<32x32xf32>
    %281 = arith.truncf %280 : vector<32x32xf32> to vector<32x32xbf16>
    %c0_205 = arith.constant 0 : index
    %c0_206 = arith.constant 0 : index
    %282 = vector.load %arg3[%c0_205, %c0_206] : memref<32x128xbf16, #tpu.memory_space<vmem>>, vector<32x128xbf16>
    %cst_207 = arith.constant dense<0.000000e+00> : vector<32x128xf32>
    %283 = tpu.matmul %281, %282, %cst_207 {dimension_numbers = #tpu.dot_dimension_numbers<[1], [0], [0], [1], [0, 0, 1, 1], [], []>} : vector<32x32xbf16>, vector<32x128xbf16>, vector<32x128xf32> -> vector<32x128xf32>
    %284 = arith.truncf %283 : vector<32x128xf32> to vector<32x128xbf16>
    %c0_208 = arith.constant 0 : index
    %c0_209 = arith.constant 0 : index
    %285 = vector.load %arg26[%c0_208, %c0_209] : memref<64x512xbf16, #tpu.memory_space<vmem>>, vector<64x512xbf16>
    %286 = arith.truncf %268 : vector<512x128xf32> to vector<512x128xbf16>
    %cst_210 = arith.constant dense<0.000000e+00> : vector<64x128xf32>
    %287 = tpu.matmul %285, %286, %cst_210 {dimension_numbers = #tpu.dot_dimension_numbers<[1], [0], [0], [1], [0, 0, 1, 1], [], []>} : vector<64x512xbf16>, vector<512x128xbf16>, vector<64x128xf32> -> vector<64x128xf32>
    %c0_211 = arith.constant 0 : index
    %c0_212 = arith.constant 0 : index
    %288 = vector.load %arg27[%c0_211, %c0_212] : memref<64x128xbf16, #tpu.memory_space<vmem>>, vector<64x128xbf16>
    %289 = arith.truncf %274 : vector<128x128xf32> to vector<128x128xbf16>
    %cst_213 = arith.constant dense<0.000000e+00> : vector<64x128xf32>
    %290 = tpu.matmul %288, %289, %cst_213 {dimension_numbers = #tpu.dot_dimension_numbers<[1], [0], [0], [1], [0, 0, 1, 1], [], []>} : vector<64x128xbf16>, vector<128x128xbf16>, vector<64x128xf32> -> vector<64x128xf32>
    %291 = arith.addf %287, %290 : vector<64x128xf32>
    %c0_214 = arith.constant 0 : index
    %c0_215 = arith.constant 0 : index
    %292 = vector.load %arg28[%c0_214, %c0_215] : memref<64x32xbf16, #tpu.memory_space<vmem>>, vector<64x32xbf16>
    %cst_216 = arith.constant dense<0.000000e+00> : vector<64x128xf32>
    %293 = tpu.matmul %292, %284, %cst_216 {dimension_numbers = #tpu.dot_dimension_numbers<[1], [0], [0], [1], [0, 0, 1, 1], [], []>} : vector<64x32xbf16>, vector<32x128xbf16>, vector<64x128xf32> -> vector<64x128xf32>
    %294 = arith.addf %291, %293 : vector<64x128xf32>
    %c0_217 = arith.constant 0 : index
    %c0_218 = arith.constant 0 : index
    %295 = vector.load %arg29[%c0_217, %c0_218] : memref<64x1xf32, #tpu.memory_space<vmem>>, vector<64x1xf32>
    %296 = vector.broadcast %295 : vector<64x1xf32> to vector<64x128xf32>
    %297 = arith.addf %294, %296 : vector<64x128xf32>
    %cst_219 = arith.constant 0.000000e+00 : f32
    %298 = vector.broadcast %cst_219 : f32 to vector<64x128xf32>
    %299 = arith.maximumf %297, %298 : vector<64x128xf32>
    %300 = arith.truncf %299 : vector<64x128xf32> to vector<64x128xbf16>
    %c0_220 = arith.constant 0 : index
    %c0_221 = arith.constant 0 : index
    %301 = vector.load %arg4[%c0_220, %c0_221] : memref<128x32xbf16, #tpu.memory_space<vmem>>, vector<128x32xbf16>
    %cst_222 = arith.constant dense<0.000000e+00> : vector<64x32xf32>
    %302 = tpu.matmul %300, %301, %cst_222 {dimension_numbers = #tpu.dot_dimension_numbers<[1], [0], [0], [1], [0, 0, 1, 1], [], []>} : vector<64x128xbf16>, vector<128x32xbf16>, vector<64x32xf32> -> vector<64x32xf32>
    %303 = arith.truncf %302 : vector<64x32xf32> to vector<64x32xbf16>
    %c0_223 = arith.constant 0 : index
    %c0_224 = arith.constant 0 : index
    %304 = vector.load %arg30[%c0_223, %c0_224] : memref<64x64xbf16, #tpu.memory_space<vmem>>, vector<64x64xbf16>
    %c0_225 = arith.constant 0 : index
    %c0_226 = arith.constant 0 : index
    %305 = vector.load %arg31[%c0_225, %c0_226] : memref<64x1xf32, #tpu.memory_space<vmem>>, vector<64x1xf32>
    %cst_227 = arith.constant dense<0.000000e+00> : vector<64x32xf32>
    %306 = tpu.matmul %304, %303, %cst_227 {dimension_numbers = #tpu.dot_dimension_numbers<[1], [0], [0], [1], [0, 0, 1, 1], [], []>} : vector<64x64xbf16>, vector<64x32xbf16>, vector<64x32xf32> -> vector<64x32xf32>
    %307 = vector.broadcast %305 : vector<64x1xf32> to vector<64x32xf32>
    %308 = arith.addf %306, %307 : vector<64x32xf32>
    %cst_228 = arith.constant 0.000000e+00 : f32
    %309 = vector.broadcast %cst_228 : f32 to vector<64x32xf32>
    %310 = arith.maximumf %308, %309 : vector<64x32xf32>
    %311 = arith.truncf %310 : vector<64x32xf32> to vector<64x32xbf16>
    %c0_229 = arith.constant 0 : index
    %c0_230 = arith.constant 0 : index
    %312 = vector.load %arg5[%c0_229, %c0_230] : memref<32x8xbf16, #tpu.memory_space<vmem>>, vector<32x8xbf16>
    %cst_231 = arith.constant dense<0.000000e+00> : vector<64x8xf32>
    %313 = tpu.matmul %311, %312, %cst_231 {dimension_numbers = #tpu.dot_dimension_numbers<[1], [0], [0], [1], [0, 0, 1, 1], [], []>} : vector<64x32xbf16>, vector<32x8xbf16>, vector<64x8xf32> -> vector<64x8xf32>
    %314 = arith.truncf %313 : vector<64x8xf32> to vector<64x8xbf16>
    %c0_232 = arith.constant 0 : index
    %c0_233 = arith.constant 0 : index
    %315 = vector.load %arg32[%c0_232, %c0_233] : memref<64x64xbf16, #tpu.memory_space<vmem>>, vector<64x64xbf16>
    %c0_234 = arith.constant 0 : index
    %c0_235 = arith.constant 0 : index
    %316 = vector.load %arg33[%c0_234, %c0_235] : memref<64x1xf32, #tpu.memory_space<vmem>>, vector<64x1xf32>
    %cst_236 = arith.constant dense<0.000000e+00> : vector<64x8xf32>
    %317 = tpu.matmul %315, %314, %cst_236 {dimension_numbers = #tpu.dot_dimension_numbers<[1], [0], [0], [1], [0, 0, 1, 1], [], []>} : vector<64x64xbf16>, vector<64x8xbf16>, vector<64x8xf32> -> vector<64x8xf32>
    %318 = vector.broadcast %316 : vector<64x1xf32> to vector<64x8xf32>
    %319 = arith.addf %317, %318 : vector<64x8xf32>
    %cst_237 = arith.constant 0.000000e+00 : f32
    %320 = vector.broadcast %cst_237 : f32 to vector<64x8xf32>
    %321 = arith.maximumf %319, %320 : vector<64x8xf32>
    %c0_238 = arith.constant 0 : index
    %c0_239 = arith.constant 0 : index
    %322 = vector.load %arg34[%c0_238, %c0_239] : memref<28x64xbf16, #tpu.memory_space<vmem>>, vector<28x64xbf16>
    %c0_240 = arith.constant 0 : index
    %c0_241 = arith.constant 0 : index
    %323 = vector.load %arg35[%c0_240, %c0_241] : memref<28x1xf32, #tpu.memory_space<vmem>>, vector<28x1xf32>
    %324 = arith.truncf %299 : vector<64x128xf32> to vector<64x128xbf16>
    %cst_242 = arith.constant dense<0.000000e+00> : vector<28x128xf32>
    %325 = tpu.matmul %322, %324, %cst_242 {dimension_numbers = #tpu.dot_dimension_numbers<[1], [0], [0], [1], [0, 0, 1, 1], [], []>} : vector<28x64xbf16>, vector<64x128xbf16>, vector<28x128xf32> -> vector<28x128xf32>
    %326 = vector.broadcast %323 : vector<28x1xf32> to vector<28x128xf32>
    %327 = arith.addf %325, %326 : vector<28x128xf32>
    %c0_243 = arith.constant 0 : index
    %c0_244 = arith.constant 0 : index
    %328 = vector.load %arg40[%c0_243, %c0_244] : memref<28x128xf32, #tpu.memory_space<vmem>>, vector<28x128xf32>
    tpu.vector_store %arg40[%c0_243, %c0_244], %327 {strides = array<i32>} : memref<28x128xf32, #tpu.memory_space<vmem>>, vector<28x128xf32>,
    %c0_245 = arith.constant 0 : index
    %c0_246 = arith.constant 0 : index
    %329 = vector.load %arg36[%c0_245, %c0_246] : memref<28x64xbf16, #tpu.memory_space<vmem>>, vector<28x64xbf16>
    %c0_247 = arith.constant 0 : index
    %c0_248 = arith.constant 0 : index
    %330 = vector.load %arg37[%c0_247, %c0_248] : memref<28x1xf32, #tpu.memory_space<vmem>>, vector<28x1xf32>
    %331 = arith.truncf %310 : vector<64x32xf32> to vector<64x32xbf16>
    %cst_249 = arith.constant dense<0.000000e+00> : vector<28x32xf32>
    %332 = tpu.matmul %329, %331, %cst_249 {dimension_numbers = #tpu.dot_dimension_numbers<[1], [0], [0], [1], [0, 0, 1, 1], [], []>} : vector<28x64xbf16>, vector<64x32xbf16>, vector<28x32xf32> -> vector<28x32xf32>
    %333 = vector.broadcast %330 : vector<28x1xf32> to vector<28x32xf32>
    %334 = arith.addf %332, %333 : vector<28x32xf32>
    %c0_250 = arith.constant 0 : index
    %c0_251 = arith.constant 0 : index
    %335 = vector.load %arg41[%c0_250, %c0_251] : memref<28x32xf32, #tpu.memory_space<vmem>>, vector<28x32xf32>
    tpu.vector_store %arg41[%c0_250, %c0_251], %334 {strides = array<i32>} : memref<28x32xf32, #tpu.memory_space<vmem>>, vector<28x32xf32>,
    %c0_252 = arith.constant 0 : index
    %c0_253 = arith.constant 0 : index
    %336 = vector.load %arg38[%c0_252, %c0_253] : memref<28x64xbf16, #tpu.memory_space<vmem>>, vector<28x64xbf16>
    %c0_254 = arith.constant 0 : index
    %c0_255 = arith.constant 0 : index
    %337 = vector.load %arg39[%c0_254, %c0_255] : memref<28x1xf32, #tpu.memory_space<vmem>>, vector<28x1xf32>
    %338 = arith.truncf %321 : vector<64x8xf32> to vector<64x8xbf16>
    %cst_256 = arith.constant dense<0.000000e+00> : vector<28x8xf32>
    %339 = tpu.matmul %336, %338, %cst_256 {dimension_numbers = #tpu.dot_dimension_numbers<[1], [0], [0], [1], [0, 0, 1, 1], [], []>} : vector<28x64xbf16>, vector<64x8xbf16>, vector<28x8xf32> -> vector<28x8xf32>
    %340 = vector.broadcast %337 : vector<28x1xf32> to vector<28x8xf32>
    %341 = arith.addf %339, %340 : vector<28x8xf32>
    %c0_257 = arith.constant 0 : index
    %c0_258 = arith.constant 0 : index
    %342 = vector.load %arg42[%c0_257, %c0_258] : memref<28x8xf32, #tpu.memory_space<vmem>>, vector<28x8xf32>
    tpu.vector_store %arg42[%c0_257, %c0_258], %341 {strides = array<i32>} : memref<28x8xf32, #tpu.memory_space<vmem>>, vector<28x8xf32>,
    return
  }
}

</mosaic_0001>

<bundles_post_ra>
// kernel: shuffle_ssd_forward.1
= control target key start
LH: loop header
LB: loop body
LE: loop exit
PB: predicated region body
PF: predicated region fallthrough
CT: control target
= control target key end

     0   :  { %v9716_v0 = vmov 0   ;;  %s8146_s3 = smov 9   ;;  %s8147_s7 = smov 7   ;;  %vm207_vm0 = vcmask 1043456   ;;  %vm203_vm1 = vcmask 64512   ;;  %vm337_vm2 = vcmask 130048   ;;  %s9715_s0 = inlined_call_operand.smem [shape: u32[43], index: -1, kind: input, shape index: {}] }
   0x1   :  { %7965 = vset.pattern.permute.xlu1 %v9716_v0  ;;  %7964 = vset.pattern.permute.xlu0 %v9716_v0  ;;  %s8200_s6 = sld [smem:[%s9715_s0 + %s8146_s3]]   ;;  %s8148_s14 = smov 6   ;;  %vm8168_vm3 = vmmov 0   ;;  %vm3466_vm4 = vcmask 261120   ;;  %vm3618_vm5 = vcmask 392192   ;;  %vm3879_vm6 = vcmask 523264  }
   0x2   :  { %s6889_s10 = sld [smem:[%s9715_s0 + %s8147_s7]]   ;;  %252 = vmatprep.mubr.bf16.mxu0 %v9716_v0  ;;  %295 = vmatprep.mubr.bf16.mxu1 %v9716_v0  ;;  %s8149_s18 = smov 11   ;;  %vm6767_vm7 = vcmask 257024   ;;  %vm6869_vm8 = vcmask 60416  }
   0x3   :  { %s1_s13 = sld [smem:[%s9715_s0]]   ;;  %s8150_s22 = smov 8  }
   0x4   :  { %s6888_s17 = sld [smem:[%s9715_s0 + %s8148_s14]]   ;;  %s8151_s26 = smov 13  }
   0x5   :  { %s6893_s21 = sld [smem:[%s9715_s0 + %s8149_s18]]   ;;  %s8152_s30 = smov 15  }
   0x6   :  { %s8263_s25 = sld [smem:[%s9715_s0 + %s8150_s22]]   ;;  %s8153_s4 = smov 17  }
   0x7   :  { %v316_v1 = vld [vmem:[%s8200_s6] sm:$0xff]  ;;  %v317_v9 = vld [vmem:[%s8200_s6 + $0x8] sm:$0xff]  ;;  %v6940_v14 = vld [vmem:[%s8200_s6 + $0x18] sm:$0xff]  ;;  %s6895_s29 = sld [smem:[%s9715_s0 + %s8151_s26]]   ;;  %s8154_s8 = smov 19  }
   0x8   :  { %324 = vperm.xlu1 %7965, %v316_v1   ;;  %v174_v2 = vld [vmem:[%s6889_s10] sm:$0xff]  ;;  %v175_v10 = vld [vmem:[%s6889_s10 + $0x8] sm:$0xff]  ;;  %v6939_v15 = vld [vmem:[%s8200_s6 + $0x10] sm:$0xff]  ;;  %s6897_s3 = sld [smem:[%s9715_s0 + %s8152_s30]]   ;;  %s8155_s12 = smov 25  }
   0x9   :  { %180 = vperm.xlu0 %7964, %v174_v2   ;;  %v176_v3 = vld [vmem:[%s1_s13] sm:$0xff]  ;;  %v177_v4 = vld [vmem:[%s1_s13 + $0x8] sm:$0xff]  ;;  %v6954_v18 = vld [vmem:[%s8200_s6 + $0x38] sm:$0xff]  ;;  %s6899_s7 = sld [smem:[%s9715_s0 + %s8153_s4]]   ;;  %s8156_s16 = smov 23  }
   0xa   :  { %v6927_v5 = vcombine.high %v176_v3, %v176_v3  ;;  %v6929_v6 = vcombine.high %v177_v4, %v177_v4  ;;  %v6926_v7 = vcombine.low %v176_v3, %v176_v3  ;;  %v6928_v8 = vcombine.low %v177_v4, %v177_v4  ;;  %v7970_v13 = vld [vmem:[%s6888_s17] sm:$0xff]   ;;  %v6947_v16 = vld [vmem:[%s8200_s6 + $0x28] sm:$0xff]  ;;  %v6953_v19 = vld [vmem:[%s8200_s6 + $0x30] sm:$0xff]  ;;  %s6901_s11 = sld [smem:[%s9715_s0 + %s8154_s8]]   ;;  %s8157_s20 = smov 21  }
   0xb   :  { %v6946_v17 = vld [vmem:[%s8200_s6 + $0x20] sm:$0xff]  ;;  %v6961_v20 = vld [vmem:[%s8200_s6 + $0x48] sm:$0xff]  ;;  %v6968_v22 = vld [vmem:[%s8200_s6 + $0x58] sm:$0xff]  ;;  %s6907_s15 = sld [smem:[%s9715_s0 + %s8155_s12]]   ;;  %s8158_s24 = smov 29  }
   0xc   :  { %6930 = vmatprep.subr.msk.bf16.mxu0 %vm207_vm0, %v6927_v5  ;;  %6932 = vmatprep.subr.msk.bf16.mxu1 %vm207_vm0, %v6929_v6  ;;  %v209_v11 = vsel %vm207_vm0, %v6926_v7, 0  ;;  %v215_v12 = vsel %vm207_vm0, %v6928_v8, 0  ;;  %v6960_v21 = vld [vmem:[%s8200_s6 + $0x40] sm:$0xff]  ;;  %v6967_v23 = vld [vmem:[%s8200_s6 + $0x50] sm:$0xff]  ;;  %v6975_v24 = vld [vmem:[%s8200_s6 + $0x68] sm:$0xff]  ;;  %s8301_s19 = sld [smem:[%s9715_s0 + %s8156_s16]]   ;;  %s8167_s27 = smov 12  }
   0xd   :  { %235 = vmatpush1.bf16.msra.mxu0 %v209_v11  ;;  %278 = vmatpush1.bf16.msra.mxu1 %v215_v12  ;;  %v6974_v25 = vld [vmem:[%s8200_s6 + $0x60] sm:$0xff]  ;;  %v6982_v26 = vld [vmem:[%s8200_s6 + $0x78] sm:$0xff]  ;;  %v6981_v27 = vld [vmem:[%s8200_s6 + $0x70] sm:$0xff]  ;;  %s8348_s23 = sld [smem:[%s9715_s0 + %s8157_s20]]   ;;  %s8169_s1 = smov 14  }
   0xe   :  { %329 = vperm.xlu1 %7965, %v317_v9   ;;  %185 = vperm.xlu0 %7964, %v175_v10   ;;  %v6989_v28 = vld [vmem:[%s8200_s6 + $0x88] sm:$0xff]  ;;  %v6988_v29 = vld [vmem:[%s8200_s6 + $0x80] sm:$0xff]  ;;  %v6996_v30 = vld [vmem:[%s8200_s6 + $0x98] sm:$0xff]  ;;  %s6911_s28 = sld [smem:[%s9715_s0 + %s8158_s24]]   ;;  %s8170_s5 = smov 2  }
   0xf   :  { %v6995_v31 = vld [vmem:[%s8200_s6 + $0x90] sm:$0xff]  ;;  %v7003_v32 = vld [vmem:[%s8200_s6 + $0xa8] sm:$0xff]  ;;  %v7002_v33 = vld [vmem:[%s8200_s6 + $0xa0] sm:$0xff]  ;;  %s8924_s30 = sld [smem:[%s9715_s0 + %s8167_s27]]   ;;  %s8171_s9 = smov 22  }
  0x10   :  { %6931 = vmatmul.mubr.msk.bf16.vlgmr.msra.gmra.mxu0 %vm203_vm1, %v7970_v13  ;;  %6933 = vmatmul.mubr.msk.bf16.vlgmr.msra.gmra.mxu1 %vm203_vm1, %v7970_v13  ;;  %v7010_v34 = vld [vmem:[%s8200_s6 + $0xb8] sm:$0xff]  ;;  %v7009_v35 = vld [vmem:[%s8200_s6 + $0xb0] sm:$0xff]  ;;  %v7017_v36 = vld [vmem:[%s8200_s6 + $0xc8] sm:$0xff]  ;;  %s8944_s4 = sld [smem:[%s9715_s0 + %s8169_s1]]   ;;  %s8172_s13 = smov 16  }
  0x11   :  { %373 = vmatprep.mubr.bf16.mxu0 %v9716_v0  ;;  %416 = vmatprep.mubr.bf16.mxu1 %v9716_v0  ;;  %v7016_v37 = vld [vmem:[%s8200_s6 + $0xc0] sm:$0xff]  ;;  %v7024_v38 = vld [vmem:[%s8200_s6 + $0xd8] sm:$0xff]  ;;  %v7023_v39 = vld [vmem:[%s8200_s6 + $0xd0] sm:$0xff]  ;;  %s8951_s8 = sld [smem:[%s9715_s0 + %s8170_s5]]   ;;  %s8173_s17 = smov 18  }
  0x12   :  { %452 = vperm.xlu1 %7965, %v6940_v14   ;;  %447 = vperm.xlu0 %7964, %v6939_v15   ;;  %v7031_v40 = vld [vmem:[%s8200_s6 + $0xe8] sm:$0xff]  ;;  %v7030_v41 = vld [vmem:[%s8200_s6 + $0xe0] sm:$0xff]  ;;  %v7038_v42 = vld [vmem:[%s8200_s6 + $0xf8] sm:$0xff]  ;;  %s8976_s12 = sld [smem:[%s9715_s0 + %s8171_s9]]   ;;  %s8175_s26 = smov 24  }
  0x13   :  { %v7037_v43 = vld [vmem:[%s8200_s6 + $0xf0] sm:$0xff]  ;;  %v7045_v44 = vld [vmem:[%s8200_s6 + $0x108] sm:$0xff]  ;;  %v7044_v45 = vld [vmem:[%s8200_s6 + $0x100] sm:$0xff]  ;;  %s6898_s16 = sld [smem:[%s9715_s0 + %s8172_s13]]   ;;  %s8183_s27 = smov 34  }
  0x14   :  { %v7052_v46 = vld [vmem:[%s8200_s6 + $0x118] sm:$0xff]  ;;  %v7051_v47 = vld [vmem:[%s8200_s6 + $0x110] sm:$0xff]  ;;  %v7059_v48 = vld [vmem:[%s8200_s6 + $0x128] sm:$0xff]  ;;  %s6900_s20 = sld [smem:[%s9715_s0 + %s8173_s17]]   ;;  %s8184_s1 = smov 32  }
  0x15   :  { %v7058_v49 = vld [vmem:[%s8200_s6 + $0x120] sm:$0xff]  ;;  %v7066_v50 = vld [vmem:[%s8200_s6 + $0x138] sm:$0xff]  ;;  %v7065_v51 = vld [vmem:[%s8200_s6 + $0x130] sm:$0xff]  ;;  %s8185_s5 = smov 36   ;;  %s8186_s9 = smov 40  }
  0x16   :  { %574 = vperm.xlu1 %7965, %v6947_v16   ;;  %569 = vperm.xlu0 %7964, %v6946_v17   ;;  %v7073_v52 = vld [vmem:[%s8200_s6 + $0x148] sm:$0xff]  ;;  %v7072_v53 = vld [vmem:[%s8200_s6 + $0x140] sm:$0xff]  ;;  %v2882_v56 = vld [vmem:[%s6893_s21 + $0x18] sm:$0xff]  ;;  %s8187_s13 = smov 38   ;;  %s8188_s17 = smov 41  }
  0x17   :  { %v2880_v54 = vld [vmem:[%s6893_s21 + $0x8] sm:$0xff]  ;;  %v2879_v55 = vld [vmem:[%s6893_s21] sm:$0xff]  ;;  %v2881_v57 = vld [vmem:[%s6893_s21 + $0x10] sm:$0xff]  ;;  %s8174_s21 = smov 20  }
  0x18   :  { %v3420_v58 = vld [vmem:[%s6895_s29 + $0x28] sm:$0xff]  ;;  %v3419_v59 = vld [vmem:[%s6895_s29 + $0x20] sm:$0xff]  ;;  %v3418_v60 = vld [vmem:[%s6895_s29 + $0x18] sm:$0xff]  ;;  %s9038_s24 = sld [smem:[%s9715_s0 + %s8174_s21]]   ;;  %s8189_s21 = smov 42  }
  0x19   :  { %v3417_v61 = vld [vmem:[%s6895_s29 + $0x10] sm:$0xff]  ;;  %v3416_v62 = vld [vmem:[%s6895_s29 + $0x8] sm:$0xff]  ;;  %v3415_v63 = vld [vmem:[%s6895_s29] sm:$0xff]  ;;  %s8159_s29 = smov 31  }
  0x1a   :  { %696 = vperm.xlu1 %7965, %v6954_v18   ;;  %691 = vperm.xlu0 %7964, %v6953_v19   ;;  %v3548_v1 = vld [vmem:[%s6897_s3 + $0x8] sm:$0xff]  ;;  %v3547_v2 = vld [vmem:[%s6897_s3] sm:$0xff]  ;;  %v3550_v3 = vld [vmem:[%s6897_s3 + $0x18] sm:$0xff]  ;;  %s6913_s2 = sld [smem:[%s9715_s0 + %s8159_s29]]   ;;  %s8176_s29 = smov 3  }
  0x1b   :  { %v3549_v4 = vld [vmem:[%s6897_s3 + $0x10] sm:$0xff]  ;;  %v3552_v5 = vld [vmem:[%s6897_s3 + $0x28] sm:$0xff]  ;;  %v3551_v6 = vld [vmem:[%s6897_s3 + $0x20] sm:$0xff] }
  0x1c   :  { %v3554_v7 = vld [vmem:[%s6897_s3 + $0x38] sm:$0xff]  ;;  %v3553_v8 = vld [vmem:[%s6897_s3 + $0x30] sm:$0xff]  ;;  %v3846_v13 = vld [vmem:[%s6899_s7 + $0x8] sm:$0xff]  ;;  %s8160_s3 = smov 33  }
  0x1d   :  { %v3848_v10 = vld [vmem:[%s6899_s7 + $0x18] sm:$0xff]  ;;  %v3847_v11 = vld [vmem:[%s6899_s7 + $0x10] sm:$0xff]  ;;  %v3845_v14 = vld [vmem:[%s6899_s7] sm:$0xff]  ;;  %s6915_s6 = sld [smem:[%s9715_s0 + %s8160_s3]]   ;;  %s8161_s7 = smov 35  }
  0x1e   :  { %818 = vperm.xlu1 %7965, %v6961_v20   ;;  %813 = vperm.xlu0 %7964, %v6960_v21   ;;  %v3946_v17 = vld [vmem:[%s6901_s11 + $0x18] sm:$0xff]  ;;  %v3945_v18 = vld [vmem:[%s6901_s11 + $0x10] sm:$0xff]  ;;  %v3944_v21 = vld [vmem:[%s6901_s11 + $0x8] sm:$0xff]  ;;  %s6917_s10 = sld [smem:[%s9715_s0 + %s8161_s7]]   ;;  %s8177_s3 = smov 27  }
  0x1f   :  { %s8178_s7 = smov 26  }
  0x22   :  { %940 = vperm.xlu1 %7965, %v6968_v22   ;;  %935 = vperm.xlu0 %7964, %v6967_v23   ;;  %v3943_v22 = vld [vmem:[%s6901_s11] sm:$0xff]  ;;  %s8162_s11 = smov 37  }
  0x23   :  { %s6919_s14 = sld [smem:[%s9715_s0 + %s8162_s11]]   ;;  %s8179_s11 = smov 28  }
  0x26   :  { %1062 = vperm.xlu1 %7965, %v6975_v24   ;;  %1057 = vperm.xlu0 %7964, %v6974_v25   ;;  %v5309_v25 = vld [vmem:[%s6907_s15 + $0x8] sm:$0xff] }
  0x2a   :  { %1184 = vperm.xlu1 %7965, %v6982_v26   ;;  %1179 = vperm.xlu0 %7964, %v6981_v27   ;;  %v5308_v26 = vld [vmem:[%s6907_s15] sm:$0xff] }
  0x2e   :  { %1306 = vperm.xlu1 %7965, %v6989_v28   ;;  %1301 = vperm.xlu0 %7964, %v6988_v29   ;;  %v5311_v29 = vld [vmem:[%s6907_s15 + $0x18] sm:$0xff] }
  0x32   :  { %1428 = vperm.xlu1 %7965, %v6996_v30   ;;  %1423 = vperm.xlu0 %7964, %v6995_v31   ;;  %v5310_v30 = vld [vmem:[%s6907_s15 + $0x10] sm:$0xff]  ;;  %s8163_s15 = smov 39  }
  0x33   :  { %s6921_s18 = sld [smem:[%s9715_s0 + %s8163_s15]]   ;;  %s8180_s15 = smov 4  }
  0x36   :  { %1550 = vperm.xlu1 %7965, %v7003_v32   ;;  %1545 = vperm.xlu0 %7964, %v7002_v33   ;;  %v5062_v33 = vld [vmem:[%s8301_s19 + $0x78] sm:$0xff] }
  0x3a   :  { %1672 = vperm.xlu1 %7965, %v7010_v34   ;;  %1667 = vperm.xlu0 %7964, %v7009_v35   ;;  %v5061_v34 = vld [vmem:[%s8301_s19 + $0x70] sm:$0xff] }
  0x3e   :  { %1794 = vperm.xlu1 %7965, %v7017_v36   ;;  %1789 = vperm.xlu0 %7964, %v7016_v37   ;;  %v5060_v37 = vld [vmem:[%s8301_s19 + $0x68] sm:$0xff] }
  0x42   :  { %1916 = vperm.xlu1 %7965, %v7024_v38   ;;  %1911 = vperm.xlu0 %7964, %v7023_v39   ;;  %v5059_v38 = vld [vmem:[%s8301_s19 + $0x60] sm:$0xff] }
  0x46   :  { %2038 = vperm.xlu1 %7965, %v7031_v40   ;;  %2033 = vperm.xlu0 %7964, %v7030_v41   ;;  %v5058_v41 = vld [vmem:[%s8301_s19 + $0x58] sm:$0xff] }
  0x4a   :  { %2160 = vperm.xlu1 %7965, %v7038_v42   ;;  %2155 = vperm.xlu0 %7964, %v7037_v43   ;;  %v5057_v42 = vld [vmem:[%s8301_s19 + $0x50] sm:$0xff] }
  0x4e   :  { %2282 = vperm.xlu1 %7965, %v7045_v44   ;;  %2277 = vperm.xlu0 %7964, %v7044_v45   ;;  %v5056_v45 = vld [vmem:[%s8301_s19 + $0x48] sm:$0xff] }
  0x52   :  { %2404 = vperm.xlu1 %7965, %v7052_v46   ;;  %2399 = vperm.xlu0 %7964, %v7051_v47   ;;  %v5055_v46 = vld [vmem:[%s8301_s19 + $0x40] sm:$0xff] }
  0x56   :  { %2526 = vperm.xlu1 %7965, %v7059_v48   ;;  %2521 = vperm.xlu0 %7964, %v7058_v49   ;;  %v5054_v49 = vld [vmem:[%s8301_s19 + $0x38] sm:$0xff] }
  0x5a   :  { %2648 = vperm.xlu1 %7965, %v7066_v50   ;;  %2643 = vperm.xlu0 %7964, %v7065_v51   ;;  %v5053_v50 = vld [vmem:[%s8301_s19 + $0x30] sm:$0xff]  ;;  %v5052_v51 = vld [vmem:[%s8301_s19 + $0x28] sm:$0xff] }
  0x5e   :  { %2770 = vperm.xlu1 %7965, %v7073_v52   ;;  %2765 = vperm.xlu0 %7964, %v7072_v53   ;;  %v5051_v52 = vld [vmem:[%s8301_s19 + $0x20] sm:$0xff] }
  0x62   :  { %2894 = vperm.xlu1 %7965, %v2880_v54   ;;  %2889 = vperm.xlu0 %7964, %v2879_v55   ;;  %v5050_v55 = vld [vmem:[%s8301_s19 + $0x18] sm:$0xff] }
  0x66   :  { %2904 = vperm.xlu1 %7965, %v2882_v56   ;;  %2899 = vperm.xlu0 %7964, %v2881_v57   ;;  %v5049_v56 = vld [vmem:[%s8301_s19 + $0x10] sm:$0xff] }
  0x6a   :  { %3448 = vperm.xlu1 %7965, %v3420_v58   ;;  %3443 = vperm.xlu0 %7964, %v3419_v59   ;;  %v5048_v59 = vld [vmem:[%s8301_s19 + $0x8] sm:$0xff] }
  0x6e   :  { %3438 = vperm.xlu1 %7965, %v3418_v60   ;;  %3433 = vperm.xlu0 %7964, %v3417_v61   ;;  %v5047_v60 = vld [vmem:[%s8301_s19] sm:$0xff]  ;;  %v4133_v61 = vld [vmem:[%s8348_s23 + $0xf8] sm:$0xff]  ;;  %s8164_s19 = smov 10  }
  0x6f   :  { %s8850_s22 = sld [smem:[%s9715_s0 + %s8164_s19]]   ;;  %s8181_s19 = smov 5  }
  0x72   :  { %3428 = vperm.xlu1 %7965, %v3416_v62   ;;  %3423 = vperm.xlu0 %7964, %v3415_v63   ;;  %v4132_v62 = vld [vmem:[%s8348_s23 + $0xf0] sm:$0xff] }
  0x76   :  { %3565 = vperm.xlu1 %7965, %v3548_v1   ;;  %3560 = vperm.xlu0 %7964, %v3547_v2   ;;  %v4117_v2 = vld [vmem:[%s8348_s23 + $0x78] sm:$0xff] }
  0x7a   :  { %3575 = vperm.xlu1 %7965, %v3550_v3   ;;  %3570 = vperm.xlu0 %7964, %v3549_v4   ;;  %v4116_v3 = vld [vmem:[%s8348_s23 + $0x70] sm:$0xff] }
  0x7e   :  { %3585 = vperm.xlu1 %7965, %v3552_v5   ;;  %3580 = vperm.xlu0 %7964, %v3551_v6   ;;  %v4131_v6 = vld [vmem:[%s8348_s23 + $0xe8] sm:$0xff] }
  0x82   :  { %3595 = vperm.xlu1 %7965, %v3554_v7   ;;  %3590 = vperm.xlu0 %7964, %v3553_v8   ;;  %v4130_v7 = vld [vmem:[%s8348_s23 + $0xe0] sm:$0xff]  ;;  %v4115_v8 = vld [vmem:[%s8348_s23 + $0x68] sm:$0xff] }
  0x83   :  { %v8276_v9 = vpop.permute.xlu1 %324 }
  0x84   :  { %v8281_v12 = vpop.permute.xlu0 %180 }
  0x86   :  { %3866 = vperm.xlu1 %7965, %v3848_v10   ;;  %3861 = vperm.xlu0 %7964, %v3847_v11   ;;  %v4114_v10 = vld [vmem:[%s8348_s23 + $0x60] sm:$0xff] }
  0x89   :  { %v8283_v15 = vpop.permute.xlu1 %329  ;;  %v8285_v16 = vpop.permute.xlu0 %185 }
  0x8a   :  { %3856 = vperm.xlu1 %7965, %v3846_v13   ;;  %3851 = vperm.xlu0 %7964, %v3845_v14   ;;  %v4129_v14 = vld [vmem:[%s8348_s23 + $0xd8] sm:$0xff] }
  0x8d   :  { %v8290_v19 = vpop.permute.xlu1 %452  ;;  %v8292_v20 = vpop.permute.xlu0 %447 }
  0x8e   :  { %3966 = vperm.xlu1 %7965, %v3946_v17   ;;  %3961 = vperm.xlu0 %7964, %v3945_v18   ;;  %v4128_v17 = vld [vmem:[%s8348_s23 + $0xd0] sm:$0xff] }
  0x91   :  { %v8294_v23 = vpop.permute.xlu1 %574  ;;  %v8296_v24 = vpop.permute.xlu0 %569 }
  0x92   :  { %3956 = vperm.xlu1 %7965, %v3944_v21   ;;  %3951 = vperm.xlu0 %7964, %v3943_v22   ;;  %v4113_v22 = vld [vmem:[%s8348_s23 + $0x58] sm:$0xff] }
  0x95   :  { %v8303_v27 = vpop.permute.xlu1 %696  ;;  %v8305_v28 = vpop.permute.xlu0 %691 }
  0x96   :  { %5321 = vperm.xlu1 %7965, %v5309_v25   ;;  %5316 = vperm.xlu0 %7964, %v5308_v26   ;;  %v4112_v25 = vld [vmem:[%s8348_s23 + $0x50] sm:$0xff] }
  0x99   :  { %v8307_v31 = vpop.permute.xlu1 %818  ;;  %v8309_v32 = vpop.permute.xlu0 %813 }
  0x9a   :  { %5331 = vperm.xlu1 %7965, %v5311_v29   ;;  %5326 = vperm.xlu0 %7964, %v5310_v30  }
  0x9d   :  { %v8313_v35 = vpop.permute.xlu1 %940  ;;  %v8315_v36 = vpop.permute.xlu0 %935 }
  0x9e   :  { %5140 = vperm.xlu1 %7965, %v5062_v33   ;;  %5135 = vperm.xlu0 %7964, %v5061_v34   ;;  %v4127_v34 = vld [vmem:[%s8348_s23 + $0xc8] sm:$0xff] }
  0xa1   :  { %v8319_v39 = vpop.permute.xlu1 %1062  ;;  %v8321_v40 = vpop.permute.xlu0 %1057 }
  0xa2   :  { %5130 = vperm.xlu1 %7965, %v5060_v37   ;;  %5125 = vperm.xlu0 %7964, %v5059_v38   ;;  %v4126_v37 = vld [vmem:[%s8348_s23 + $0xc0] sm:$0xff] }
  0xa5   :  { %v8325_v43 = vpop.permute.xlu1 %1184  ;;  %v8327_v44 = vpop.permute.xlu0 %1179 }
  0xa6   :  { %5120 = vperm.xlu1 %7965, %v5058_v41   ;;  %5115 = vperm.xlu0 %7964, %v5057_v42  }
  0xa9   :  { %v8331_v47 = vpop.permute.xlu1 %1306  ;;  %v8333_v48 = vpop.permute.xlu0 %1301 }
  0xaa   :  { %5110 = vperm.xlu1 %7965, %v5056_v45   ;;  %5105 = vperm.xlu0 %7964, %v5055_v46  }
  0xad   :  { %v8339_v53 = vpop.permute.xlu1 %1428  ;;  %v8341_v54 = vpop.permute.xlu0 %1423 }
  0xae   :  { %5100 = vperm.xlu1 %7965, %v5054_v49   ;;  %5095 = vperm.xlu0 %7964, %v5053_v50  }
  0xb1   :  { %v8350_v57 = vpop.permute.xlu1 %1550  ;;  %v8352_v58 = vpop.permute.xlu0 %1545 }
  0xb2   :  { %5090 = vperm.xlu1 %7965, %v5052_v51   ;;  %5085 = vperm.xlu0 %7964, %v5051_v52  }
  0xb5   :  { %v8358_v63 = vpop.permute.xlu1 %1672  ;;  %v8360_v1 = vpop.permute.xlu0 %1667 }
  0xb6   :  { %5080 = vperm.xlu1 %7965, %v5050_v55   ;;  %5075 = vperm.xlu0 %7964, %v5049_v56  }
  0xb9   :  { %v8364_v4 = vpop.permute.xlu1 %1794  ;;  %v8366_v5 = vpop.permute.xlu0 %1789 }
  0xba   :  { %5070 = vperm.xlu1 %7965, %v5048_v59   ;;  %5065 = vperm.xlu0 %7964, %v5047_v60  }
  0xbd   :  { %v8372_v11 = vpop.permute.xlu1 %1916  ;;  %v8374_v13 = vpop.permute.xlu0 %1911 }
  0xbe   :  { %4323 = vperm.xlu1 %7965, %v4133_v61   ;;  %4318 = vperm.xlu0 %7964, %v4132_v62   ;;  %v4111_v62 = vld [vmem:[%s8348_s23 + $0x48] sm:$0xff] }
  0xc1   :  { %v8378_v18 = vpop.permute.xlu1 %2038  ;;  %v8380_v21 = vpop.permute.xlu0 %2033 }
  0xc2   :  { %4243 = vperm.xlu1 %7965, %v4117_v2   ;;  %4238 = vperm.xlu0 %7964, %v4116_v3   ;;  %v4110_v2 = vld [vmem:[%s8348_s23 + $0x40] sm:$0xff] }
  0xc5   :  { %v8388_v46 = vpop.permute.xlu1 %2160  ;;  %v8390_v49 = vpop.permute.xlu0 %2155 }
  0xc6   :  { %4313 = vperm.xlu1 %7965, %v4131_v6   ;;  %4308 = vperm.xlu0 %7964, %v4130_v7  }
  0xca   :  { %4233 = vperm.xlu1 %7965, %v4115_v8   ;;  %4228 = vperm.xlu0 %7964, %v4114_v10  }
  0xce   :  { %4303 = vperm.xlu1 %7965, %v4129_v14   ;;  %4298 = vperm.xlu0 %7964, %v4128_v17   ;;  %v8400_v17 = vpop.permute.xlu1 %2282 }
  0xd0   :  { %v254_v26 = vpop.f32.mrf.mxu0  ;;  %v297_v29 = vpop.f32.mrf.mxu1 }
  0xd1   :  { %v255_v56 = vadd.f32 %v254_v26, %v8281_v12  ;;  %v298_v59 = vadd.f32 %v297_v29, %v8281_v12  ;;  %v4165_v29 = vld [vmem:[%s8348_s23 + $0x1f8] sm:$0xff] }
  0xd2   :  { %4223 = vperm.xlu1 %7965, %v4113_v22   ;;  %4218 = vperm.xlu0 %7964, %v4112_v25   ;;  %v256_v30 = vpop.f32.mrf.mxu0  ;;  %v299_v33 = vpop.f32.mrf.mxu1 }
  0xd3   :  { %v257_v38 = vadd.f32 %v256_v30, %v8281_v12  ;;  %v300_v41 = vadd.f32 %v299_v33, %v8281_v12  ;;  %v8402_v12 = vpop.permute.xlu0 %2277  ;;  %v306_v22 = vmax.f32 %v255_v56, 0.0  ;;  %v4164_v30 = vld [vmem:[%s8348_s23 + $0x1f0] sm:$0xff]  ;;  %v4109_v56 = vld [vmem:[%s8348_s23 + $0x38] sm:$0xff] }
  0xd4   :  { %v258_v42 = vpop.f32.mrf.mxu0  ;;  %v301_v45 = vpop.f32.mrf.mxu1 }
  0xd5   :  { %v259_v50 = vadd.f32 %v258_v42, %v8285_v16  ;;  %v302_v51 = vadd.f32 %v301_v45, %v8285_v16  ;;  %v307_v3 = vmax.f32 %v257_v38, 0.0  ;;  %v309_v6 = vmax.f32 %v300_v41, 0.0  ;;  %v4149_v38 = vld [vmem:[%s8348_s23 + $0x178] sm:$0xff]  ;;  %v4148_v41 = vld [vmem:[%s8348_s23 + $0x170] sm:$0xff]  ;;  %v8409_v42 = vpop.permute.xlu1 %2404 }
  0xd6   :  { %4293 = vperm.xlu1 %7965, %v4127_v34   ;;  %4288 = vperm.xlu0 %7964, %v4126_v37   ;;  %v260_v52 = vpop.f32.mrf.mxu0  ;;  %v303_v55 = vpop.f32.mrf.mxu1  ;;  %v7971_v37 = vld [vmem:[%s8263_s25] sm:$0xff]  }
  0xd7   :  { %v261_v60 = vadd.f32 %v260_v52, %v8285_v16  ;;  %v304_v61 = vadd.f32 %v303_v55, %v8285_v16  ;;  %v310_v7 = vmax.f32 %v259_v50, 0.0  ;;  %v312_v8 = vmax.f32 %v302_v51, 0.0  ;;  %v8411_v45 = vpop.permute.xlu0 %2399  ;;  %v4125_v50 = vld [vmem:[%s8348_s23 + $0xb8] sm:$0xff]  ;;  %v4124_v51 = vld [vmem:[%s8348_s23 + $0xb0] sm:$0xff] }
  0xd8   :  { %v308_v16 = vmax.f32 %v298_v59, 0.0  ;;  %v4108_v59 = vld [vmem:[%s8348_s23 + $0x30] sm:$0xff] }
  0xd9   :  { %v311_v10 = vmax.f32 %v261_v60, 0.0  ;;  %v313_v14 = vmax.f32 %v304_v61, 0.0  ;;  %v318_v33 = vpack.c.bf16 %v310_v7, %v306_v22  ;;  %v8419_v52 = vpop.permute.xlu1 %2526  ;;  %v4163_v60 = vld [vmem:[%s8348_s23 + $0x1e8] sm:$0xff]  ;;  %v4162_v61 = vld [vmem:[%s8348_s23 + $0x1e0] sm:$0xff] }
  0xda   :  { %4213 = vperm.xlu1 %7965, %v4111_v62   ;;  %4208 = vperm.xlu0 %7964, %v4110_v2   ;;  %v320_v34 = vpack.c.bf16 %v312_v8, %v308_v16  ;;  %v4107_v22 = vld [vmem:[%s8348_s23 + $0x28] sm:$0xff]  ;;  %v4106_v16 = vld [vmem:[%s8348_s23 + $0x20] sm:$0xff] }
  0xdb   :  { %v319_v25 = vpack.c.bf16 %v311_v10, %v307_v3  ;;  %v321_v26 = vpack.c.bf16 %v313_v14, %v309_v6  ;;  %v8421_v55 = vpop.permute.xlu0 %2521  ;;  %v4147_v3 = vld [vmem:[%s8348_s23 + $0x168] sm:$0xff]  ;;  %v4146_v6 = vld [vmem:[%s8348_s23 + $0x160] sm:$0xff] }
  0xdc   :  { %v4123_v10 = vld [vmem:[%s8348_s23 + $0xa8] sm:$0xff]  ;;  %v4122_v14 = vld [vmem:[%s8348_s23 + $0xa0] sm:$0xff] }
  0xdd   :  { %355 = vmatprep.subr.bf16.mxu0 %v319_v25  ;;  %398 = vmatprep.subr.bf16.mxu1 %v321_v26  ;;  %v8427_v62 = vpop.permute.xlu1 %2648 }
  0xde   :  { %4483 = vperm.xlu1 %7965, %v4165_v29   ;;  %4478 = vperm.xlu0 %7964, %v4164_v30   ;;  %v4161_v29 = vld [vmem:[%s8348_s23 + $0x1d8] sm:$0xff]  ;;  %v4160_v30 = vld [vmem:[%s8348_s23 + $0x1d0] sm:$0xff] }
  0xdf   :  { %356 = vmatpush1.bf16.msra.mxu0 %v318_v33  ;;  %399 = vmatpush1.bf16.msra.mxu1 %v320_v34  ;;  %v8429_v2 = vpop.permute.xlu0 %2643 }
  0xe1   :  { %v8433_v7 = vpop.permute.xlu1 %2770 }
  0xe2   :  { %6935 = vmatmul.mubr.msk.bf16.vlgmr.msra.gmra.mxu0 %vm337_vm2, %v7971_v37  ;;  %6936 = vmatmul.mubr.msk.bf16.vlgmr.msra.gmra.mxu1 %vm337_vm2, %v7971_v37  ;;  %9765 = vst [vmem:[#allocation2_spill] sm:$0xff] %v8433_v7  ;;  %v4145_v37 = vld [vmem:[%s8348_s23 + $0x158] sm:$0xff] }
  0xe3   :  { %4403 = vperm.xlu1 %7965, %v4149_v38   ;;  %4398 = vperm.xlu0 %7964, %v4148_v41   ;;  %v8435_v8 = vpop.permute.xlu0 %2765  ;;  %v4144_v38 = vld [vmem:[%s8348_s23 + $0x150] sm:$0xff]  ;;  %v4121_v41 = vld [vmem:[%s8348_s23 + $0x98] sm:$0xff] }
  0xe4   :  { %495 = vmatprep.mubr.bf16.mxu0 %v9716_v0  ;;  %538 = vmatprep.mubr.bf16.mxu1 %v9716_v0 }
  0xe5   :  { %v8441_v25 = vpop.permute.xlu1 %2894 }
  0xe6   :  { %9766 = vst [vmem:[#allocation3_spill] sm:$0xff] %v8441_v25 }
  0xe7   :  { %4283 = vperm.xlu1 %7965, %v4125_v50   ;;  %4278 = vperm.xlu0 %7964, %v4124_v51   ;;  %v8443_v26 = vpop.permute.xlu0 %2889  ;;  %v4120_v50 = vld [vmem:[%s8348_s23 + $0x90] sm:$0xff] }
  0xe8   :  { %9767 = vst [vmem:[#allocation4_spill] sm:$0xff] %v8443_v26 }
  0xe9   :  { %v8447_v33 = vpop.permute.xlu1 %2904 }
  0xea   :  { %9768 = vst [vmem:[#allocation5_spill] sm:$0xff] %v8447_v33 }
  0xeb   :  { %4203 = vperm.xlu1 %7965, %v4109_v56   ;;  %4198 = vperm.xlu0 %7964, %v4108_v59   ;;  %v8449_v34 = vpop.permute.xlu0 %2899  ;;  %v4105_v59 = vld [vmem:[%s8348_s23 + $0x18] sm:$0xff] }
  0xec   :  { %9769 = vst [vmem:[#allocation6_spill] sm:$0xff] %v8449_v34 }
  0xed   :  { %v8455_v51 = vpop.permute.xlu1 %3448 }
  0xee   :  { %9770 = vst [vmem:[#allocation7_spill] sm:$0xff] %v8455_v51 }
  0xef   :  { %4473 = vperm.xlu1 %7965, %v4163_v60   ;;  %4468 = vperm.xlu0 %7964, %v4162_v61   ;;  %v8457_v56 = vpop.permute.xlu0 %3443  ;;  %v4104_v60 = vld [vmem:[%s8348_s23 + $0x10] sm:$0xff] }
  0xf0   :  { %9771 = vst [vmem:[#allocation8_spill] sm:$0xff] %v8457_v56 }
  0xf1   :  { %v8461_v61 = vpop.permute.xlu1 %3438 }
  0xf2   :  { %9772 = vst [vmem:[#allocation9_spill] sm:$0xff] %v8461_v61 }
  0xf3   :  { %4393 = vperm.xlu1 %7965, %v4147_v3   ;;  %4388 = vperm.xlu0 %7964, %v4146_v6   ;;  %v8463_v3 = vpop.permute.xlu0 %3433  ;;  %v4159_v6 = vld [vmem:[%s8348_s23 + $0x1c8] sm:$0xff] }
  0xf4   :  { %9773 = vst [vmem:[#allocation10_spill] sm:$0xff] %v8463_v3 }
  0xf7   :  { %4273 = vperm.xlu1 %7965, %v4123_v10   ;;  %4268 = vperm.xlu0 %7964, %v4122_v14   ;;  %v4158_v10 = vld [vmem:[%s8348_s23 + $0x1c0] sm:$0xff]  ;;  %v4143_v14 = vld [vmem:[%s8348_s23 + $0x148] sm:$0xff] }
  0xfb   :  { %4193 = vperm.xlu1 %7965, %v4107_v22   ;;  %4188 = vperm.xlu0 %7964, %v4106_v16   ;;  %v4142_v22 = vld [vmem:[%s8348_s23 + $0x140] sm:$0xff]  ;;  %v8469_v16 = vpop.permute.xlu1 %3428 }
  0xfc   :  { %9774 = vst [vmem:[#allocation11_spill] sm:$0xff] %v8469_v16 }
  0xff   :  { %4463 = vperm.xlu1 %7965, %v4161_v29   ;;  %4458 = vperm.xlu0 %7964, %v4160_v30   ;;  %v8471_v29 = vpop.permute.xlu0 %3423  ;;  %v4119_v30 = vld [vmem:[%s8348_s23 + $0x88] sm:$0xff] }
 0x100   :  { %9775 = vst [vmem:[#allocation12_spill] sm:$0xff] %v8471_v29 }
 0x103   :  { %4383 = vperm.xlu1 %7965, %v4145_v37   ;;  %4378 = vperm.xlu0 %7964, %v4144_v38   ;;  %v4118_v37 = vld [vmem:[%s8348_s23 + $0x80] sm:$0xff]  ;;  %v8475_v38 = vpop.permute.xlu1 %3565 }
 0x104   :  { %9776 = vst [vmem:[#allocation13_spill] sm:$0xff] %v8475_v38  ;;  %v4139_v38 = vld [vmem:[%s8348_s23 + $0x128] sm:$0xff] }
 0x107   :  { %4263 = vperm.xlu1 %7965, %v4121_v41   ;;  %4258 = vperm.xlu0 %7964, %v4120_v50   ;;  %v8477_v41 = vpop.permute.xlu0 %3560  ;;  %v4103_v50 = vld [vmem:[%s8348_s23 + $0x8] sm:$0xff] }
 0x108   :  { %9777 = vst [vmem:[#allocation14_spill] sm:$0xff] %v8477_v41  ;;  %v5952_v41 = vld [vmem:[%s6911_s28 + $0x10] sm:$0xff] }
 0x10b   :  { %4183 = vperm.xlu1 %7965, %v4105_v59   ;;  %4178 = vperm.xlu0 %7964, %v4104_v60   ;;  %v4102_v59 = vld [vmem:[%s8348_s23] sm:$0xff]  ;;  %v4157_v60 = vld [vmem:[%s8348_s23 + $0x1b8] sm:$0xff] }
 0x10f   :  { %4453 = vperm.xlu1 %7965, %v4159_v6   ;;  %4448 = vperm.xlu0 %7964, %v4158_v10   ;;  %v4156_v6 = vld [vmem:[%s8348_s23 + $0x1b0] sm:$0xff]  ;;  %v8483_v10 = vpop.permute.xlu1 %3575 }
 0x110   :  { %9778 = vst [vmem:[#allocation15_spill] sm:$0xff] %v8483_v10  ;;  %v4151_v10 = vld [vmem:[%s8348_s23 + $0x188] sm:$0xff] }
 0x113   :  { %4373 = vperm.xlu1 %7965, %v4143_v14   ;;  %4368 = vperm.xlu0 %7964, %v4142_v22   ;;  %v8485_v14 = vpop.permute.xlu0 %3570  ;;  %v4141_v22 = vld [vmem:[%s8348_s23 + $0x138] sm:$0xff] }
 0x114   :  { %9779 = vst [vmem:[#allocation16_spill] sm:$0xff] %v8485_v14 }
 0x117   :  { %4253 = vperm.xlu1 %7965, %v4119_v30   ;;  %4248 = vperm.xlu0 %7964, %v4118_v37   ;;  %v4140_v30 = vld [vmem:[%s8348_s23 + $0x130] sm:$0xff]  ;;  %v8489_v37 = vpop.permute.xlu1 %3585  ;;  %v8491_v0 = vpop.permute.xlu0 %3580 }
 0x118   :  { %9780 = vst [vmem:[#allocation17_spill] sm:$0xff] %v8489_v37  ;;  %9781 = vst [vmem:[#allocation18_spill] sm:$0xff] %v8491_v0  ;;  %v4153_v37 = vld [vmem:[%s8348_s23 + $0x198] sm:$0xff]  ;;  %v4152_v0 = vld [vmem:[%s8348_s23 + $0x190] sm:$0xff] }
 0x11b   :  { %4173 = vperm.xlu1 %7965, %v4103_v50   ;;  %4168 = vperm.xlu0 %7964, %v4102_v59   ;;  %v4155_v50 = vld [vmem:[%s8348_s23 + $0x1a8] sm:$0xff]  ;;  %v4154_v59 = vld [vmem:[%s8348_s23 + $0x1a0] sm:$0xff]  ;;  %v8499_v14 = vpop.permute.xlu0 %3590 }
 0x11c   :  { %9783 = vst [vmem:[#allocation20_spill] sm:$0xff] %v8499_v14  ;;  %v5953_v14 = vld [vmem:[%s6911_s28 + $0x18] sm:$0xff] }
 0x11f   :  { %4443 = vperm.xlu1 %7965, %v4157_v60   ;;  %4438 = vperm.xlu0 %7964, %v4156_v6   ;;  %v4138_v60 = vld [vmem:[%s8348_s23 + $0x120] sm:$0xff]  ;;  %v8497_v6 = vpop.permute.xlu1 %3595 }
 0x120   :  { %9782 = vst [vmem:[#allocation19_spill] sm:$0xff] %v8497_v6  ;;  %v4150_v6 = vld [vmem:[%s8348_s23 + $0x180] sm:$0xff] }
 0x123   :  { %4363 = vperm.xlu1 %7965, %v4141_v22   ;;  %4358 = vperm.xlu0 %7964, %v4140_v30   ;;  %v8503_v22 = vpop.permute.xlu1 %3866  ;;  %v8505_v30 = vpop.permute.xlu0 %3861 }
 0x124   :  { %9784 = vst [vmem:[#allocation21_spill] sm:$0xff] %v8503_v22  ;;  %9785 = vst [vmem:[#allocation22_spill] sm:$0xff] %v8505_v30  ;;  %v4135_v22 = vld [vmem:[%s8348_s23 + $0x108] sm:$0xff] }
 0x127   :  { %4433 = vperm.xlu1 %7965, %v4155_v50   ;;  %4428 = vperm.xlu0 %7964, %v4154_v59   ;;  %v4137_v50 = vld [vmem:[%s8348_s23 + $0x118] sm:$0xff]  ;;  %v4136_v59 = vld [vmem:[%s8348_s23 + $0x110] sm:$0xff] }
 0x12b   :  { %4353 = vperm.xlu1 %7965, %v4139_v38   ;;  %4348 = vperm.xlu0 %7964, %v4138_v60   ;;  %v8514_v38 = vpop.permute.xlu1 %3856  ;;  %v8516_v60 = vpop.permute.xlu0 %3851 }
 0x12c   :  { %9786 = vst [vmem:[#allocation23_spill] sm:$0xff] %v8514_v38  ;;  %9787 = vst [vmem:[#allocation24_spill] sm:$0xff] %v8516_v60 }
 0x12f   :  { %4423 = vperm.xlu1 %7965, %v4153_v37   ;;  %4418 = vperm.xlu0 %7964, %v4152_v0   ;;  %v4134_v37 = vld [vmem:[%s8348_s23 + $0x100] sm:$0xff]  ;;  %v8520_v0 = vpop.permute.xlu1 %3966  ;;  %v8522_v30 = vpop.permute.xlu0 %3961  ;;  %s8165_s23 = smov 1  }
 0x130   :  { %9788 = vst [vmem:[#allocation25_spill] sm:$0xff] %v8520_v0  ;;  %9789 = vst [vmem:[#allocation26_spill] sm:$0xff] %v8522_v30  ;;  %v6161_v30 = vld [vmem:[%s6913_s2 + $0x10] sm:$0xff] }
 0x133   :  { %4343 = vperm.xlu1 %7965, %v4137_v50   ;;  %4338 = vperm.xlu0 %7964, %v4136_v59   ;;  %v5951_v50 = vld [vmem:[%s6911_s28 + $0x8] sm:$0xff]  ;;  %v5950_v59 = vld [vmem:[%s6911_s28] sm:$0xff]  ;;  %v8524_v29 = vpop.permute.xlu1 %3956  ;;  %v8526_v38 = vpop.permute.xlu0 %3951 }
 0x134   :  { %9790 = vst [vmem:[#allocation27_spill] sm:$0xff] %v8524_v29  ;;  %9791 = vst [vmem:[#allocation28_spill] sm:$0xff] %v8526_v38  ;;  %v6160_v29 = vld [vmem:[%s6913_s2 + $0x8] sm:$0xff]  ;;  %v6162_v38 = vld [vmem:[%s6913_s2 + $0x18] sm:$0xff] }
 0x137   :  { %4413 = vperm.xlu1 %7965, %v4151_v10   ;;  %4408 = vperm.xlu0 %7964, %v4150_v6   ;;  %v5955_v10 = vld [vmem:[%s6911_s28 + $0x28] sm:$0xff]  ;;  %v5954_v6 = vld [vmem:[%s6911_s28 + $0x20] sm:$0xff] }
 0x13b   :  { %4333 = vperm.xlu1 %7965, %v4135_v22   ;;  %4328 = vperm.xlu0 %7964, %v4134_v37   ;;  %v8531_v22 = vpop.permute.xlu1 %5321  ;;  %v8533_v37 = vpop.permute.xlu0 %5316 }
 0x13c   :  { %9792 = vst [vmem:[#allocation29_spill] sm:$0xff] %v8531_v22  ;;  %9793 = vst [vmem:[#allocation30_spill] sm:$0xff] %v8533_v37 }
 0x13f   :  { %5965 = vperm.xlu1 %7965, %v5951_v50   ;;  %5960 = vperm.xlu0 %7964, %v5950_v59   ;;  %v5957_v50 = vld [vmem:[%s6911_s28 + $0x38] sm:$0xff]  ;;  %v5956_v59 = vld [vmem:[%s6911_s28 + $0x30] sm:$0xff]  ;;  %v8537_v0 = vpop.permute.xlu0 %5326  ;;  %s9094_s28 = sld [smem:[%s9715_s0 + %s8175_s26]]  }
 0x140   :  { %9795 = vst [vmem:[#allocation32_spill] sm:$0xff] %v8537_v0  ;;  %v6428_v0 = vld [vmem:[%s6915_s6 + $0x38] sm:$0xff] }
 0x143   :  { %5975 = vperm.xlu1 %7965, %v5953_v14   ;;  %5970 = vperm.xlu0 %7964, %v5952_v41   ;;  %v6159_v14 = vld [vmem:[%s6913_s2] sm:$0xff]  ;;  %v8535_v41 = vpop.permute.xlu1 %5331  ;;  %v8541_v22 = vpop.permute.xlu0 %5135 }
 0x144   :  { %9794 = vst [vmem:[#allocation31_spill] sm:$0xff] %v8535_v41  ;;  %9797 = vst [vmem:[#allocation34_spill] sm:$0xff] %v8541_v22  ;;  %v6426_v41 = vld [vmem:[%s6915_s6 + $0x28] sm:$0xff]  ;;  %v6425_v22 = vld [vmem:[%s6915_s6 + $0x20] sm:$0xff] }
 0x147   :  { %5985 = vperm.xlu1 %7965, %v5955_v10   ;;  %5980 = vperm.xlu0 %7964, %v5954_v6   ;;  %v8539_v60 = vpop.permute.xlu1 %5140  ;;  %v6164_v10 = vld [vmem:[%s6913_s2 + $0x28] sm:$0xff]  ;;  %v6163_v6 = vld [vmem:[%s6913_s2 + $0x20] sm:$0xff] }
 0x148   :  { %9796 = vst [vmem:[#allocation33_spill] sm:$0xff] %v8539_v60  ;;  %v6581_v60 = vld [vmem:[%s6917_s10 + $0x18] sm:$0xf] }
 0x14b   :  { %5995 = vperm.xlu1 %7965, %v5957_v50   ;;  %5990 = vperm.xlu0 %7964, %v5956_v59   ;;  %v6166_v50 = vld [vmem:[%s6913_s2 + $0x38] sm:$0xff]  ;;  %v8546_v59 = vpop.permute.xlu1 %5130 }
 0x14c   :  { %9798 = vst [vmem:[#allocation35_spill] sm:$0xff] %v8546_v59 }
 0x14f   :  { %6174 = vperm.xlu1 %7965, %v6160_v29   ;;  %6169 = vperm.xlu0 %7964, %v6159_v14   ;;  %v6165_v29 = vld [vmem:[%s6913_s2 + $0x30] sm:$0xff]  ;;  %v8548_v14 = vpop.permute.xlu0 %5125  ;;  %s9101_s2 = sld [smem:[%s9715_s0 + %s8176_s29]]  }
 0x150   :  { %9799 = vst [vmem:[#allocation36_spill] sm:$0xff] %v8548_v14  ;;  %v6422_v14 = vld [vmem:[%s6915_s6 + $0x8] sm:$0xff] }
 0x153   :  { %6184 = vperm.xlu1 %7965, %v6162_v38   ;;  %6179 = vperm.xlu0 %7964, %v6161_v30   ;;  %v6427_v38 = vld [vmem:[%s6915_s6 + $0x30] sm:$0xff]  ;;  %v8550_v30 = vpop.permute.xlu1 %5120  ;;  %v8552_v37 = vpop.permute.xlu0 %5115 }
 0x154   :  { %9800 = vst [vmem:[#allocation37_spill] sm:$0xff] %v8550_v30  ;;  %9801 = vst [vmem:[#allocation38_spill] sm:$0xff] %v8552_v37  ;;  %v6774_v37 = vld [vmem:[%s6921_s18 + $0x8] sm:$0xff] }
 0x157   :  { %6194 = vperm.xlu1 %7965, %v6164_v10   ;;  %6189 = vperm.xlu0 %7964, %v6163_v6   ;;  %v6424_v10 = vld [vmem:[%s6915_s6 + $0x18] sm:$0xff]  ;;  %v6423_v6 = vld [vmem:[%s6915_s6 + $0x10] sm:$0xff] }
 0x15b   :  { %6204 = vperm.xlu1 %7965, %v6166_v50   ;;  %6199 = vperm.xlu0 %7964, %v6165_v29   ;;  %v8557_v50 = vpop.permute.xlu1 %5110  ;;  %v8559_v29 = vpop.permute.xlu0 %5105 }
 0x15c   :  { %9802 = vst [vmem:[#allocation39_spill] sm:$0xff] %v8557_v50  ;;  %9803 = vst [vmem:[#allocation40_spill] sm:$0xff] %v8559_v29  ;;  %v6676_v29 = vld [vmem:[%s6919_s14 + $0x8] sm:$0xff] }
 0x15f   :  { %6466 = vperm.xlu1 %7965, %v6428_v0   ;;  %6461 = vperm.xlu0 %7964, %v6427_v38   ;;  %v6421_v0 = vld [vmem:[%s6915_s6] sm:$0xff]  ;;  %v8561_v38 = vpop.permute.xlu1 %5100  ;;  %v8563_v59 = vpop.permute.xlu0 %5095  ;;  %s9399_s6 = sld [smem:[%s9715_s0 + %s8177_s3]]  }
 0x160   :  { %9804 = vst [vmem:[#allocation41_spill] sm:$0xff] %v8561_v38  ;;  %9805 = vst [vmem:[#allocation42_spill] sm:$0xff] %v8563_v59  ;;  %v6775_v38 = vld [vmem:[%s6921_s18 + $0x10] sm:$0xff] }
 0x163   :  { %6456 = vperm.xlu1 %7965, %v6426_v41   ;;  %6451 = vperm.xlu0 %7964, %v6425_v22   ;;  %v6579_v22 = vld [vmem:[%s6917_s10 + $0x8] sm:$0xff]  ;;  %v6578_v41 = vld [vmem:[%s6917_s10] sm:$0xff]  ;;  %v8570_v50 = vpop.permute.xlu0 %5085 }
 0x164   :  { %9807 = vst [vmem:[#allocation44_spill] sm:$0xff] %v8570_v50  ;;  %v6776_v50 = vld [vmem:[%s6921_s18 + $0x18] sm:$0xf] }
 0x167   :  { %6446 = vperm.xlu1 %7965, %v6424_v10   ;;  %6441 = vperm.xlu0 %7964, %v6423_v6   ;;  %v6580_v10 = vld [vmem:[%s6917_s10 + $0x10] sm:$0xff]  ;;  %v8568_v6 = vpop.permute.xlu1 %5090  ;;  %v8577_v30 = vpop.permute.xlu0 %5075  ;;  %s9430_s10 = sld [smem:[%s9715_s0 + %s8178_s7]]  }
 0x168   :  { %9806 = vst [vmem:[#allocation43_spill] sm:$0xff] %v8568_v6  ;;  %9809 = vst [vmem:[#allocation46_spill] sm:$0xff] %v8577_v30 }
 0x16b   :  { %6436 = vperm.xlu1 %7965, %v6422_v14   ;;  %6431 = vperm.xlu0 %7964, %v6421_v0   ;;  %v6675_v14 = vld [vmem:[%s6919_s14] sm:$0xff]  ;;  %v8575_v0 = vpop.permute.xlu1 %5080  ;;  %v8581_v6 = vpop.permute.xlu0 %5065 }
 0x16c   :  { %9808 = vst [vmem:[#allocation45_spill] sm:$0xff] %v8575_v0  ;;  %9811 = vst [vmem:[#allocation48_spill] sm:$0xff] %v8581_v6 }
 0x16f   :  { %6589 = vperm.xlu1 %7965, %v6579_v22   ;;  %6584 = vperm.xlu0 %7964, %v6578_v41   ;;  %v6678_v22 = vld [vmem:[%s6919_s14 + $0x18] sm:$0xf]  ;;  %v6677_v41 = vld [vmem:[%s6919_s14 + $0x10] sm:$0xff]  ;;  %v8585_v0 = vpop.permute.xlu0 %4318  ;;  %s9533_s14 = sld [smem:[%s9715_s0 + %s8179_s11]]  }
 0x170   :  { %9813 = vst [vmem:[#allocation50_spill] sm:$0xff] %v8585_v0 }
 0x173   :  { %6599 = vperm.xlu1 %7965, %v6581_v60   ;;  %6594 = vperm.xlu0 %7964, %v6580_v10   ;;  %v6773_v60 = vld [vmem:[%s6921_s18] sm:$0xff]  ;;  %v8579_v10 = vpop.permute.xlu1 %5070  ;;  %s9543_s18 = sld [smem:[%s9715_s0 + %s8180_s15]]  }
 0x174   :  { %9810 = vst [vmem:[#allocation47_spill] sm:$0xff] %v8579_v10 }
 0x177   :  { %6686 = vperm.xlu1 %7965, %v6676_v29   ;;  %6681 = vperm.xlu0 %7964, %v6675_v14   ;;  %v8583_v59 = vpop.permute.xlu1 %4323 }
 0x178   :  { %9812 = vst [vmem:[#allocation49_spill] sm:$0xff] %v8583_v59 }
 0x17b   :  { %6696 = vperm.xlu1 %7965, %v6678_v22   ;;  %6691 = vperm.xlu0 %7964, %v6677_v41  }
 0x17f   :  { %6788 = vperm.xlu1 %7965, %v6774_v37   ;;  %6783 = vperm.xlu0 %7964, %v6773_v60  }
 0x183   :  { %6798 = vperm.xlu1 %7965, %v6776_v50   ;;  %6793 = vperm.xlu0 %7964, %v6775_v38  }
 0x1a2   :  { %v375_v29 = vpop.f32.mrf.mxu0  ;;  %v418_v14 = vpop.f32.mrf.mxu1 }
 0x1a3   :  { %v376_v59 = vadd.f32 %v375_v29, %v8276_v9  ;;  %v419_v0 = vadd.f32 %v418_v14, %v8276_v9 }
 0x1a4   :  { %v377_v22 = vpop.f32.mrf.mxu0  ;;  %v420_v41 = vpop.f32.mrf.mxu1 }
 0x1a5   :  { %v378_v10 = vadd.f32 %v377_v22, %v8276_v9  ;;  %v421_v6 = vadd.f32 %v420_v41, %v8276_v9  ;;  %v429_v25 = vmax.f32 %v419_v0, 0.0  ;;  %v7972_v9 = vld [vmem:[%s8263_s25 + $0x8] sm:$0xff]  }
 0x1a6   :  { %v379_v30 = vpop.f32.mrf.mxu0  ;;  %v422_v16 = vpop.f32.mrf.mxu1 }
 0x1a7   :  { %v380_v37 = vadd.f32 %v379_v30, %v8283_v15  ;;  %v423_v60 = vadd.f32 %v422_v16, %v8283_v15  ;;  %v428_v22 = vmax.f32 %v378_v10, 0.0  ;;  %v430_v33 = vmax.f32 %v421_v6, 0.0 }
 0x1a8   :  { %v381_v50 = vpop.f32.mrf.mxu0  ;;  %v424_v38 = vpop.f32.mrf.mxu1  ;;  %v427_v30 = vmax.f32 %v376_v59, 0.0 }
 0x1a9   :  { %v382_v51 = vadd.f32 %v381_v50, %v8283_v15  ;;  %v425_v3 = vadd.f32 %v424_v38, %v8283_v15  ;;  %v431_v56 = vmax.f32 %v380_v37, 0.0  ;;  %v433_v61 = vmax.f32 %v423_v60, 0.0 }
 0x1aa   :  { %v9814_v15 = vmov 0  }
 0x1ab   :  { %v432_v41 = vmax.f32 %v382_v51, 0.0  ;;  %v434_v34 = vmax.f32 %v425_v3, 0.0  ;;  %v441_v29 = vpack.c.bf16 %v431_v56, %v427_v30  ;;  %v443_v7 = vpack.c.bf16 %v433_v61, %v429_v25 }
 0x1ad   :  { %v442_v16 = vpack.c.bf16 %v432_v41, %v428_v22  ;;  %v444_v26 = vpack.c.bf16 %v434_v34, %v430_v33 }
 0x1af   :  { %477 = vmatprep.subr.bf16.mxu0 %v442_v16  ;;  %520 = vmatprep.subr.bf16.mxu1 %v444_v26 }
 0x1b0   :  { %478 = vmatpush1.bf16.msra.mxu0 %v441_v29  ;;  %521 = vmatpush1.bf16.msra.mxu1 %v443_v7 }
 0x1b3   :  { %6942 = vmatmul.mubr.msk.bf16.vlgmr.msra.gmra.mxu0 %vm337_vm2, %v7972_v9  ;;  %6943 = vmatmul.mubr.msk.bf16.vlgmr.msra.gmra.mxu1 %vm337_vm2, %v7972_v9 }
 0x1b4   :  { %617 = vmatprep.mubr.bf16.mxu0 %v9814_v15  ;;  %660 = vmatprep.mubr.bf16.mxu1 %v9814_v15 }
 0x273   :  { %v497_v51 = vpop.f32.mrf.mxu0  ;;  %v540_v3 = vpop.f32.mrf.mxu1 }
 0x274   :  { %v498_v61 = vadd.f32 %v497_v51, %v8292_v20  ;;  %v541_v0 = vadd.f32 %v540_v3, %v8292_v20 }
 0x275   :  { %v499_v59 = vpop.f32.mrf.mxu0  ;;  %v542_v6 = vpop.f32.mrf.mxu1 }
 0x276   :  { %v500_v25 = vadd.f32 %v499_v59, %v8292_v20  ;;  %v543_v26 = vadd.f32 %v542_v6, %v8292_v20  ;;  %v549_v29 = vmax.f32 %v498_v61, 0.0  ;;  %v551_v9 = vmax.f32 %v541_v0, 0.0  ;;  %v7973_v20 = vld [vmem:[%s8263_s25 + $0x10] sm:$0xff]  }
 0x277   :  { %v501_v33 = vpop.f32.mrf.mxu0  ;;  %v544_v34 = vpop.f32.mrf.mxu1 }
 0x278   :  { %v502_v7 = vadd.f32 %v501_v33, %v8290_v19  ;;  %v545_v56 = vadd.f32 %v544_v34, %v8290_v19  ;;  %v550_v22 = vmax.f32 %v500_v25, 0.0  ;;  %v552_v41 = vmax.f32 %v543_v26, 0.0 }
 0x279   :  { %v503_v10 = vpop.f32.mrf.mxu0  ;;  %v546_v14 = vpop.f32.mrf.mxu1 }
 0x27a   :  { %v504_v37 = vadd.f32 %v503_v10, %v8290_v19  ;;  %v547_v60 = vadd.f32 %v546_v14, %v8290_v19  ;;  %v553_v50 = vmax.f32 %v502_v7, 0.0  ;;  %v555_v38 = vmax.f32 %v545_v56, 0.0 }
 0x27c   :  { %v554_v30 = vmax.f32 %v504_v37, 0.0  ;;  %v556_v16 = vmax.f32 %v547_v60, 0.0  ;;  %v563_v51 = vpack.c.bf16 %v553_v50, %v549_v29  ;;  %v565_v33 = vpack.c.bf16 %v555_v38, %v551_v9 }
 0x27e   :  { %v564_v59 = vpack.c.bf16 %v554_v30, %v550_v22  ;;  %v566_v6 = vpack.c.bf16 %v556_v16, %v552_v41 }
 0x280   :  { %599 = vmatprep.subr.bf16.mxu0 %v564_v59  ;;  %642 = vmatprep.subr.bf16.mxu1 %v566_v6 }
 0x281   :  { %600 = vmatpush1.bf16.msra.mxu0 %v563_v51  ;;  %643 = vmatpush1.bf16.msra.mxu1 %v565_v33 }
 0x284   :  { %6949 = vmatmul.mubr.msk.bf16.vlgmr.msra.gmra.mxu0 %vm337_vm2, %v7973_v20  ;;  %6950 = vmatmul.mubr.msk.bf16.vlgmr.msra.gmra.mxu1 %vm337_vm2, %v7973_v20 }
 0x285   :  { %739 = vmatprep.mubr.bf16.mxu0 %v9814_v15  ;;  %782 = vmatprep.mubr.bf16.mxu1 %v9814_v15 }
 0x344   :  { %v619_v19 = vpop.f32.mrf.mxu0  ;;  %v662_v3 = vpop.f32.mrf.mxu1 }
 0x345   :  { %v620_v14 = vadd.f32 %v619_v19, %v8296_v24  ;;  %v663_v37 = vadd.f32 %v662_v3, %v8296_v24 }
 0x346   :  { %v621_v34 = vpop.f32.mrf.mxu0  ;;  %v664_v25 = vpop.f32.mrf.mxu1 }
 0x347   :  { %v622_v56 = vadd.f32 %v621_v34, %v8296_v24  ;;  %v665_v61 = vadd.f32 %v664_v25, %v8296_v24  ;;  %v671_v6 = vmax.f32 %v620_v14, 0.0  ;;  %v673_v51 = vmax.f32 %v663_v37, 0.0  ;;  %v7974_v24 = vld [vmem:[%s8263_s25 + $0x18] sm:$0xff]  }
 0x348   :  { %v623_v26 = vpop.f32.mrf.mxu0  ;;  %v666_v7 = vpop.f32.mrf.mxu1 }
 0x349   :  { %v624_v0 = vadd.f32 %v623_v26, %v8294_v23  ;;  %v667_v10 = vadd.f32 %v666_v7, %v8294_v23  ;;  %v672_v16 = vmax.f32 %v622_v56, 0.0  ;;  %v674_v29 = vmax.f32 %v665_v61, 0.0 }
 0x34a   :  { %v625_v60 = vpop.f32.mrf.mxu0  ;;  %v668_v50 = vpop.f32.mrf.mxu1 }
 0x34b   :  { %v626_v38 = vadd.f32 %v625_v60, %v8294_v23  ;;  %v669_v22 = vadd.f32 %v668_v50, %v8294_v23  ;;  %v675_v41 = vmax.f32 %v624_v0, 0.0  ;;  %v677_v30 = vmax.f32 %v667_v10, 0.0 }
 0x34d   :  { %v676_v9 = vmax.f32 %v626_v38, 0.0  ;;  %v678_v59 = vmax.f32 %v669_v22, 0.0  ;;  %v685_v19 = vpack.c.bf16 %v675_v41, %v671_v6  ;;  %v687_v34 = vpack.c.bf16 %v677_v30, %v673_v51 }
 0x34f   :  { %v686_v33 = vpack.c.bf16 %v676_v9, %v672_v16  ;;  %v688_v20 = vpack.c.bf16 %v678_v59, %v674_v29 }
 0x351   :  { %721 = vmatprep.subr.bf16.mxu0 %v686_v33  ;;  %764 = vmatprep.subr.bf16.mxu1 %v688_v20 }
 0x352   :  { %722 = vmatpush1.bf16.msra.mxu0 %v685_v19  ;;  %765 = vmatpush1.bf16.msra.mxu1 %v687_v34 }
 0x355   :  { %6956 = vmatmul.mubr.msk.bf16.vlgmr.msra.gmra.mxu0 %vm337_vm2, %v7974_v24  ;;  %6957 = vmatmul.mubr.msk.bf16.vlgmr.msra.gmra.mxu1 %vm337_vm2, %v7974_v24 }
 0x356   :  { %861 = vmatprep.mubr.bf16.mxu0 %v9814_v15  ;;  %904 = vmatprep.mubr.bf16.mxu1 %v9814_v15 }
 0x415   :  { %v741_v23 = vpop.f32.mrf.mxu0  ;;  %v784_v3 = vpop.f32.mrf.mxu1 }
 0x416   :  { %v742_v37 = vadd.f32 %v741_v23, %v8305_v28  ;;  %v785_v60 = vadd.f32 %v784_v3, %v8305_v28 }
 0x417   :  { %v743_v25 = vpop.f32.mrf.mxu0  ;;  %v786_v26 = vpop.f32.mrf.mxu1 }
 0x418   :  { %v744_v61 = vadd.f32 %v743_v25, %v8305_v28  ;;  %v787_v0 = vadd.f32 %v786_v26, %v8305_v28  ;;  %v793_v51 = vmax.f32 %v742_v37, 0.0  ;;  %v795_v33 = vmax.f32 %v785_v60, 0.0  ;;  %v7975_v28 = vld [vmem:[%s8263_s25 + $0x20] sm:$0xff]  }
 0x419   :  { %v745_v7 = vpop.f32.mrf.mxu0  ;;  %v788_v56 = vpop.f32.mrf.mxu1 }
 0x41a   :  { %v746_v10 = vadd.f32 %v745_v7, %v8303_v27  ;;  %v789_v14 = vadd.f32 %v788_v56, %v8303_v27  ;;  %v794_v29 = vmax.f32 %v744_v61, 0.0  ;;  %v796_v9 = vmax.f32 %v787_v0, 0.0 }
 0x41b   :  { %v747_v50 = vpop.f32.mrf.mxu0  ;;  %v790_v38 = vpop.f32.mrf.mxu1 }
 0x41c   :  { %v748_v22 = vadd.f32 %v747_v50, %v8303_v27  ;;  %v791_v41 = vadd.f32 %v790_v38, %v8303_v27  ;;  %v797_v30 = vmax.f32 %v746_v10, 0.0  ;;  %v799_v16 = vmax.f32 %v789_v14, 0.0 }
 0x41e   :  { %v798_v59 = vmax.f32 %v748_v22, 0.0  ;;  %v800_v6 = vmax.f32 %v791_v41, 0.0  ;;  %v807_v34 = vpack.c.bf16 %v797_v30, %v793_v51  ;;  %v809_v24 = vpack.c.bf16 %v799_v16, %v795_v33 }
 0x420   :  { %v808_v20 = vpack.c.bf16 %v798_v59, %v794_v29  ;;  %v810_v19 = vpack.c.bf16 %v800_v6, %v796_v9 }
 0x422   :  { %843 = vmatprep.subr.bf16.mxu0 %v808_v20  ;;  %886 = vmatprep.subr.bf16.mxu1 %v810_v19 }
 0x423   :  { %844 = vmatpush1.bf16.msra.mxu0 %v807_v34  ;;  %887 = vmatpush1.bf16.msra.mxu1 %v809_v24 }
 0x426   :  { %6963 = vmatmul.mubr.msk.bf16.vlgmr.msra.gmra.mxu0 %vm337_vm2, %v7975_v28  ;;  %6964 = vmatmul.mubr.msk.bf16.vlgmr.msra.gmra.mxu1 %vm337_vm2, %v7975_v28 }
 0x427   :  { %983 = vmatprep.mubr.bf16.mxu0 %v9814_v15  ;;  %1026 = vmatprep.mubr.bf16.mxu1 %v9814_v15 }
 0x4e6   :  { %v863_v27 = vpop.f32.mrf.mxu0  ;;  %v906_v23 = vpop.f32.mrf.mxu1 }
 0x4e7   :  { %v864_v14 = vadd.f32 %v863_v27, %v8309_v32  ;;  %v907_v37 = vadd.f32 %v906_v23, %v8309_v32 }
 0x4e8   :  { %v865_v3 = vpop.f32.mrf.mxu0  ;;  %v908_v25 = vpop.f32.mrf.mxu1 }
 0x4e9   :  { %v866_v56 = vadd.f32 %v865_v3, %v8309_v32  ;;  %v909_v61 = vadd.f32 %v908_v25, %v8309_v32  ;;  %v915_v6 = vmax.f32 %v864_v14, 0.0  ;;  %v917_v51 = vmax.f32 %v907_v37, 0.0  ;;  %v7976_v32 = vld [vmem:[%s8263_s25 + $0x28] sm:$0xff]  }
 0x4ea   :  { %v867_v26 = vpop.f32.mrf.mxu0  ;;  %v910_v7 = vpop.f32.mrf.mxu1 }
 0x4eb   :  { %v868_v0 = vadd.f32 %v867_v26, %v8307_v31  ;;  %v911_v10 = vadd.f32 %v910_v7, %v8307_v31  ;;  %v916_v16 = vmax.f32 %v866_v56, 0.0  ;;  %v918_v29 = vmax.f32 %v909_v61, 0.0 }
 0x4ec   :  { %v869_v60 = vpop.f32.mrf.mxu0  ;;  %v912_v50 = vpop.f32.mrf.mxu1 }
 0x4ed   :  { %v870_v38 = vadd.f32 %v869_v60, %v8307_v31  ;;  %v913_v22 = vadd.f32 %v912_v50, %v8307_v31  ;;  %v919_v41 = vmax.f32 %v868_v0, 0.0  ;;  %v921_v30 = vmax.f32 %v911_v10, 0.0 }
 0x4ef   :  { %v920_v9 = vmax.f32 %v870_v38, 0.0  ;;  %v922_v59 = vmax.f32 %v913_v22, 0.0  ;;  %v929_v19 = vpack.c.bf16 %v919_v41, %v915_v6  ;;  %v931_v34 = vpack.c.bf16 %v921_v30, %v917_v51 }
 0x4f1   :  { %v930_v33 = vpack.c.bf16 %v920_v9, %v916_v16  ;;  %v932_v20 = vpack.c.bf16 %v922_v59, %v918_v29 }
 0x4f3   :  { %965 = vmatprep.subr.bf16.mxu0 %v930_v33  ;;  %1008 = vmatprep.subr.bf16.mxu1 %v932_v20 }
 0x4f4   :  { %966 = vmatpush1.bf16.msra.mxu0 %v929_v19  ;;  %1009 = vmatpush1.bf16.msra.mxu1 %v931_v34 }
 0x4f7   :  { %6970 = vmatmul.mubr.msk.bf16.vlgmr.msra.gmra.mxu0 %vm337_vm2, %v7976_v32  ;;  %6971 = vmatmul.mubr.msk.bf16.vlgmr.msra.gmra.mxu1 %vm337_vm2, %v7976_v32 }
 0x4f8   :  { %1105 = vmatprep.mubr.bf16.mxu0 %v9814_v15  ;;  %1148 = vmatprep.mubr.bf16.mxu1 %v9814_v15 }
 0x5b7   :  { %v985_v31 = vpop.f32.mrf.mxu0  ;;  %v1028_v24 = vpop.f32.mrf.mxu1 }
 0x5b8   :  { %v986_v61 = vadd.f32 %v985_v31, %v8315_v36  ;;  %v1029_v0 = vadd.f32 %v1028_v24, %v8315_v36 }
 0x5b9   :  { %v987_v28 = vpop.f32.mrf.mxu0  ;;  %v1030_v27 = vpop.f32.mrf.mxu1 }
 0x5ba   :  { %v988_v25 = vadd.f32 %v987_v28, %v8315_v36  ;;  %v1031_v26 = vadd.f32 %v1030_v27, %v8315_v36  ;;  %v1037_v29 = vmax.f32 %v986_v61, 0.0  ;;  %v1039_v9 = vmax.f32 %v1029_v0, 0.0  ;;  %v7977_v36 = vld [vmem:[%s8263_s25 + $0x30] sm:$0xff]  }
 0x5bb   :  { %v989_v23 = vpop.f32.mrf.mxu0  ;;  %v1032_v3 = vpop.f32.mrf.mxu1 }
 0x5bc   :  { %v990_v7 = vadd.f32 %v989_v23, %v8313_v35  ;;  %v1033_v56 = vadd.f32 %v1032_v3, %v8313_v35  ;;  %v1038_v22 = vmax.f32 %v988_v25, 0.0  ;;  %v1040_v41 = vmax.f32 %v1031_v26, 0.0 }
 0x5bd   :  { %v991_v10 = vpop.f32.mrf.mxu0  ;;  %v1034_v14 = vpop.f32.mrf.mxu1 }
 0x5be   :  { %v992_v37 = vadd.f32 %v991_v10, %v8313_v35  ;;  %v1035_v60 = vadd.f32 %v1034_v14, %v8313_v35  ;;  %v1041_v50 = vmax.f32 %v990_v7, 0.0  ;;  %v1043_v38 = vmax.f32 %v1033_v56, 0.0 }
 0x5c0   :  { %v1042_v30 = vmax.f32 %v992_v37, 0.0  ;;  %v1044_v16 = vmax.f32 %v1035_v60, 0.0  ;;  %v1051_v51 = vpack.c.bf16 %v1041_v50, %v1037_v29  ;;  %v1053_v33 = vpack.c.bf16 %v1043_v38, %v1039_v9 }
 0x5c2   :  { %v1052_v59 = vpack.c.bf16 %v1042_v30, %v1038_v22  ;;  %v1054_v6 = vpack.c.bf16 %v1044_v16, %v1040_v41 }
 0x5c4   :  { %1087 = vmatprep.subr.bf16.mxu0 %v1052_v59  ;;  %1130 = vmatprep.subr.bf16.mxu1 %v1054_v6 }
 0x5c5   :  { %1088 = vmatpush1.bf16.msra.mxu0 %v1051_v51  ;;  %1131 = vmatpush1.bf16.msra.mxu1 %v1053_v33 }
 0x5c8   :  { %6977 = vmatmul.mubr.msk.bf16.vlgmr.msra.gmra.mxu0 %vm337_vm2, %v7977_v36  ;;  %6978 = vmatmul.mubr.msk.bf16.vlgmr.msra.gmra.mxu1 %vm337_vm2, %v7977_v36 }
 0x5c9   :  { %1227 = vmatprep.mubr.bf16.mxu0 %v9814_v15  ;;  %1270 = vmatprep.mubr.bf16.mxu1 %v9814_v15 }
 0x688   :  { %v1107_v35 = vpop.f32.mrf.mxu0  ;;  %v1150_v20 = vpop.f32.mrf.mxu1 }
 0x689   :  { %v1108_v3 = vadd.f32 %v1107_v35, %v8321_v40  ;;  %v1151_v25 = vadd.f32 %v1150_v20, %v8321_v40 }
 0x68a   :  { %v1109_v19 = vpop.f32.mrf.mxu0  ;;  %v1152_v34 = vpop.f32.mrf.mxu1 }
 0x68b   :  { %v1110_v24 = vadd.f32 %v1109_v19, %v8321_v40  ;;  %v1153_v28 = vadd.f32 %v1152_v34, %v8321_v40  ;;  %v1159_v38 = vmax.f32 %v1108_v3, 0.0  ;;  %v1161_v22 = vmax.f32 %v1151_v25, 0.0  ;;  %v7978_v40 = vld [vmem:[%s8263_s25 + $0x38] sm:$0xff]  }
 0x68c   :  { %v1111_v32 = vpop.f32.mrf.mxu0  ;;  %v1154_v31 = vpop.f32.mrf.mxu1 }
 0x68d   :  { %v1112_v27 = vadd.f32 %v1111_v32, %v8319_v39  ;;  %v1155_v23 = vadd.f32 %v1154_v31, %v8319_v39  ;;  %v1160_v14 = vmax.f32 %v1110_v24, 0.0  ;;  %v1162_v37 = vmax.f32 %v1153_v28, 0.0 }
 0x68e   :  { %v1113_v26 = vpop.f32.mrf.mxu0  ;;  %v1156_v7 = vpop.f32.mrf.mxu1 }
 0x68f   :  { %v1114_v56 = vadd.f32 %v1113_v26, %v8319_v39  ;;  %v1157_v61 = vadd.f32 %v1156_v7, %v8319_v39  ;;  %v1163_v0 = vmax.f32 %v1112_v27, 0.0  ;;  %v1165_v10 = vmax.f32 %v1155_v23, 0.0 }
 0x691   :  { %v1164_v60 = vmax.f32 %v1114_v56, 0.0  ;;  %v1166_v50 = vmax.f32 %v1157_v61, 0.0  ;;  %v1173_v16 = vpack.c.bf16 %v1163_v0, %v1159_v38  ;;  %v1175_v29 = vpack.c.bf16 %v1165_v10, %v1161_v22 }
 0x693   :  { %v1174_v41 = vpack.c.bf16 %v1164_v60, %v1160_v14  ;;  %v1176_v30 = vpack.c.bf16 %v1166_v50, %v1162_v37 }
 0x695   :  { %1209 = vmatprep.subr.bf16.mxu0 %v1174_v41  ;;  %1252 = vmatprep.subr.bf16.mxu1 %v1176_v30 }
 0x696   :  { %1210 = vmatpush1.bf16.msra.mxu0 %v1173_v16  ;;  %1253 = vmatpush1.bf16.msra.mxu1 %v1175_v29 }
 0x699   :  { %6984 = vmatmul.mubr.msk.bf16.vlgmr.msra.gmra.mxu0 %vm337_vm2, %v7978_v40  ;;  %6985 = vmatmul.mubr.msk.bf16.vlgmr.msra.gmra.mxu1 %vm337_vm2, %v7978_v40 }
 0x69a   :  { %1349 = vmatprep.mubr.bf16.mxu0 %v9814_v15  ;;  %1392 = vmatprep.mubr.bf16.mxu1 %v9814_v15 }
 0x759   :  { %v1229_v39 = vpop.f32.mrf.mxu0  ;;  %v1272_v9 = vpop.f32.mrf.mxu1 }
 0x75a   :  { %v1230_v34 = vadd.f32 %v1229_v39, %v8327_v44  ;;  %v1273_v32 = vadd.f32 %v1272_v9, %v8327_v44 }
 0x75b   :  { %v1231_v59 = vpop.f32.mrf.mxu0  ;;  %v1274_v6 = vpop.f32.mrf.mxu1 }
 0x75c   :  { %v1232_v36 = vadd.f32 %v1231_v59, %v8327_v44  ;;  %v1275_v35 = vadd.f32 %v1274_v6, %v8327_v44  ;;  %v1281_v61 = vmax.f32 %v1230_v34, 0.0  ;;  %v1283_v0 = vmax.f32 %v1273_v32, 0.0  ;;  %v7979_v44 = vld [vmem:[%s8263_s25 + $0x40] sm:$0xff]  }
 0x75d   :  { %v1233_v51 = vpop.f32.mrf.mxu0  ;;  %v1276_v33 = vpop.f32.mrf.mxu1 }
 0x75e   :  { %v1234_v20 = vadd.f32 %v1233_v51, %v8325_v43  ;;  %v1277_v19 = vadd.f32 %v1276_v33, %v8325_v43  ;;  %v1282_v25 = vmax.f32 %v1232_v36, 0.0  ;;  %v1284_v26 = vmax.f32 %v1275_v35, 0.0 }
 0x75f   :  { %v1235_v31 = vpop.f32.mrf.mxu0  ;;  %v1278_v24 = vpop.f32.mrf.mxu1 }
 0x760   :  { %v1236_v28 = vadd.f32 %v1235_v31, %v8325_v43  ;;  %v1279_v27 = vadd.f32 %v1278_v24, %v8325_v43  ;;  %v1285_v23 = vmax.f32 %v1234_v20, 0.0  ;;  %v1287_v3 = vmax.f32 %v1277_v19, 0.0 }
 0x762   :  { %v1286_v7 = vmax.f32 %v1236_v28, 0.0  ;;  %v1288_v56 = vmax.f32 %v1279_v27, 0.0  ;;  %v1295_v37 = vpack.c.bf16 %v1285_v23, %v1281_v61  ;;  %v1297_v60 = vpack.c.bf16 %v1287_v3, %v1283_v0 }
 0x764   :  { %v1296_v10 = vpack.c.bf16 %v1286_v7, %v1282_v25  ;;  %v1298_v14 = vpack.c.bf16 %v1288_v56, %v1284_v26 }
 0x766   :  { %1331 = vmatprep.subr.bf16.mxu0 %v1296_v10  ;;  %1374 = vmatprep.subr.bf16.mxu1 %v1298_v14 }
 0x767   :  { %1332 = vmatpush1.bf16.msra.mxu0 %v1295_v37  ;;  %1375 = vmatpush1.bf16.msra.mxu1 %v1297_v60 }
 0x76a   :  { %6991 = vmatmul.mubr.msk.bf16.vlgmr.msra.gmra.mxu0 %vm337_vm2, %v7979_v44  ;;  %6992 = vmatmul.mubr.msk.bf16.vlgmr.msra.gmra.mxu1 %vm337_vm2, %v7979_v44 }
 0x76b   :  { %1471 = vmatprep.mubr.bf16.mxu0 %v9814_v15  ;;  %1514 = vmatprep.mubr.bf16.mxu1 %v9814_v15 }
 0x82a   :  { %v1351_v43 = vpop.f32.mrf.mxu0  ;;  %v1394_v50 = vpop.f32.mrf.mxu1 }
 0x82b   :  { %v1352_v9 = vadd.f32 %v1351_v43, %v8333_v48  ;;  %v1395_v59 = vadd.f32 %v1394_v50, %v8333_v48 }
 0x82c   :  { %v1353_v38 = vpop.f32.mrf.mxu0  ;;  %v1396_v22 = vpop.f32.mrf.mxu1 }
 0x82d   :  { %v1354_v16 = vadd.f32 %v1353_v38, %v8333_v48  ;;  %v1397_v29 = vadd.f32 %v1396_v22, %v8333_v48  ;;  %v1403_v24 = vmax.f32 %v1352_v9, 0.0  ;;  %v1405_v28 = vmax.f32 %v1395_v59, 0.0  ;;  %v7980_v48 = vld [vmem:[%s8263_s25 + $0x48] sm:$0xff]  }
 0x82e   :  { %v1355_v41 = vpop.f32.mrf.mxu0  ;;  %v1398_v30 = vpop.f32.mrf.mxu1 }
 0x82f   :  { %v1356_v40 = vadd.f32 %v1355_v41, %v8331_v47  ;;  %v1399_v39 = vadd.f32 %v1398_v30, %v8331_v47  ;;  %v1404_v19 = vmax.f32 %v1354_v16, 0.0  ;;  %v1406_v34 = vmax.f32 %v1397_v29, 0.0 }
 0x830   :  { %v1357_v6 = vpop.f32.mrf.mxu0  ;;  %v1400_v51 = vpop.f32.mrf.mxu1 }
 0x831   :  { %v1358_v33 = vadd.f32 %v1357_v6, %v8331_v47  ;;  %v1401_v36 = vadd.f32 %v1400_v51, %v8331_v47  ;;  %v1407_v35 = vmax.f32 %v1356_v40, 0.0  ;;  %v1409_v20 = vmax.f32 %v1399_v39, 0.0 }
 0x833   :  { %v1408_v32 = vmax.f32 %v1358_v33, 0.0  ;;  %v1410_v31 = vmax.f32 %v1401_v36, 0.0  ;;  %v1417_v3 = vpack.c.bf16 %v1407_v35, %v1403_v24  ;;  %v1419_v25 = vpack.c.bf16 %v1409_v20, %v1405_v28 }
 0x835   :  { %v1418_v27 = vpack.c.bf16 %v1408_v32, %v1404_v19  ;;  %v1420_v23 = vpack.c.bf16 %v1410_v31, %v1406_v34 }
 0x837   :  { %1453 = vmatprep.subr.bf16.mxu0 %v1418_v27  ;;  %1496 = vmatprep.subr.bf16.mxu1 %v1420_v23 }
 0x838   :  { %1454 = vmatpush1.bf16.msra.mxu0 %v1417_v3  ;;  %1497 = vmatpush1.bf16.msra.mxu1 %v1419_v25 }
 0x83b   :  { %6998 = vmatmul.mubr.msk.bf16.vlgmr.msra.gmra.mxu0 %vm337_vm2, %v7980_v48  ;;  %6999 = vmatmul.mubr.msk.bf16.vlgmr.msra.gmra.mxu1 %vm337_vm2, %v7980_v48 }
 0x83c   :  { %1593 = vmatprep.mubr.bf16.mxu0 %v9814_v15  ;;  %1636 = vmatprep.mubr.bf16.mxu1 %v9814_v15 }
 0x8fb   :  { %v1473_v47 = vpop.f32.mrf.mxu0  ;;  %v1516_v26 = vpop.f32.mrf.mxu1 }
 0x8fc   :  { %v1474_v44 = vadd.f32 %v1473_v47, %v8341_v54  ;;  %v1517_v43 = vadd.f32 %v1516_v26, %v8341_v54 }
 0x8fd   :  { %v1475_v7 = vpop.f32.mrf.mxu0  ;;  %v1518_v56 = vpop.f32.mrf.mxu1 }
 0x8fe   :  { %v1476_v10 = vadd.f32 %v1475_v7, %v8341_v54  ;;  %v1519_v14 = vadd.f32 %v1518_v56, %v8341_v54  ;;  %v1525_v59 = vmax.f32 %v1474_v44, 0.0  ;;  %v1527_v6 = vmax.f32 %v1517_v43, 0.0  ;;  %v7981_v54 = vld [vmem:[%s8263_s25 + $0x50] sm:$0xff]  }
 0x8ff   :  { %v1477_v61 = vpop.f32.mrf.mxu0  ;;  %v1520_v0 = vpop.f32.mrf.mxu1 }
 0x900   :  { %v1478_v37 = vadd.f32 %v1477_v61, %v8339_v53  ;;  %v1521_v60 = vadd.f32 %v1520_v0, %v8339_v53  ;;  %v1526_v29 = vmax.f32 %v1476_v10, 0.0  ;;  %v1528_v40 = vmax.f32 %v1519_v14, 0.0 }
 0x901   :  { %v1479_v50 = vpop.f32.mrf.mxu0  ;;  %v1522_v38 = vpop.f32.mrf.mxu1 }
 0x902   :  { %v1480_v22 = vadd.f32 %v1479_v50, %v8339_v53  ;;  %v1523_v41 = vadd.f32 %v1522_v38, %v8339_v53  ;;  %v1529_v30 = vmax.f32 %v1478_v37, 0.0  ;;  %v1531_v16 = vmax.f32 %v1521_v60, 0.0 }
 0x904   :  { %v1530_v39 = vmax.f32 %v1480_v22, 0.0  ;;  %v1532_v9 = vmax.f32 %v1523_v41, 0.0  ;;  %v1539_v36 = vpack.c.bf16 %v1529_v30, %v1525_v59  ;;  %v1541_v35 = vpack.c.bf16 %v1531_v16, %v1527_v6 }
 0x906   :  { %v1540_v51 = vpack.c.bf16 %v1530_v39, %v1526_v29  ;;  %v1542_v33 = vpack.c.bf16 %v1532_v9, %v1528_v40 }
 0x908   :  { %1575 = vmatprep.subr.bf16.mxu0 %v1540_v51  ;;  %1618 = vmatprep.subr.bf16.mxu1 %v1542_v33 }
 0x909   :  { %1576 = vmatpush1.bf16.msra.mxu0 %v1539_v36  ;;  %1619 = vmatpush1.bf16.msra.mxu1 %v1541_v35 }
 0x90c   :  { %7005 = vmatmul.mubr.msk.bf16.vlgmr.msra.gmra.mxu0 %vm337_vm2, %v7981_v54  ;;  %7006 = vmatmul.mubr.msk.bf16.vlgmr.msra.gmra.mxu1 %vm337_vm2, %v7981_v54 }
 0x90d   :  { %1715 = vmatprep.mubr.bf16.mxu0 %v9814_v15  ;;  %1758 = vmatprep.mubr.bf16.mxu1 %v9814_v15 }
 0x9cc   :  { %v1595_v53 = vpop.f32.mrf.mxu0  ;;  %v1638_v20 = vpop.f32.mrf.mxu1 }
 0x9cd   :  { %v1596_v3 = vadd.f32 %v1595_v53, %v8352_v58  ;;  %v1639_v25 = vadd.f32 %v1638_v20, %v8352_v58 }
 0x9ce   :  { %v1597_v19 = vpop.f32.mrf.mxu0  ;;  %v1640_v34 = vpop.f32.mrf.mxu1 }
 0x9cf   :  { %v1598_v24 = vadd.f32 %v1597_v19, %v8352_v58  ;;  %v1641_v28 = vadd.f32 %v1640_v34, %v8352_v58  ;;  %v1647_v60 = vmax.f32 %v1596_v3, 0.0  ;;  %v1649_v44 = vmax.f32 %v1639_v25, 0.0  ;;  %v7982_v58 = vld [vmem:[%s8263_s25 + $0x58] sm:$0xff]  }
 0x9d0   :  { %v1599_v32 = vpop.f32.mrf.mxu0  ;;  %v1642_v31 = vpop.f32.mrf.mxu1 }
 0x9d1   :  { %v1600_v27 = vadd.f32 %v1599_v32, %v8350_v57  ;;  %v1643_v23 = vadd.f32 %v1642_v31, %v8350_v57  ;;  %v1648_v0 = vmax.f32 %v1598_v24, 0.0  ;;  %v1650_v10 = vmax.f32 %v1641_v28, 0.0 }
 0x9d2   :  { %v1601_v48 = vpop.f32.mrf.mxu0  ;;  %v1644_v47 = vpop.f32.mrf.mxu1 }
 0x9d3   :  { %v1602_v26 = vadd.f32 %v1601_v48, %v8350_v57  ;;  %v1645_v7 = vadd.f32 %v1644_v47, %v8350_v57  ;;  %v1651_v56 = vmax.f32 %v1600_v27, 0.0  ;;  %v1653_v61 = vmax.f32 %v1643_v23, 0.0 }
 0x9d5   :  { %v1652_v14 = vmax.f32 %v1602_v26, 0.0  ;;  %v1654_v37 = vmax.f32 %v1645_v7, 0.0  ;;  %v1661_v38 = vpack.c.bf16 %v1651_v56, %v1647_v60  ;;  %v1663_v22 = vpack.c.bf16 %v1653_v61, %v1649_v44 }
 0x9d7   :  { %v1662_v43 = vpack.c.bf16 %v1652_v14, %v1648_v0  ;;  %v1664_v50 = vpack.c.bf16 %v1654_v37, %v1650_v10 }
 0x9d9   :  { %1697 = vmatprep.subr.bf16.mxu0 %v1662_v43  ;;  %1740 = vmatprep.subr.bf16.mxu1 %v1664_v50 }
 0x9da   :  { %1698 = vmatpush1.bf16.msra.mxu0 %v1661_v38  ;;  %1741 = vmatpush1.bf16.msra.mxu1 %v1663_v22 }
 0x9dd   :  { %7012 = vmatmul.mubr.msk.bf16.vlgmr.msra.gmra.mxu0 %vm337_vm2, %v7982_v58  ;;  %7013 = vmatmul.mubr.msk.bf16.vlgmr.msra.gmra.mxu1 %vm337_vm2, %v7982_v58 }
 0x9de   :  { %1837 = vmatprep.mubr.bf16.mxu0 %v9814_v15  ;;  %1880 = vmatprep.mubr.bf16.mxu1 %v9814_v15 }
 0xa9d   :  { %v1717_v57 = vpop.f32.mrf.mxu0  ;;  %v1760_v41 = vpop.f32.mrf.mxu1 }
 0xa9e   :  { %v1718_v51 = vadd.f32 %v1717_v57, %v8360_v1  ;;  %v1761_v33 = vadd.f32 %v1760_v41, %v8360_v1 }
 0xa9f   :  { %v1719_v30 = vpop.f32.mrf.mxu0  ;;  %v1762_v16 = vpop.f32.mrf.mxu1 }
 0xaa0   :  { %v1720_v39 = vadd.f32 %v1719_v30, %v8360_v1  ;;  %v1763_v9 = vadd.f32 %v1762_v16, %v8360_v1  ;;  %v1769_v28 = vmax.f32 %v1718_v51, 0.0  ;;  %v1771_v27 = vmax.f32 %v1761_v33, 0.0  ;;  %v7983_v1 = vld [vmem:[%s8263_s25 + $0x60] sm:$0xff]  }
 0xaa1   :  { %v1721_v29 = vpop.f32.mrf.mxu0  ;;  %v1764_v40 = vpop.f32.mrf.mxu1 }
 0xaa2   :  { %v1722_v59 = vadd.f32 %v1721_v29, %v8358_v63  ;;  %v1765_v6 = vadd.f32 %v1764_v40, %v8358_v63  ;;  %v1770_v34 = vmax.f32 %v1720_v39, 0.0  ;;  %v1772_v32 = vmax.f32 %v1763_v9, 0.0 }
 0xaa3   :  { %v1723_v36 = vpop.f32.mrf.mxu0  ;;  %v1766_v35 = vpop.f32.mrf.mxu1 }
 0xaa4   :  { %v1724_v54 = vadd.f32 %v1723_v36, %v8358_v63  ;;  %v1767_v53 = vadd.f32 %v1766_v35, %v8358_v63  ;;  %v1773_v20 = vmax.f32 %v1722_v59, 0.0  ;;  %v1775_v19 = vmax.f32 %v1765_v6, 0.0 }
 0xaa6   :  { %v1774_v31 = vmax.f32 %v1724_v54, 0.0  ;;  %v1776_v24 = vmax.f32 %v1767_v53, 0.0  ;;  %v1783_v25 = vpack.c.bf16 %v1773_v20, %v1769_v28  ;;  %v1785_v48 = vpack.c.bf16 %v1775_v19, %v1771_v27 }
 0xaa8   :  { %v1784_v23 = vpack.c.bf16 %v1774_v31, %v1770_v34  ;;  %v1786_v3 = vpack.c.bf16 %v1776_v24, %v1772_v32 }
 0xaaa   :  { %1819 = vmatprep.subr.bf16.mxu0 %v1784_v23  ;;  %1862 = vmatprep.subr.bf16.mxu1 %v1786_v3 }
 0xaab   :  { %1820 = vmatpush1.bf16.msra.mxu0 %v1783_v25  ;;  %1863 = vmatpush1.bf16.msra.mxu1 %v1785_v48 }
 0xaae   :  { %7019 = vmatmul.mubr.msk.bf16.vlgmr.msra.gmra.mxu0 %vm337_vm2, %v7983_v1  ;;  %7020 = vmatmul.mubr.msk.bf16.vlgmr.msra.gmra.mxu1 %vm337_vm2, %v7983_v1 }
 0xaaf   :  { %1959 = vmatprep.mubr.bf16.mxu0 %v9814_v15  ;;  %2002 = vmatprep.mubr.bf16.mxu1 %v9814_v15 }
 0xb6e   :  { %v1839_v63 = vpop.f32.mrf.mxu0  ;;  %v1882_v47 = vpop.f32.mrf.mxu1 }
 0xb6f   :  { %v1840_v60 = vadd.f32 %v1839_v63, %v8366_v5  ;;  %v1883_v44 = vadd.f32 %v1882_v47, %v8366_v5 }
 0xb70   :  { %v1841_v26 = vpop.f32.mrf.mxu0  ;;  %v1884_v7 = vpop.f32.mrf.mxu1 }
 0xb71   :  { %v1842_v0 = vadd.f32 %v1841_v26, %v8366_v5  ;;  %v1885_v10 = vadd.f32 %v1884_v7, %v8366_v5  ;;  %v1891_v40 = vmax.f32 %v1840_v60, 0.0  ;;  %v1893_v39 = vmax.f32 %v1883_v44, 0.0  ;;  %v7984_v5 = vld [vmem:[%s8263_s25 + $0x68] sm:$0xff]  }
 0xb72   :  { %v1843_v56 = vpop.f32.mrf.mxu0  ;;  %v1886_v61 = vpop.f32.mrf.mxu1 }
 0xb73   :  { %v1844_v14 = vadd.f32 %v1843_v56, %v8364_v4  ;;  %v1887_v37 = vadd.f32 %v1886_v61, %v8364_v4  ;;  %v1892_v41 = vmax.f32 %v1842_v0, 0.0  ;;  %v1894_v30 = vmax.f32 %v1885_v10, 0.0 }
 0xb74   :  { %v1845_v43 = vpop.f32.mrf.mxu0  ;;  %v1888_v50 = vpop.f32.mrf.mxu1 }
 0xb75   :  { %v1846_v38 = vadd.f32 %v1845_v43, %v8364_v4  ;;  %v1889_v22 = vadd.f32 %v1888_v50, %v8364_v4  ;;  %v1895_v58 = vmax.f32 %v1844_v14, 0.0  ;;  %v1897_v57 = vmax.f32 %v1887_v37, 0.0 }
 0xb77   :  { %v1896_v16 = vmax.f32 %v1846_v38, 0.0  ;;  %v1898_v29 = vmax.f32 %v1889_v22, 0.0  ;;  %v1905_v6 = vpack.c.bf16 %v1895_v58, %v1891_v40  ;;  %v1907_v51 = vpack.c.bf16 %v1897_v57, %v1893_v39 }
 0xb79   :  { %v1906_v9 = vpack.c.bf16 %v1896_v16, %v1892_v41  ;;  %v1908_v59 = vpack.c.bf16 %v1898_v29, %v1894_v30 }
 0xb7b   :  { %1941 = vmatprep.subr.bf16.mxu0 %v1906_v9  ;;  %1984 = vmatprep.subr.bf16.mxu1 %v1908_v59 }
 0xb7c   :  { %1942 = vmatpush1.bf16.msra.mxu0 %v1905_v6  ;;  %1985 = vmatpush1.bf16.msra.mxu1 %v1907_v51 }
 0xb7f   :  { %7026 = vmatmul.mubr.msk.bf16.vlgmr.msra.gmra.mxu0 %vm337_vm2, %v7984_v5  ;;  %7027 = vmatmul.mubr.msk.bf16.vlgmr.msra.gmra.mxu1 %vm337_vm2, %v7984_v5 }
 0xb80   :  { %2081 = vmatprep.mubr.bf16.mxu0 %v9814_v15  ;;  %2124 = vmatprep.mubr.bf16.mxu1 %v9814_v15 }
 0xc3f   :  { %v1961_v4 = vpop.f32.mrf.mxu0  ;;  %v2004_v33 = vpop.f32.mrf.mxu1 }
 0xc40   :  { %v1962_v31 = vadd.f32 %v1961_v4, %v8374_v13  ;;  %v2005_v24 = vadd.f32 %v2004_v33, %v8374_v13 }
 0xc41   :  { %v1963_v36 = vpop.f32.mrf.mxu0  ;;  %v2006_v35 = vpop.f32.mrf.mxu1 }
 0xc42   :  { %v1964_v20 = vadd.f32 %v1963_v36, %v8374_v13  ;;  %v2007_v19 = vadd.f32 %v2006_v35, %v8374_v13  ;;  %v2013_v7 = vmax.f32 %v1962_v31, 0.0  ;;  %v2015_v56 = vmax.f32 %v2005_v24, 0.0  ;;  %v7985_v13 = vld [vmem:[%s8263_s25 + $0x70] sm:$0xff]  }
 0xc43   :  { %v1965_v54 = vpop.f32.mrf.mxu0  ;;  %v2008_v53 = vpop.f32.mrf.mxu1 }
 0xc44   :  { %v1966_v34 = vadd.f32 %v1965_v54, %v8372_v11  ;;  %v2009_v32 = vadd.f32 %v2008_v53, %v8372_v11  ;;  %v2014_v1 = vmax.f32 %v1964_v20, 0.0  ;;  %v2016_v63 = vmax.f32 %v2007_v19, 0.0 }
 0xc45   :  { %v1967_v28 = vpop.f32.mrf.mxu0  ;;  %v2010_v27 = vpop.f32.mrf.mxu1 }
 0xc46   :  { %v1968_v23 = vadd.f32 %v1967_v28, %v8372_v11  ;;  %v2011_v3 = vadd.f32 %v2010_v27, %v8372_v11  ;;  %v2017_v25 = vmax.f32 %v1966_v34, 0.0  ;;  %v2019_v48 = vmax.f32 %v2009_v32, 0.0 }
 0xc48   :  { %v2018_v47 = vmax.f32 %v1968_v23, 0.0  ;;  %v2020_v26 = vmax.f32 %v2011_v3, 0.0  ;;  %v2027_v10 = vpack.c.bf16 %v2017_v25, %v2013_v7  ;;  %v2029_v14 = vpack.c.bf16 %v2019_v48, %v2015_v56 }
 0xc4a   :  { %v2028_v61 = vpack.c.bf16 %v2018_v47, %v2014_v1  ;;  %v2030_v0 = vpack.c.bf16 %v2020_v26, %v2016_v63 }
 0xc4c   :  { %2063 = vmatprep.subr.bf16.mxu0 %v2028_v61  ;;  %2106 = vmatprep.subr.bf16.mxu1 %v2030_v0 }
 0xc4d   :  { %2064 = vmatpush1.bf16.msra.mxu0 %v2027_v10  ;;  %2107 = vmatpush1.bf16.msra.mxu1 %v2029_v14 }
 0xc50   :  { %7033 = vmatmul.mubr.msk.bf16.vlgmr.msra.gmra.mxu0 %vm337_vm2, %v7985_v13  ;;  %7034 = vmatmul.mubr.msk.bf16.vlgmr.msra.gmra.mxu1 %vm337_vm2, %v7985_v13 }
 0xc51   :  { %2203 = vmatprep.mubr.bf16.mxu0 %v9814_v15  ;;  %2246 = vmatprep.mubr.bf16.mxu1 %v9814_v15 }
 0xd10   :  { %v2083_v11 = vpop.f32.mrf.mxu0  ;;  %v2126_v37 = vpop.f32.mrf.mxu1 }
 0xd11   :  { %v2084_v41 = vadd.f32 %v2083_v11, %v8380_v21  ;;  %v2127_v30 = vadd.f32 %v2126_v37, %v8380_v21 }
 0xd12   :  { %v2085_v60 = vpop.f32.mrf.mxu0  ;;  %v2128_v44 = vpop.f32.mrf.mxu1 }
 0xd13   :  { %v2086_v38 = vadd.f32 %v2085_v60, %v8380_v21  ;;  %v2129_v22 = vadd.f32 %v2128_v44, %v8380_v21  ;;  %v2135_v33 = vmax.f32 %v2084_v41, 0.0  ;;  %v2137_v36 = vmax.f32 %v2127_v30, 0.0  ;;  %v7986_v21 = vld [vmem:[%s8263_s25 + $0x78] sm:$0xff]  }
 0xd14   :  { %v2087_v43 = vpop.f32.mrf.mxu0  ;;  %v2130_v50 = vpop.f32.mrf.mxu1 }
 0xd15   :  { %v2088_v58 = vadd.f32 %v2087_v43, %v8378_v18  ;;  %v2131_v57 = vadd.f32 %v2130_v50, %v8378_v18  ;;  %v2136_v6 = vmax.f32 %v2086_v38, 0.0  ;;  %v2138_v51 = vmax.f32 %v2129_v22, 0.0 }
 0xd16   :  { %v2089_v16 = vpop.f32.mrf.mxu0  ;;  %v2132_v29 = vpop.f32.mrf.mxu1 }
 0xd17   :  { %v2090_v40 = vadd.f32 %v2089_v16, %v8378_v18  ;;  %v2133_v39 = vadd.f32 %v2132_v29, %v8378_v18  ;;  %v2139_v9 = vmax.f32 %v2088_v58, 0.0  ;;  %v2141_v59 = vmax.f32 %v2131_v57, 0.0 }
 0xd19   :  { %v2140_v5 = vmax.f32 %v2090_v40, 0.0  ;;  %v2142_v4 = vmax.f32 %v2133_v39, 0.0  ;;  %v2149_v53 = vpack.c.bf16 %v2139_v9, %v2135_v33  ;;  %v2151_v20 = vpack.c.bf16 %v2141_v59, %v2137_v36 }
 0xd1b   :  { %v2150_v35 = vpack.c.bf16 %v2140_v5, %v2136_v6  ;;  %v2152_v54 = vpack.c.bf16 %v2142_v4, %v2138_v51 }
 0xd1d   :  { %2185 = vmatprep.subr.bf16.mxu0 %v2150_v35  ;;  %2228 = vmatprep.subr.bf16.mxu1 %v2152_v54 }
 0xd1e   :  { %2186 = vmatpush1.bf16.msra.mxu0 %v2149_v53  ;;  %2229 = vmatpush1.bf16.msra.mxu1 %v2151_v20 }
 0xd21   :  { %7040 = vmatmul.mubr.msk.bf16.vlgmr.msra.gmra.mxu0 %vm337_vm2, %v7986_v21  ;;  %7041 = vmatmul.mubr.msk.bf16.vlgmr.msra.gmra.mxu1 %vm337_vm2, %v7986_v21 }
 0xd22   :  { %2325 = vmatprep.mubr.bf16.mxu0 %v9814_v15  ;;  %2368 = vmatprep.mubr.bf16.mxu1 %v9814_v15 }
 0xde1   :  { %v2205_v18 = vpop.f32.mrf.mxu0  ;;  %v2248_v19 = vpop.f32.mrf.mxu1 }
 0xde2   :  { %v2206_v25 = vadd.f32 %v2205_v18, %v8390_v49  ;;  %v2249_v48 = vadd.f32 %v2248_v19, %v8390_v49 }
 0xde3   :  { %v2207_v34 = vpop.f32.mrf.mxu0  ;;  %v2250_v32 = vpop.f32.mrf.mxu1 }
 0xde4   :  { %v2208_v28 = vadd.f32 %v2207_v34, %v8390_v49  ;;  %v2251_v27 = vadd.f32 %v2250_v32, %v8390_v49  ;;  %v2257_v13 = vmax.f32 %v2206_v25, 0.0  ;;  %v2259_v11 = vmax.f32 %v2249_v48, 0.0  ;;  %v7987_v49 = vld [vmem:[%s8263_s25 + $0x80] sm:$0xff]  }
 0xde5   :  { %v2209_v31 = vpop.f32.mrf.mxu0  ;;  %v2252_v24 = vpop.f32.mrf.mxu1 }
 0xde6   :  { %v2210_v23 = vadd.f32 %v2209_v31, %v8388_v46  ;;  %v2253_v3 = vadd.f32 %v2252_v24, %v8388_v46  ;;  %v2258_v61 = vmax.f32 %v2208_v28, 0.0  ;;  %v2260_v0 = vmax.f32 %v2251_v27, 0.0 }
 0xde7   :  { %v2211_v1 = vpop.f32.mrf.mxu0  ;;  %v2254_v63 = vpop.f32.mrf.mxu1 }
 0xde8   :  { %v2212_v47 = vadd.f32 %v2211_v1, %v8388_v46  ;;  %v2255_v26 = vadd.f32 %v2254_v63, %v8388_v46  ;;  %v2261_v7 = vmax.f32 %v2210_v23, 0.0  ;;  %v2263_v56 = vmax.f32 %v2253_v3, 0.0 }
 0xdea   :  { %v2262_v10 = vmax.f32 %v2212_v47, 0.0  ;;  %v2264_v14 = vmax.f32 %v2255_v26, 0.0  ;;  %v2271_v44 = vpack.c.bf16 %v2261_v7, %v2257_v13  ;;  %v2273_v43 = vpack.c.bf16 %v2263_v56, %v2259_v11 }
 0xdec   :  { %v2272_v37 = vpack.c.bf16 %v2262_v10, %v2258_v61  ;;  %v2274_v60 = vpack.c.bf16 %v2264_v14, %v2260_v0 }
 0xdee   :  { %2307 = vmatprep.subr.bf16.mxu0 %v2272_v37  ;;  %2350 = vmatprep.subr.bf16.mxu1 %v2274_v60 }
 0xdef   :  { %2308 = vmatpush1.bf16.msra.mxu0 %v2271_v44  ;;  %2351 = vmatpush1.bf16.msra.mxu1 %v2273_v43 }
 0xdf2   :  { %7047 = vmatmul.mubr.msk.bf16.vlgmr.msra.gmra.mxu0 %vm337_vm2, %v7987_v49  ;;  %7048 = vmatmul.mubr.msk.bf16.vlgmr.msra.gmra.mxu1 %vm337_vm2, %v7987_v49 }
 0xdf3   :  { %2447 = vmatprep.mubr.bf16.mxu0 %v9814_v15  ;;  %2490 = vmatprep.mubr.bf16.mxu1 %v9814_v15 }
 0xeb2   :  { %v2327_v46 = vpop.f32.mrf.mxu0  ;;  %v2370_v50 = vpop.f32.mrf.mxu1 }
 0xeb3   :  { %v2328_v40 = vadd.f32 %v2327_v46, %v8402_v12  ;;  %v2371_v39 = vadd.f32 %v2370_v50, %v8402_v12 }
 0xeb4   :  { %v2329_v38 = vpop.f32.mrf.mxu0  ;;  %v2372_v22 = vpop.f32.mrf.mxu1 }
 0xeb5   :  { %v2330_v41 = vadd.f32 %v2329_v38, %v8402_v12  ;;  %v2373_v30 = vadd.f32 %v2372_v22, %v8402_v12  ;;  %v2379_v53 = vmax.f32 %v2328_v40, 0.0  ;;  %v2381_v20 = vmax.f32 %v2371_v39, 0.0  ;;  %v7988_v12 = vld [vmem:[%s8263_s25 + $0x88] sm:$0xff]  }
 0xeb6   :  { %v2331_v58 = vpop.f32.mrf.mxu0  ;;  %v2374_v57 = vpop.f32.mrf.mxu1 }
 0xeb7   :  { %v2332_v16 = vadd.f32 %v2331_v58, %v8400_v17  ;;  %v2375_v29 = vadd.f32 %v2374_v57, %v8400_v17  ;;  %v2380_v33 = vmax.f32 %v2330_v41, 0.0  ;;  %v2382_v36 = vmax.f32 %v2373_v30, 0.0 }
 0xeb8   :  { %v2333_v9 = vpop.f32.mrf.mxu0  ;;  %v2376_v59 = vpop.f32.mrf.mxu1 }
 0xeb9   :  { %v2334_v6 = vadd.f32 %v2333_v9, %v8400_v17  ;;  %v2377_v51 = vadd.f32 %v2376_v59, %v8400_v17  ;;  %v2383_v5 = vmax.f32 %v2332_v16, 0.0  ;;  %v2385_v4 = vmax.f32 %v2375_v29, 0.0 }
 0xebb   :  { %v2384_v35 = vmax.f32 %v2334_v6, 0.0  ;;  %v2386_v54 = vmax.f32 %v2377_v51, 0.0  ;;  %v2393_v19 = vpack.c.bf16 %v2383_v5, %v2379_v53  ;;  %v2395_v34 = vpack.c.bf16 %v2385_v4, %v2381_v20 }
 0xebd   :  { %v2394_v21 = vpack.c.bf16 %v2384_v35, %v2380_v33  ;;  %v2396_v18 = vpack.c.bf16 %v2386_v54, %v2382_v36 }
 0xebf   :  { %2429 = vmatprep.subr.bf16.mxu0 %v2394_v21  ;;  %2472 = vmatprep.subr.bf16.mxu1 %v2396_v18 }
 0xec0   :  { %2430 = vmatpush1.bf16.msra.mxu0 %v2393_v19  ;;  %2473 = vmatpush1.bf16.msra.mxu1 %v2395_v34 }
 0xec3   :  { %7054 = vmatmul.mubr.msk.bf16.vlgmr.msra.gmra.mxu0 %vm337_vm2, %v7988_v12  ;;  %7055 = vmatmul.mubr.msk.bf16.vlgmr.msra.gmra.mxu1 %vm337_vm2, %v7988_v12 }
 0xec4   :  { %2569 = vmatprep.mubr.bf16.mxu0 %v9814_v15  ;;  %2612 = vmatprep.mubr.bf16.mxu1 %v9814_v15 }
 0xf83   :  { %v2449_v17 = vpop.f32.mrf.mxu0  ;;  %v2492_v32 = vpop.f32.mrf.mxu1 }
 0xf84   :  { %v2450_v1 = vadd.f32 %v2449_v17, %v8411_v45  ;;  %v2493_v63 = vadd.f32 %v2492_v32, %v8411_v45 }
 0xf85   :  { %v2451_v31 = vpop.f32.mrf.mxu0  ;;  %v2494_v24 = vpop.f32.mrf.mxu1 }
 0xf86   :  { %v2452_v23 = vadd.f32 %v2451_v31, %v8411_v45  ;;  %v2495_v3 = vadd.f32 %v2494_v24, %v8411_v45  ;;  %v2501_v37 = vmax.f32 %v2450_v1, 0.0  ;;  %v2503_v60 = vmax.f32 %v2493_v63, 0.0  ;;  %v7989_v45 = vld [vmem:[%s8263_s25 + $0x90] sm:$0xff]  }
 0xf87   :  { %v2453_v28 = vpop.f32.mrf.mxu0  ;;  %v2496_v27 = vpop.f32.mrf.mxu1 }
 0xf88   :  { %v2454_v25 = vadd.f32 %v2453_v28, %v8409_v42  ;;  %v2497_v48 = vadd.f32 %v2496_v27, %v8409_v42  ;;  %v2502_v10 = vmax.f32 %v2452_v23, 0.0  ;;  %v2504_v14 = vmax.f32 %v2495_v3, 0.0 }
 0xf89   :  { %v2455_v47 = vpop.f32.mrf.mxu0  ;;  %v2498_v26 = vpop.f32.mrf.mxu1 }
 0xf8a   :  { %v2456_v7 = vadd.f32 %v2455_v47, %v8409_v42  ;;  %v2499_v56 = vadd.f32 %v2498_v26, %v8409_v42  ;;  %v2505_v61 = vmax.f32 %v2454_v25, 0.0  ;;  %v2507_v0 = vmax.f32 %v2497_v48, 0.0 }
 0xf8c   :  { %v2506_v13 = vmax.f32 %v2456_v7, 0.0  ;;  %v2508_v11 = vmax.f32 %v2499_v56, 0.0  ;;  %v2515_v49 = vpack.c.bf16 %v2505_v61, %v2501_v37  ;;  %v2517_v46 = vpack.c.bf16 %v2507_v0, %v2503_v60 }
 0xf8e   :  { %v2516_v44 = vpack.c.bf16 %v2506_v13, %v2502_v10  ;;  %v2518_v43 = vpack.c.bf16 %v2508_v11, %v2504_v14 }
 0xf90   :  { %2551 = vmatprep.subr.bf16.mxu0 %v2516_v44  ;;  %2594 = vmatprep.subr.bf16.mxu1 %v2518_v43 }
 0xf91   :  { %2552 = vmatpush1.bf16.msra.mxu0 %v2515_v49  ;;  %2595 = vmatpush1.bf16.msra.mxu1 %v2517_v46 }
 0xf94   :  { %7061 = vmatmul.mubr.msk.bf16.vlgmr.msra.gmra.mxu0 %vm337_vm2, %v7989_v45  ;;  %7062 = vmatmul.mubr.msk.bf16.vlgmr.msra.gmra.mxu1 %vm337_vm2, %v7989_v45 }
 0xf95   :  { %2691 = vmatprep.mubr.bf16.mxu0 %v9814_v15  ;;  %2734 = vmatprep.mubr.bf16.mxu1 %v9814_v15 }
0x1054   :  { %v2571_v42 = vpop.f32.mrf.mxu0  ;;  %v2614_v50 = vpop.f32.mrf.mxu1 }
0x1055   :  { %v2572_v40 = vadd.f32 %v2571_v42, %v8421_v55  ;;  %v2615_v39 = vadd.f32 %v2614_v50, %v8421_v55 }
0x1056   :  { %v2573_v38 = vpop.f32.mrf.mxu0  ;;  %v2616_v22 = vpop.f32.mrf.mxu1 }
0x1057   :  { %v2574_v41 = vadd.f32 %v2573_v38, %v8421_v55  ;;  %v2617_v30 = vadd.f32 %v2616_v22, %v8421_v55  ;;  %v2623_v53 = vmax.f32 %v2572_v40, 0.0  ;;  %v2625_v20 = vmax.f32 %v2615_v39, 0.0  ;;  %v7990_v55 = vld [vmem:[%s8263_s25 + $0x98] sm:$0xff]  }
0x1058   :  { %v2575_v58 = vpop.f32.mrf.mxu0  ;;  %v2618_v57 = vpop.f32.mrf.mxu1 }
0x1059   :  { %v2576_v16 = vadd.f32 %v2575_v58, %v8419_v52  ;;  %v2619_v29 = vadd.f32 %v2618_v57, %v8419_v52  ;;  %v2624_v33 = vmax.f32 %v2574_v41, 0.0  ;;  %v2626_v36 = vmax.f32 %v2617_v30, 0.0  ;;  %v9815_v58 = vld [vmem:[#allocation2_spill] sm:$0xff] }
0x105a   :  { %v2577_v9 = vpop.f32.mrf.mxu0  ;;  %v2620_v59 = vpop.f32.mrf.mxu1 }
0x105b   :  { %v2578_v6 = vadd.f32 %v2577_v9, %v8419_v52  ;;  %v2621_v51 = vadd.f32 %v2620_v59, %v8419_v52  ;;  %v2627_v5 = vmax.f32 %v2576_v16, 0.0  ;;  %v2629_v4 = vmax.f32 %v2619_v29, 0.0 }
0x105d   :  { %v2628_v35 = vmax.f32 %v2578_v6, 0.0  ;;  %v2630_v54 = vmax.f32 %v2621_v51, 0.0  ;;  %v2637_v19 = vpack.c.bf16 %v2627_v5, %v2623_v53  ;;  %v2639_v34 = vpack.c.bf16 %v2629_v4, %v2625_v20 }
0x105f   :  { %v2638_v21 = vpack.c.bf16 %v2628_v35, %v2624_v33  ;;  %v2640_v18 = vpack.c.bf16 %v2630_v54, %v2626_v36 }
0x1061   :  { %2673 = vmatprep.subr.bf16.mxu0 %v2638_v21  ;;  %2716 = vmatprep.subr.bf16.mxu1 %v2640_v18 }
0x1062   :  { %2674 = vmatpush1.bf16.msra.mxu0 %v2637_v19  ;;  %2717 = vmatpush1.bf16.msra.mxu1 %v2639_v34  ;;  %v7992_v19 = vld [vmem:[%s8850_s22] sm:$0xff]  }
0x1065   :  { %7068 = vmatmul.mubr.msk.bf16.vlgmr.msra.gmra.mxu0 %vm337_vm2, %v7990_v55  ;;  %7069 = vmatmul.mubr.msk.bf16.vlgmr.msra.gmra.mxu1 %vm337_vm2, %v7990_v55 }
0x1066   :  { %2813 = vmatprep.mubr.bf16.mxu0 %v9814_v15  ;;  %2856 = vmatprep.mubr.bf16.mxu1 %v9814_v15 }
0x1125   :  { %v2693_v52 = vpop.f32.mrf.mxu0  ;;  %v2736_v12 = vpop.f32.mrf.mxu1 }
0x1126   :  { %v2694_v25 = vadd.f32 %v2693_v52, %v8429_v2  ;;  %v2737_v48 = vadd.f32 %v2736_v12, %v8429_v2 }
0x1127   :  { %v2695_v17 = vpop.f32.mrf.mxu0  ;;  %v2738_v32 = vpop.f32.mrf.mxu1 }
0x1128   :  { %v2696_v28 = vadd.f32 %v2695_v17, %v8429_v2  ;;  %v2739_v27 = vadd.f32 %v2738_v32, %v8429_v2  ;;  %v2745_v13 = vmax.f32 %v2694_v25, 0.0  ;;  %v2747_v11 = vmax.f32 %v2737_v48, 0.0  ;;  %v7991_v2 = vld [vmem:[%s8263_s25 + $0xa0] sm:$0xff]   ;;  %s8855_s25 = sld [smem:[%s9715_s0 + %s8165_s23]]   ;;  %s8182_s23 = smov 30  }
0x1129   :  { %v2697_v31 = vpop.f32.mrf.mxu0  ;;  %v2740_v24 = vpop.f32.mrf.mxu1 }
0x112a   :  { %v2698_v23 = vadd.f32 %v2697_v31, %v8427_v62  ;;  %v2741_v3 = vadd.f32 %v2740_v24, %v8427_v62  ;;  %v2746_v61 = vmax.f32 %v2696_v28, 0.0  ;;  %v2748_v0 = vmax.f32 %v2739_v27, 0.0  ;;  %v7993_v28 = vld [vmem:[%s8850_s22 + $0x8] sm:$0xff]   ;;  %s9561_s22 = sld [smem:[%s9715_s0 + %s8181_s19]]  }
0x112b   :  { %v2699_v1 = vpop.f32.mrf.mxu0  ;;  %v2742_v63 = vpop.f32.mrf.mxu1 }
0x112c   :  { %v2700_v47 = vadd.f32 %v2699_v1, %v8427_v62  ;;  %v2743_v26 = vadd.f32 %v2742_v63, %v8427_v62  ;;  %v2749_v7 = vmax.f32 %v2698_v23, 0.0  ;;  %v2751_v56 = vmax.f32 %v2741_v3, 0.0 }
0x112e   :  { %v2750_v10 = vmax.f32 %v2700_v47, 0.0  ;;  %v2752_v14 = vmax.f32 %v2743_v26, 0.0  ;;  %v2759_v44 = vpack.c.bf16 %v2749_v7, %v2745_v13  ;;  %v2761_v43 = vpack.c.bf16 %v2751_v56, %v2747_v11  ;;  %v7994_v53 = vld [vmem:[%s8855_s25 + $0x78] sm:$0xff]   ;;  %v7998_v52 = vld [vmem:[%s8855_s25 + $0x70] sm:$0xff]   ;;  %v8002_v31 = vld [vmem:[%s8855_s25 + $0x68] sm:$0xff]  }
0x112f   :  { %v7995_v20 = vld [vmem:[%s8855_s25 + $0xf8] sm:$0xff]   ;;  %v7999_v12 = vld [vmem:[%s8855_s25 + $0xf0] sm:$0xff]   ;;  %v8003_v24 = vld [vmem:[%s8855_s25 + $0xe8] sm:$0xff]  }
0x1130   :  { %v2760_v37 = vpack.c.bf16 %v2750_v10, %v2746_v61  ;;  %v2762_v60 = vpack.c.bf16 %v2752_v14, %v2748_v0  ;;  %v7996_v34 = vld [vmem:[%s8855_s25 + $0x38] sm:$0xff]   ;;  %v8000_v17 = vld [vmem:[%s8855_s25 + $0x30] sm:$0xff]   ;;  %v8004_v27 = vld [vmem:[%s8855_s25 + $0x28] sm:$0xff]  }
0x1131   :  { %v7997_v55 = vld [vmem:[%s8855_s25 + $0xb8] sm:$0xff]   ;;  %v8001_v32 = vld [vmem:[%s8855_s25 + $0xb0] sm:$0xff]   ;;  %v8005_v23 = vld [vmem:[%s8855_s25 + $0xa8] sm:$0xff]  }
0x1132   :  { %2795 = vmatprep.subr.bf16.mxu0 %v2760_v37  ;;  %2838 = vmatprep.subr.bf16.mxu1 %v2762_v60  ;;  %v8007_v3 = vld [vmem:[%s8855_s25 + $0xe0] sm:$0xff]   ;;  %v8010_v1 = vld [vmem:[%s8855_s25 + $0x58] sm:$0xff]   ;;  %v8014_v7 = vld [vmem:[%s8855_s25 + $0x50] sm:$0xff]  }
0x1133   :  { %2796 = vmatpush1.bf16.msra.mxu0 %v2759_v44  ;;  %2839 = vmatpush1.bf16.msra.mxu1 %v2761_v43  ;;  %v8008_v25 = vld [vmem:[%s8855_s25 + $0x20] sm:$0xff]   ;;  %v8011_v63 = vld [vmem:[%s8855_s25 + $0xd8] sm:$0xff]   ;;  %v8015_v56 = vld [vmem:[%s8855_s25 + $0xd0] sm:$0xff]  }
0x1134   :  { %v8009_v48 = vld [vmem:[%s8855_s25 + $0xa0] sm:$0xff]   ;;  %v8012_v47 = vld [vmem:[%s8855_s25 + $0x18] sm:$0xff]   ;;  %v8016_v61 = vld [vmem:[%s8855_s25 + $0x10] sm:$0xff]  }
0x1135   :  { %v8013_v26 = vld [vmem:[%s8855_s25 + $0x98] sm:$0xff]   ;;  %v8017_v0 = vld [vmem:[%s8855_s25 + $0x90] sm:$0xff]   ;;  %v8018_v10 = vld [vmem:[%s8855_s25 + $0x48] sm:$0xff]  }
0x1136   :  { %7075 = vmatmul.mubr.msk.bf16.vlgmr.msra.gmra.mxu0 %vm337_vm2, %v7991_v2  ;;  %7076 = vmatmul.mubr.msk.bf16.vlgmr.msra.gmra.mxu1 %vm337_vm2, %v7991_v2  ;;  %v8019_v14 = vld [vmem:[%s8855_s25 + $0xc8] sm:$0xff]   ;;  %v8022_v37 = vld [vmem:[%s8855_s25 + $0x40] sm:$0xff]  }
0x1137   :  { %2955 = vmatprep.mubr.bf16.mxu0 %v9814_v15  ;;  %3008 = vmatprep.mubr.bf16.mxu1 %v9814_v15  ;;  %v8020_v13 = vld [vmem:[%s8855_s25 + $0x8] sm:$0xff]   ;;  %v8023_v60 = vld [vmem:[%s8855_s25 + $0xc0] sm:$0xff]  }
0x1138   :  { %v8021_v11 = vld [vmem:[%s8855_s25 + $0x88] sm:$0xff]   ;;  %v8024_v44 = vld [vmem:[%s8855_s25] sm:$0xff]  }
0x1139   :  { %v8025_v43 = vld [vmem:[%s8855_s25 + $0x80] sm:$0xff]  }
0x11f6   :  { %v2815_v62 = vpop.f32.mrf.mxu0  ;;  %v2858_v49 = vpop.f32.mrf.mxu1 }
0x11f7   :  { %v2816_v30 = vadd.f32 %v2815_v62, %v8435_v8  ;;  %v2859_v16 = vadd.f32 %v2858_v49, %v8435_v8 }
0x11f8   :  { %v2817_v46 = vpop.f32.mrf.mxu0  ;;  %v2860_v45 = vpop.f32.mrf.mxu1 }
0x11f9   :  { %v2818_v38 = vadd.f32 %v2817_v46, %v8435_v8  ;;  %v2861_v22 = vadd.f32 %v2860_v45, %v8435_v8  ;;  %v2867_v36 = vmax.f32 %v2816_v30, 0.0  ;;  %v2869_v35 = vmax.f32 %v2859_v16, 0.0 }
0x11fa   :  { %v2819_v42 = vpop.f32.mrf.mxu0  ;;  %v2862_v50 = vpop.f32.mrf.mxu1 }
0x11fb   :  { %v2820_v57 = vadd.f32 %v2819_v42, %v9815_v58  ;;  %v2863_v41 = vadd.f32 %v2862_v50, %v9815_v58  ;;  %v2868_v51 = vmax.f32 %v2818_v38, 0.0  ;;  %v2870_v5 = vmax.f32 %v2861_v22, 0.0  ;;  %v9816_v50 = vld [vmem:[#allocation4_spill] sm:$0xff] }
0x11fc   :  { %v2821_v29 = vpop.f32.mrf.mxu0  ;;  %v2864_v40 = vpop.f32.mrf.mxu1 }
0x11fd   :  { %v2822_v39 = vadd.f32 %v2821_v29, %v9815_v58  ;;  %v2865_v9 = vadd.f32 %v2864_v40, %v9815_v58  ;;  %v2871_v59 = vmax.f32 %v2820_v57, 0.0  ;;  %v2873_v6 = vmax.f32 %v2863_v41, 0.0  ;;  %v9817_v58 = vld [vmem:[#allocation3_spill] sm:$0xff] }
0x11ff   :  { %v2872_v4 = vmax.f32 %v2822_v39, 0.0  ;;  %v2874_v33 = vmax.f32 %v2865_v9, 0.0  ;;  %v2883_v21 = vpack.c.bf16 %v2871_v59, %v2867_v36  ;;  %v2885_v18 = vpack.c.bf16 %v2873_v6, %v2869_v35 }
0x1201   :  { %v2884_v8 = vpack.c.bf16 %v2872_v4, %v2868_v51  ;;  %v2886_v54 = vpack.c.bf16 %v2874_v33, %v2870_v5 }
0x1203   :  { %2937 = vmatprep.subr.bf16.mxu0 %v2884_v8  ;;  %2990 = vmatprep.subr.bf16.mxu1 %v2886_v54 }
0x1204   :  { %2938 = vmatpush1.bf16.msra.mxu0 %v2883_v21  ;;  %2991 = vmatpush1.bf16.msra.mxu1 %v2885_v18 }
0x1205   :  { %7303 = vmatprep.subr.bf16.mxu0 %v7994_v53  ;;  %7331 = vmatprep.subr.bf16.mxu1 %v7995_v20 }
0x1207   :  { %7079 = vmatmul.mubr.msk.bf16.vlgmr.msra.gmra.mxu0 %vm337_vm2, %v7992_v19  ;;  %7081 = vmatmul.mubr.msk.bf16.vlgmr.msra.gmra.mxu1 %vm337_vm2, %v7992_v19 }
0x1208   :  { %2965 = vmatprep.mubr.bf16.mxu0 %v9814_v15  ;;  %3018 = vmatprep.mubr.bf16.mxu1 %v9814_v15  ;;  %v8006_v15 = vld [vmem:[%s8855_s25 + $0x60] sm:$0xff]   ;;  %s6912_s25 = sld [smem:[%s9715_s0 + %s8182_s23]]  }
0x1209   :  { %7304 = vmatpush3.bf16.msra.mxu0 %v7996_v34  ;;  %7332 = vmatpush3.bf16.msra.mxu1 %v7997_v55  ;;  %v9818_v55 = vld [vmem:[#allocation6_spill] sm:$0xff] }
0x120a   :  { %7305 = vmatprep.subr.bf16.mxu0 %v7998_v52  ;;  %7333 = vmatprep.subr.bf16.mxu1 %v7999_v12 }
0x120d   :  { %7306 = vmatpush3.bf16.msra.mxu0 %v8000_v17  ;;  %7334 = vmatpush3.bf16.msra.mxu1 %v8001_v32 }
0x120e   :  { %7307 = vmatprep.subr.bf16.mxu0 %v8002_v31  ;;  %7335 = vmatprep.subr.bf16.mxu1 %v8003_v24  ;;  %v9819_v31 = vld [vmem:[#allocation5_spill] sm:$0xff] }
0x120f   :  { %7080 = vmatmul.mubr.msk.bf16.gmra.mxu0 %vm337_vm2, %v7993_v28  ;;  %7082 = vmatmul.mubr.msk.bf16.gmra.mxu1 %vm337_vm2, %v7993_v28 }
0x1211   :  { %7308 = vmatpush3.bf16.msra.mxu0 %v8004_v27  ;;  %7336 = vmatpush3.bf16.msra.mxu1 %v8005_v23 }
0x1212   :  { %7309 = vmatprep.subr.bf16.mxu0 %v8006_v15  ;;  %7337 = vmatprep.subr.bf16.mxu1 %v8007_v3 }
0x1215   :  { %7310 = vmatpush3.bf16.msra.mxu0 %v8008_v25  ;;  %7338 = vmatpush3.bf16.msra.mxu1 %v8009_v48 }
0x1216   :  { %7311 = vmatprep.subr.bf16.mxu0 %v8010_v1  ;;  %7339 = vmatprep.subr.bf16.mxu1 %v8011_v63 }
0x1219   :  { %7312 = vmatpush3.bf16.msra.mxu0 %v8012_v47  ;;  %7340 = vmatpush3.bf16.msra.mxu1 %v8013_v26 }
0x121a   :  { %7313 = vmatprep.subr.bf16.mxu0 %v8014_v7  ;;  %7341 = vmatprep.subr.bf16.mxu1 %v8015_v56 }
0x121d   :  { %7314 = vmatpush3.bf16.msra.mxu0 %v8016_v61  ;;  %7342 = vmatpush3.bf16.msra.mxu1 %v8017_v0 }
0x121e   :  { %7315 = vmatprep.subr.bf16.mxu0 %v8018_v10  ;;  %7343 = vmatprep.subr.bf16.mxu1 %v8019_v14 }
0x1221   :  { %7316 = vmatpush3.bf16.msra.mxu0 %v8020_v13  ;;  %7344 = vmatpush3.bf16.msra.mxu1 %v8021_v11 }
0x1222   :  { %7317 = vmatprep.subr.bf16.mxu0 %v8022_v37  ;;  %7345 = vmatprep.subr.bf16.mxu1 %v8023_v60  ;;  %v8166_v37 = vmov 0.0  }
0x1225   :  { %7318 = vmatpush3.bf16.msra.mxu0 %v8024_v44  ;;  %7346 = vmatpush3.bf16.msra.mxu1 %v8025_v43 }
0x1226   :  { %7597 = vmatprep.subr.bf16.mxu0 %v8166_v37 }
0x12c7   :  { %v2957_v2 = vpop.f32.mrf.mxu0  ;;  %v3010_v62 = vpop.f32.mrf.mxu1 }
0x12c8   :  { %v2958_v30 = vadd.f32 %v2957_v2, %v9816_v50  ;;  %v3011_v16 = vadd.f32 %v3010_v62, %v9816_v50 }
0x12c9   :  { %v2959_v49 = vpop.f32.mrf.mxu0  ;;  %v3012_v46 = vpop.f32.mrf.mxu1 }
0x12ca   :  { %v2960_v38 = vadd.f32 %v2959_v49, %v9816_v50  ;;  %v3013_v22 = vadd.f32 %v3012_v46, %v9816_v50  ;;  %v3029_v8 = vmax.f32 %v2958_v30, 0.0  ;;  %v3031_v54 = vmax.f32 %v3011_v16, 0.0 }
0x12cb   :  { %v2961_v45 = vpop.f32.mrf.mxu0  ;;  %v3014_v42 = vpop.f32.mrf.mxu1 }
0x12cc   :  { %v2962_v57 = vadd.f32 %v2961_v45, %v9817_v58  ;;  %v3015_v41 = vadd.f32 %v3014_v42, %v9817_v58  ;;  %v3030_v4 = vmax.f32 %v2960_v38, 0.0  ;;  %v3032_v33 = vmax.f32 %v3013_v22, 0.0 }
0x12cd   :  { %v2963_v29 = vpop.f32.mrf.mxu0  ;;  %v3016_v40 = vpop.f32.mrf.mxu1 }
0x12ce   :  { %v2964_v39 = vadd.f32 %v2963_v29, %v9817_v58  ;;  %v3017_v9 = vadd.f32 %v3016_v40, %v9817_v58  ;;  %v3033_v59 = vmax.f32 %v2962_v57, 0.0  ;;  %v3035_v6 = vmax.f32 %v3015_v41, 0.0 }
0x12cf   :  { %v2967_v51 = vpop.f32.mrf.mxu0  ;;  %v3020_v5 = vpop.f32.mrf.mxu1 }
0x12d0   :  { %v3034_v36 = vmax.f32 %v2964_v39, 0.0  ;;  %v3036_v35 = vmax.f32 %v3017_v9, 0.0  ;;  %v3045_v19 = vpack.c.bf16 %v3033_v59, %v3029_v8  ;;  %v3047_v34 = vpack.c.bf16 %v3035_v6, %v3031_v54  ;;  %v8026_v54 = vld [vmem:[%s8924_s30] sm:$0xff]  }
0x12d1   :  { %v2969_v53 = vpop.f32.mrf.mxu0  ;;  %v3022_v20 = vpop.f32.mrf.mxu1  ;;  %v2968_v27 = vadd.f32 %v2967_v51, %v9818_v55  ;;  %v3021_v23 = vadd.f32 %v3020_v5, %v9818_v55 }
0x12d2   :  { %v3046_v21 = vpack.c.bf16 %v3034_v36, %v3030_v4  ;;  %v3048_v18 = vpack.c.bf16 %v3036_v35, %v3032_v33  ;;  %v2970_v52 = vadd.f32 %v2969_v53, %v9818_v55  ;;  %v3023_v32 = vadd.f32 %v3022_v20, %v9818_v55  ;;  %v8027_v53 = vld [vmem:[%s8924_s30 + $0x8] sm:$0xff]   ;;  %v8028_v20 = vld [vmem:[%s8924_s30 + $0x10] sm:$0xff]   ;;  %v8036_v55 = vld [vmem:[%s8951_s8 + $0x20] sm:$0xff]   ;;  %s9602_s30 = sld [smem:[%s9715_s0 + %s8183_s27]]  }
0x12d3   :  { %v2971_v12 = vpop.f32.mrf.mxu0  ;;  %v3024_v17 = vpop.f32.mrf.mxu1  ;;  %v3037_v61 = vmax.f32 %v2968_v27, 0.0  ;;  %v3039_v0 = vmax.f32 %v3021_v23, 0.0 }
0x12d4   :  { %v2972_v24 = vadd.f32 %v2971_v12, %v9819_v31  ;;  %v3025_v28 = vadd.f32 %v3024_v17, %v9819_v31  ;;  %3341 = vmatprep.mubr.bf16.mxu0 %v3046_v21  ;;  %3390 = vmatprep.mubr.bf16.mxu1 %v3048_v18  ;;  %v3038_v47 = vmax.f32 %v2970_v52, 0.0  ;;  %v3040_v26 = vmax.f32 %v3023_v32, 0.0  ;;  %v8029_v21 = vld [vmem:[%s8944_s4] sm:$0xff]   ;;  %v8033_v18 = vld [vmem:[%s8951_s8 + $0x38] sm:$0xff]  }
0x12d5   :  { %v2973_v15 = vpop.f32.mrf.mxu0  ;;  %v3026_v3 = vpop.f32.mrf.mxu1  ;;  %3342 = vmatmul.mubr.bf16.vlgmr.msra.gmra.mxu0 %v3045_v19  ;;  %3391 = vmatmul.mubr.bf16.vlgmr.msra.gmra.mxu1 %v3047_v34  ;;  %v8034_v19 = vld [vmem:[%s8951_s8 + $0x30] sm:$0xff]   ;;  %v8035_v34 = vld [vmem:[%s8951_s8 + $0x28] sm:$0xff]   ;;  %v8037_v52 = vld [vmem:[%s8951_s8 + $0x18] sm:$0xff]  }
0x12d6   :  { %v2974_v25 = vadd.f32 %v2973_v15, %v9819_v31  ;;  %v3027_v48 = vadd.f32 %v3026_v3, %v9819_v31  ;;  %v3041_v1 = vmax.f32 %v2972_v24, 0.0  ;;  %v3043_v63 = vmax.f32 %v3025_v28, 0.0 }
0x12d8   :  { %v3042_v7 = vmax.f32 %v2974_v25, 0.0  ;;  %v3044_v56 = vmax.f32 %v3027_v48, 0.0  ;;  %v3049_v13 = vpack.c.bf16 %v3041_v1, %v3037_v61  ;;  %v3051_v11 = vpack.c.bf16 %v3043_v63, %v3039_v0  ;;  %v9820_v25 = vld [vmem:[#allocation9_spill] sm:$0xff]  ;;  %v9821_v1 = vld [vmem:[#allocation8_spill] sm:$0xff] }
0x12da   :  { %v3050_v10 = vpack.c.bf16 %v3042_v7, %v3038_v47  ;;  %v3052_v14 = vpack.c.bf16 %v3044_v56, %v3040_v26  ;;  %v9822_v26 = vld [vmem:[#allocation10_spill] sm:$0xff]  ;;  %v9823_v56 = vld [vmem:[#allocation7_spill] sm:$0xff] }
0x12dc   :  { %3349 = vmatprep.mubr.bf16.mxu0 %v3050_v10  ;;  %3398 = vmatprep.mubr.bf16.mxu1 %v3052_v14  ;;  %v9824_v10 = vld [vmem:[#allocation11_spill] sm:$0xff] }
0x12dd   :  { %3350 = vmatmul.mubr.bf16.gmra.mxu0 %v3049_v13  ;;  %3399 = vmatmul.mubr.bf16.gmra.mxu1 %v3051_v11 }
0x12de   :  { %7601 = vmatprep.mubr.msk.bf16.mxu0 %vm8168_vm3, %v8166_v37  ;;  %7619 = vmatprep.mubr.msk.bf16.mxu1 %vm3618_vm5, %v8029_v21 }
0x1395   :  { %v7319_v60 = vpop.f32.mrf.mxu0  ;;  %v7347_v44 = vpop.f32.mrf.mxu1 }
0x1397   :  { %v7320_v43 = vpop.f32.mrf.mxu0  ;;  %v7348_v2 = vpop.f32.mrf.mxu1 }
0x1398   :  { %v7321_v6 = vadd.f32 %v7320_v43, %v7319_v60  ;;  %v7349_v51 = vadd.f32 %v7348_v2, %v7347_v44  ;;  %v9825_v60 = vld [vmem:[#allocation12_spill] sm:$0xff] }
0x1399   :  { %v7322_v62 = vpop.f32.mrf.mxu0  ;;  %v7350_v49 = vpop.f32.mrf.mxu1 }
0x139a   :  { %v3393_v35 = vadd.f32 %v7349_v51, %v7321_v6 }
0x139b   :  { %v7323_v46 = vpop.f32.mrf.mxu0  ;;  %v7351_v45 = vpop.f32.mrf.mxu1 }
0x139c   :  { %v7324_v40 = vadd.f32 %v7323_v46, %v7322_v62  ;;  %v7352_v39 = vadd.f32 %v7351_v45, %v7350_v49 }
0x139d   :  { %v7325_v42 = vpop.f32.mrf.mxu0  ;;  %v7353_v50 = vpop.f32.mrf.mxu1 }
0x139e   :  { %v3396_v33 = vadd.f32 %v7352_v39, %v7324_v40  ;;  %v9827_v39 = vld [vmem:[#allocation15_spill] sm:$0xff] }
0x139f   :  { %v7326_v38 = vpop.f32.mrf.mxu0  ;;  %v7354_v22 = vpop.f32.mrf.mxu1 }
0x13a0   :  { %v7327_v41 = vadd.f32 %v7326_v38, %v7325_v42  ;;  %v7355_v30 = vadd.f32 %v7354_v22, %v7353_v50  ;;  %v8930_v8 = vpack.c.bf16 %v3396_v33, %v3393_v35  ;;  %v8030_v42 = vld [vmem:[%s8944_s4 + $0x8] sm:$0xff]   ;;  %v8031_v50 = vld [vmem:[%s8944_s4 + $0x10] sm:$0xff]   ;;  %v8032_v38 = vld [vmem:[%s8944_s4 + $0x18] sm:$0xff]   ;;  %s9634_s4 = sld [smem:[%s9715_s0 + %s8184_s1]]  }
0x13a1   :  { %v7328_v58 = vpop.f32.mrf.mxu0  ;;  %v7356_v57 = vpop.f32.mrf.mxu1  ;;  %v8038_v22 = vld [vmem:[%s8951_s8 + $0x10] sm:$0xff]  }
0x13a2   :  { %v3401_v5 = vadd.f32 %v7355_v30, %v7327_v41 }
0x13a3   :  { %v7329_v16 = vpop.f32.mrf.mxu0  ;;  %v7357_v29 = vpop.f32.mrf.mxu1 }
0x13a4   :  { %v7330_v9 = vadd.f32 %v7329_v16, %v7328_v58  ;;  %v7358_v59 = vadd.f32 %v7357_v29, %v7356_v57  ;;  %v8039_v58 = vld [vmem:[%s8951_s8 + $0x8] sm:$0xff]   ;;  %v8040_v57 = vld [vmem:[%s8951_s8] sm:$0xff]   ;;  %s9641_s8 = sld [smem:[%s9715_s0 + %s8185_s5]]  }
0x13a5   :  { %v9826_v29 = vld [vmem:[#allocation14_spill] sm:$0xff] }
0x13a6   :  { %v3404_v4 = vadd.f32 %v7358_v59, %v7330_v9  ;;  %v9828_v59 = vld [vmem:[#allocation16_spill] sm:$0xff] }
0x13a8   :  { %v8927_v36 = vpack.c.bf16 %v3404_v4, %v3401_v5  ;;  %v9829_v5 = vld [vmem:[#allocation13_spill] sm:$0xff] }
0x13aa   :  { %7598 = vmatpush3.bf16.msra.mxu0 %v8927_v36 }
0x13ab   :  { %7599 = vmatprep.subr.bf16.mxu0 %v8166_v37 }
0x13ae   :  { %7600 = vmatpush3.bf16.msra.mxu0 %v8930_v8 }
0x13af   :  { %7627 = vmatprep.subr.bf16.mxu0 %v8033_v18 }
0x13b1   :  { %7602 = vmatmul.mubr.msk.bf16.vlgmr.msra.gmra.mxu0 %vm3466_vm4, %v8026_v54 }
0x13b2   :  { %7605 = vmatprep.mubr.msk.bf16.mxu0 %vm8168_vm3, %v8166_v37  ;;  %7628 = vmatpush3.bf16.msra.mxu0 %v8033_v18  ;;  %v9830_v18 = vld [vmem:[#allocation20_spill] sm:$0xff] }
0x13b3   :  { %7629 = vmatprep.subr.bf16.mxu0 %v8034_v19 }
0x13b6   :  { %7630 = vmatpush3.bf16.msra.mxu0 %v8034_v19 }
0x13b7   :  { %7631 = vmatprep.subr.bf16.mxu0 %v8035_v34 }
0x13b9   :  { %7606 = vmatmul.mubr.msk.bf16.gmra.mxu0 %vm3466_vm4, %v8027_v53 }
0x13ba   :  { %7609 = vmatprep.mubr.msk.bf16.mxu0 %vm8168_vm3, %v8166_v37  ;;  %7632 = vmatpush3.bf16.msra.mxu0 %v8035_v34 }
0x13bb   :  { %7633 = vmatprep.subr.bf16.mxu0 %v8036_v55 }
0x13be   :  { %7634 = vmatpush3.bf16.msra.mxu0 %v8036_v55 }
0x13bf   :  { %7635 = vmatprep.subr.bf16.mxu0 %v8037_v52 }
0x13c1   :  { %7610 = vmatmul.mubr.msk.bf16.gmra.mxu0 %vm3466_vm4, %v8028_v20 }
0x13c2   :  { %7636 = vmatpush3.bf16.msra.mxu0 %v8037_v52 }
0x13c3   :  { %7637 = vmatprep.subr.bf16.mxu0 %v8038_v22 }
0x13c6   :  { %7638 = vmatpush3.bf16.msra.mxu0 %v8038_v22 }
0x13c7   :  { %7639 = vmatprep.subr.bf16.mxu0 %v8039_v58 }
0x13ca   :  { %7640 = vmatpush3.bf16.msra.mxu0 %v8039_v58  ;;  %v9834_v58 = vld [vmem:[#allocation46_spill] sm:$0xff] }
0x13cb   :  { %7641 = vmatprep.subr.bf16.mxu0 %v8040_v57 }
0x13ce   :  { %7642 = vmatpush3.bf16.msra.mxu0 %v8040_v57 }
0x1471   :  { %v3510_v12 = vpop.f32.mrf.mxu0 }
0x1472   :  { %v3511_v44 = vadd.f32 %v3510_v12, %v9825_v60  ;;  %v9831_v12 = vld [vmem:[#allocation18_spill] sm:$0xff] }
0x1473   :  { %v7603_v17 = vpop.f32.mrf.mxu0 }
0x1474   :  { %v3533_v46 = vmax.f32 %v3511_v44, 0.0 }
0x1475   :  { %v3513_v32 = vpop.f32.mrf.mxu0 }
0x1476   :  { %v3514_v14 = vadd.f32 %v3513_v32, %v9824_v10  ;;  %v9832_v32 = vld [vmem:[#allocation19_spill] sm:$0xff]  ;;  %v8048_v10 = vld [vmem:[%s8976_s12 + $0x38] sm:$0xff]  }
0x1477   :  { %v7604_v31 = vpop.f32.mrf.mxu0 }
0x1478   :  { %v3534_v62 = vmax.f32 %v3514_v14, 0.0  ;;  %v8049_v14 = vld [vmem:[%s6898_s16] sm:$0xff]  }
0x1479   :  { %v3518_v24 = vpop.f32.mrf.mxu0 }
0x147a   :  { %v3519_v7 = vadd.f32 %v3518_v24, %v9822_v26  ;;  %v3555_v45 = vpack.c.bf16 %v3534_v62, %v3533_v46  ;;  %v8043_v26 = vld [vmem:[%s8976_s12 + $0x10] sm:$0xff]  }
0x147b   :  { %v7607_v28 = vpop.f32.mrf.mxu0 }
0x147c   :  { %v3535_v43 = vmax.f32 %v3519_v7, 0.0  ;;  %v8044_v7 = vld [vmem:[%s8976_s12 + $0x18] sm:$0xff]  }
0x147d   :  { %v3521_v27 = vpop.f32.mrf.mxu0 }
0x147e   :  { %v3522_v48 = vadd.f32 %v3521_v27, %v9820_v25 }
0x147f   :  { %v7608_v23 = vpop.f32.mrf.mxu0 }
0x1480   :  { %v3536_v13 = vmax.f32 %v3522_v48, 0.0  ;;  %v9833_v23 = vld [vmem:[#allocation17_spill] sm:$0xff] }
0x1481   :  { %v3526_v15 = vpop.f32.mrf.mxu0 }
0x1482   :  { %v3527_v63 = vadd.f32 %v3526_v15, %v9821_v1  ;;  %v3556_v49 = vpack.c.bf16 %v3536_v13, %v3535_v43 }
0x1483   :  { %v7611_v3 = vpop.f32.mrf.mxu0 }
0x1484   :  { %v3537_v11 = vmax.f32 %v3527_v63, 0.0  ;;  %v8041_v63 = vld [vmem:[%s8976_s12] sm:$0xff]  }
0x1485   :  { %v3529_v47 = vpop.f32.mrf.mxu0 }
0x1486   :  { %v3530_v61 = vadd.f32 %v3529_v47, %v9823_v56  ;;  %v8042_v47 = vld [vmem:[%s8976_s12 + $0x8] sm:$0xff]   ;;  %v8045_v56 = vld [vmem:[%s8976_s12 + $0x20] sm:$0xff]  }
0x1487   :  { %v7612_v0 = vpop.f32.mrf.mxu0 }
0x1488   :  { %v3538_v37 = vmax.f32 %v3530_v61, 0.0  ;;  %v8046_v61 = vld [vmem:[%s8976_s12 + $0x28] sm:$0xff]   ;;  %v8047_v0 = vld [vmem:[%s8976_s12 + $0x30] sm:$0xff]   ;;  %s6922_s12 = sld [smem:[%s9715_s0 + %s8186_s9]]  }
0x148a   :  { %v3557_v2 = vpack.c.bf16 %v3538_v37, %v3537_v11 }
0x148c   :  { %7613 = vmatprep.subr.bf16.mxu1 %v3557_v2 }
0x148d   :  { %7614 = vmatpush3.bf16.msra.mxu1 %v3557_v2 }
0x148e   :  { %7615 = vmatprep.subr.bf16.mxu1 %v3556_v49 }
0x1491   :  { %7616 = vmatpush3.bf16.msra.mxu1 %v3556_v49 }
0x1492   :  { %7617 = vmatprep.subr.bf16.mxu1 %v3555_v45 }
0x1495   :  { %7618 = vmatpush3.bf16.msra.mxu1 %v3555_v45 }
0x1498   :  { %7620 = vmatmul.mubr.msk.bf16.vlgmr.msra.gmra.mxu1 %vm3618_vm5, %v8030_v42 }
0x1499   :  { %7623 = vmatprep.mubr.msk.bf16.mxu1 %vm3618_vm5, %v8031_v50 }
0x14a0   :  { %7624 = vmatmul.mubr.msk.bf16.gmra.mxu1 %vm3618_vm5, %v8032_v38 }
0x14a1   :  { %7659 = vmatprep.mubr.msk.bf16.mxu1 %vm3879_vm6, %v8049_v14  ;;  %v9853_v14 = vld [vmem:[#allocation24_spill] sm:$0xff] }
0x1558   :  { %v7621_v41 = vpop.f32.mrf.mxu1 }
0x1559   :  { %v3674_v6 = vadd.f32 %v7621_v41, %v9828_v59  ;;  %v9835_v41 = vld [vmem:[#allocation45_spill] sm:$0xff]  ;;  %v9838_v59 = vld [vmem:[#allocation47_spill] sm:$0xff] }
0x155a   :  { %v3665_v30 = vpop.f32.mrf.mxu1 }
0x155b   :  { %v3666_v40 = vadd.f32 %v3665_v30, %v9826_v29  ;;  %v3698_v20 = vmax.f32 %v3674_v6, 0.0  ;;  %v8050_v29 = vld [vmem:[%s6898_s16 + $0x8] sm:$0xff]   ;;  %s9683_s16 = sld [smem:[%s9715_s0 + %s8187_s13]]  }
0x155c   :  { %v7622_v16 = vpop.f32.mrf.mxu1 }
0x155d   :  { %v3677_v9 = vadd.f32 %v7622_v16, %v9827_v39  ;;  %v3696_v54 = vmax.f32 %v3666_v40, 0.0  ;;  %v9836_v40 = vld [vmem:[#allocation48_spill] sm:$0xff] }
0x155e   :  { %v3668_v51 = vpop.f32.mrf.mxu1 }
0x155f   :  { %v3669_v4 = vadd.f32 %v3668_v51, %v9829_v5  ;;  %v3699_v33 = vmax.f32 %v3677_v9, 0.0 }
0x1560   :  { %v7625_v35 = vpop.f32.mrf.mxu1 }
0x1561   :  { %v3697_v53 = vmax.f32 %v3669_v4, 0.0  ;;  %v3690_v19 = vadd.f32 %v7625_v35, %v9830_v18  ;;  %v3705_v55 = vpack.c.bf16 %v3699_v33, %v3698_v20  ;;  %v9840_v35 = vld [vmem:[#allocation42_spill] sm:$0xff]  ;;  %v9842_v18 = vld [vmem:[#allocation44_spill] sm:$0xff] }
0x1562   :  { %v3681_v21 = vpop.f32.mrf.mxu1 }
0x1563   :  { %v3704_v34 = vpack.c.bf16 %v3697_v53, %v3696_v54  ;;  %v3682_v17 = vadd.f32 %v3681_v21, %v9831_v12  ;;  %v3702_v28 = vmax.f32 %v3690_v19, 0.0  ;;  %v9841_v53 = vld [vmem:[#allocation41_spill] sm:$0xff] }
0x1564   :  { %v7626_v52 = vpop.f32.mrf.mxu1 }
0x1565   :  { %v3693_v31 = vadd.f32 %v7626_v52, %v9832_v32  ;;  %7643 = vmatprep.mubr.bf16.mxu0 %v3704_v34  ;;  %v3700_v3 = vmax.f32 %v3682_v17, 0.0 }
0x1566   :  { %v3684_v24 = vpop.f32.mrf.mxu1  ;;  %7644 = vmatmul.mubr.bf16.vlgmr.msra.gmra.mxu0 %v3705_v55 }
0x1567   :  { %v3703_v27 = vmax.f32 %v3693_v31, 0.0  ;;  %v3685_v15 = vadd.f32 %v3684_v24, %v9833_v23  ;;  %v9846_v24 = vld [vmem:[#allocation38_spill] sm:$0xff] }
0x1569   :  { %v3707_v25 = vpack.c.bf16 %v3703_v27, %v3702_v28  ;;  %v3701_v48 = vmax.f32 %v3685_v15, 0.0  ;;  %v9847_v27 = vld [vmem:[#allocation37_spill] sm:$0xff] }
0x156b   :  { %7739 = vmatprep.subr.bf16.mxu0 %v3707_v25  ;;  %v3706_v1 = vpack.c.bf16 %v3701_v48, %v3700_v3  ;;  %v9848_v3 = vld [vmem:[#allocation40_spill] sm:$0xff] }
0x156c   :  { %7740 = vmatpush3.bf16.msra.mxu0 %v3707_v25 }
0x156d   :  { %7647 = vmatprep.mubr.bf16.mxu0 %v3706_v1  ;;  %7741 = vmatprep.subr.bf16.mxu0 %v3706_v1 }
0x156e   :  { %7648 = vmatmul.mubr.bf16.gmra.mxu0 %v3707_v25 }
0x156f   :  { %7747 = vmatprep.mubr.msk.bf16.mxu0 %vm3879_vm6, %v8041_v63 }
0x1570   :  { %7742 = vmatpush3.bf16.msra.mxu0 %v3706_v1  ;;  %v9850_v1 = vld [vmem:[#allocation39_spill] sm:$0xff] }
0x1571   :  { %7743 = vmatprep.subr.bf16.mxu0 %v3705_v55 }
0x1574   :  { %7744 = vmatpush3.bf16.msra.mxu0 %v3705_v55  ;;  %v9844_v55 = vld [vmem:[#allocation43_spill] sm:$0xff] }
0x1575   :  { %7745 = vmatprep.subr.bf16.mxu0 %v3704_v34 }
0x1578   :  { %7746 = vmatpush3.bf16.msra.mxu0 %v3704_v34 }
0x157b   :  { %7748 = vmatmul.mubr.msk.bf16.vlgmr.msra.gmra.mxu0 %vm3879_vm6, %v8042_v47 }
0x157c   :  { %7751 = vmatprep.mubr.msk.bf16.mxu0 %vm3879_vm6, %v8043_v26  ;;  %v8051_v26 = vld [vmem:[%s6900_s20] sm:$0xff]  }
0x1583   :  { %7752 = vmatmul.mubr.msk.bf16.gmra.mxu0 %vm3879_vm6, %v8044_v7 }
0x1584   :  { %7755 = vmatprep.mubr.msk.bf16.mxu0 %vm3879_vm6, %v8045_v56 }
0x158b   :  { %7756 = vmatmul.mubr.msk.bf16.gmra.mxu0 %vm3879_vm6, %v8046_v61  ;;  %v9852_v61 = vld [vmem:[#allocation22_spill] sm:$0xff] }
0x158c   :  { %7759 = vmatprep.mubr.msk.bf16.mxu0 %vm3879_vm6, %v8047_v0 }
0x1593   :  { %7760 = vmatmul.mubr.msk.bf16.gmra.mxu0 %vm3879_vm6, %v8048_v10 }
0x1626   :  { %v7645_v13 = vpop.f32.mrf.mxu0 }
0x1628   :  { %v3806_v11 = vpop.f32.mrf.mxu0 }
0x162a   :  { %v7646_v37 = vpop.f32.mrf.mxu0 }
0x162b   :  { %v3838_v45 = vpack.c.bf16 %v7646_v37, %v7645_v13 }
0x162c   :  { %v3809_v60 = vpop.f32.mrf.mxu0 }
0x162d   :  { %v3837_v50 = vpack.c.bf16 %v3809_v60, %v3806_v11  ;;  %v9854_v11 = vld [vmem:[#allocation21_spill] sm:$0xff] }
0x162e   :  { %v7649_v44 = vpop.f32.mrf.mxu0 }
0x1630   :  { %v3822_v43 = vpop.f32.mrf.mxu0 }
0x1632   :  { %v7650_v2 = vpop.f32.mrf.mxu0 }
0x1633   :  { %v3840_v62 = vpack.c.bf16 %v7650_v2, %v7649_v44  ;;  %v9855_v2 = vld [vmem:[#allocation23_spill] sm:$0xff] }
0x1634   :  { %v3825_v49 = vpop.f32.mrf.mxu0 }
0x1635   :  { %v3839_v46 = vpack.c.bf16 %v3825_v49, %v3822_v43  ;;  %7651 = vmatprep.subr.bf16.mxu1 %v3840_v62 }
0x1636   :  { %7652 = vmatpush3.bf16.msra.mxu1 %v3840_v62 }
0x1637   :  { %7653 = vmatprep.subr.bf16.mxu1 %v3839_v46 }
0x163a   :  { %7654 = vmatpush3.bf16.msra.mxu1 %v3839_v46 }
0x163b   :  { %7655 = vmatprep.subr.bf16.mxu1 %v3838_v45  ;;  %v7749_v42 = vpop.f32.mrf.mxu0 }
0x163c   :  { %v5250_v57 = vadd.f32 %v7749_v42, %v9834_v58  ;;  %v8055_v58 = vld [vmem:[%s9038_s24 + $0x10] sm:$0xff]  }
0x163d   :  { %v5241_v38 = vpop.f32.mrf.mxu0 }
0x163e   :  { %7656 = vmatpush3.bf16.msra.mxu1 %v3838_v45  ;;  %v5242_v39 = vadd.f32 %v5241_v38, %v9836_v40  ;;  %v8053_v38 = vld [vmem:[%s9038_s24] sm:$0xff]   ;;  %v8063_v40 = vld [vmem:[%s9038_s24 + $0x50] sm:$0xff]  }
0x163f   :  { %7657 = vmatprep.subr.bf16.mxu1 %v3837_v50  ;;  %v7750_v22 = vpop.f32.mrf.mxu0 }
0x1640   :  { %v5253_v30 = vadd.f32 %v7750_v22, %v9835_v41  ;;  %v8054_v22 = vld [vmem:[%s9038_s24 + $0x8] sm:$0xff]   ;;  %v8057_v41 = vld [vmem:[%s9038_s24 + $0x20] sm:$0xff]  }
0x1641   :  { %v5244_v16 = vpop.f32.mrf.mxu0 }
0x1642   :  { %v9009_v9 = vpack.c.bf16 %v5253_v30, %v5250_v57  ;;  %v5245_v6 = vadd.f32 %v5244_v16, %v9838_v59  ;;  %7658 = vmatpush3.bf16.msra.mxu1 %v3837_v50  ;;  %v8052_v50 = vld [vmem:[%s6900_s20 + $0x8] sm:$0xff]   ;;  %v8056_v57 = vld [vmem:[%s9038_s24 + $0x18] sm:$0xff]   ;;  %v8059_v30 = vld [vmem:[%s9038_s24 + $0x30] sm:$0xff]   ;;  %s9691_s20 = sld [smem:[%s9715_s0 + %s8188_s17]]  }
0x1643   :  { %v7753_v51 = vpop.f32.mrf.mxu0  ;;  %v8061_v16 = vld [vmem:[%s9038_s24 + $0x40] sm:$0xff]  }
0x1644   :  { %9837 = vst [vmem:[#allocation2_spill] sm:$0xff] %v9009_v9  ;;  %v9012_v5 = vpack.c.bf16 %v5245_v6, %v5242_v39  ;;  %v5266_v54 = vadd.f32 %v7753_v51, %v9840_v35  ;;  %v8064_v39 = vld [vmem:[%s9038_s24 + $0x58] sm:$0xff]   ;;  %v8065_v59 = vld [vmem:[%s9038_s24 + $0x60] sm:$0xff]   ;;  %v8066_v6 = vld [vmem:[%s9038_s24 + $0x68] sm:$0xff]  }
0x1645   :  { %7660 = vmatmul.mubr.msk.bf16.vlgmr.msra.gmra.mxu1 %vm3879_vm6, %v8050_v29  ;;  %v5257_v4 = vpop.f32.mrf.mxu0  ;;  %v8062_v29 = vld [vmem:[%s9038_s24 + $0x48] sm:$0xff]   ;;  %v8067_v51 = vld [vmem:[%s9038_s24 + $0x70] sm:$0xff]  }
0x1646   :  { %9839 = vst [vmem:[#allocation4_spill] sm:$0xff] %v9012_v5  ;;  %v5258_v19 = vadd.f32 %v5257_v4, %v9842_v18  ;;  %7667 = vmatprep.mubr.msk.bf16.mxu1 %vm3466_vm4, %v8051_v26  ;;  %v8068_v4 = vld [vmem:[%s9038_s24 + $0x78] sm:$0xff]   ;;  %v8070_v35 = vld [vmem:[%s9038_s24 + $0x88] sm:$0xff]   ;;  %v8073_v18 = vld [vmem:[%s9038_s24 + $0xa0] sm:$0xff]  }
0x1647   :  { %v7754_v33 = vpop.f32.mrf.mxu0 }
0x1648   :  { %v5269_v20 = vadd.f32 %v7754_v33, %v9841_v53  ;;  %v8069_v33 = vld [vmem:[%s9038_s24 + $0x80] sm:$0xff]   ;;  %v9086_v53 = vpop.permute.xlu1 %4243 }
0x1649   :  { %v5260_v21 = vpop.f32.mrf.mxu0 }
0x164a   :  { %v9018_v34 = vpack.c.bf16 %v5269_v20, %v5266_v54  ;;  %v5261_v52 = vadd.f32 %v5260_v21, %v9844_v55  ;;  %v8071_v54 = vld [vmem:[%s9038_s24 + $0x90] sm:$0xff]   ;;  %v9088_v20 = vpop.permute.xlu0 %4238  ;;  %v8072_v21 = vld [vmem:[%s9038_s24 + $0x98] sm:$0xff]  }
0x164b   :  { %v7757_v12 = vpop.f32.mrf.mxu0 }
0x164c   :  { %9843 = vst [vmem:[#allocation3_spill] sm:$0xff] %v9018_v34  ;;  %v9021_v17 = vpack.c.bf16 %v5261_v52, %v5258_v19  ;;  %v5282_v28 = vadd.f32 %v7757_v12, %v9846_v24  ;;  %v9103_v19 = vpop.permute.xlu1 %4313  ;;  %v8085_v52 = vld [vmem:[%s9094_s28] sm:$0xff]   ;;  %v8074_v12 = vld [vmem:[%s9038_s24 + $0xa8] sm:$0xff]   ;;  %v8075_v24 = vld [vmem:[%s9038_s24 + $0xb0] sm:$0xff]  }
0x164d   :  { %v5273_v32 = vpop.f32.mrf.mxu0  ;;  %7767 = vmatprep.mubr.msk.bf16.mxu0 %vm3466_vm4, %v8085_v52 }
0x164e   :  { %9845 = vst [vmem:[#allocation6_spill] sm:$0xff] %v9021_v17  ;;  %v5274_v25 = vadd.f32 %v5273_v32, %v9848_v3  ;;  %v9105_v55 = vpop.permute.xlu0 %4308 }
0x164f   :  { %v7758_v31 = vpop.f32.mrf.mxu0 }
0x1650   :  { %v5285_v23 = vadd.f32 %v7758_v31, %v9847_v27  ;;  %v9112_v32 = vpop.permute.xlu1 %4233 }
0x1651   :  { %v5276_v15 = vpop.f32.mrf.mxu0 }
0x1652   :  { %v9026_v48 = vpack.c.bf16 %v5285_v23, %v5282_v28  ;;  %v5277_v63 = vadd.f32 %v5276_v15, %v9850_v1  ;;  %v9114_v31 = vpop.permute.xlu0 %4228  ;;  %v8076_v23 = vld [vmem:[%s9038_s24 + $0xb8] sm:$0xff]   ;;  %v8077_v15 = vld [vmem:[%s9038_s24 + $0xc0] sm:$0xff]   ;;  %v8078_v1 = vld [vmem:[%s9038_s24 + $0xc8] sm:$0xff]  }
0x1653   :  { %v7761_v5 = vpop.f32.mrf.mxu0 }
0x1654   :  { %9849 = vst [vmem:[#allocation5_spill] sm:$0xff] %v9026_v48  ;;  %v9029_v47 = vpack.c.bf16 %v5277_v63, %v5274_v25  ;;  %v9119_v28 = vpop.permute.xlu1 %4303  ;;  %v8079_v63 = vld [vmem:[%s9038_s24 + $0xd0] sm:$0xff]  }
0x1656   :  { %9851 = vst [vmem:[#allocation9_spill] sm:$0xff] %v9029_v47  ;;  %v9121_v27 = vpop.permute.xlu0 %4298 }
0x1658   :  { %v9126_v3 = vpop.permute.xlu1 %4223 }
0x165a   :  { %v9128_v25 = vpop.permute.xlu0 %4218 }
0x165c   :  { %v9133_v26 = vpop.permute.xlu1 %4293 }
0x1705   :  { %v7661_v7 = vpop.f32.mrf.mxu1 }
0x1706   :  { %v3929_v0 = vadd.f32 %v7661_v7, %v9852_v61  ;;  %v9135_v7 = vpop.permute.xlu0 %4288  ;;  %v9140_v61 = vpop.permute.xlu1 %4213 }
0x1707   :  { %v3920_v56 = vpop.f32.mrf.mxu1 }
0x1708   :  { %v3921_v13 = vadd.f32 %v3920_v56, %v9853_v14  ;;  %v3937_v44 = vmax.f32 %v3929_v0, 0.0  ;;  %v8080_v56 = vld [vmem:[%s9038_s24 + $0xd8] sm:$0xff]  }
0x1709   :  { %v7662_v10 = vpop.f32.mrf.mxu1 }
0x170a   :  { %v3932_v37 = vadd.f32 %v7662_v10, %v9854_v11  ;;  %v3935_v49 = vmax.f32 %v3921_v13, 0.0  ;;  %v9142_v0 = vpop.permute.xlu0 %4208  ;;  %v8081_v10 = vld [vmem:[%s9038_s24 + $0xe0] sm:$0xff]   ;;  %v9147_v14 = vpop.permute.xlu1 %4483  ;;  %v8082_v11 = vld [vmem:[%s9038_s24 + $0xe8] sm:$0xff]  }
0x170b   :  { %v3923_v60 = vpop.f32.mrf.mxu1 }
0x170c   :  { %v3938_v43 = vmax.f32 %v3932_v37, 0.0  ;;  %v3924_v62 = vadd.f32 %v3923_v60, %v9855_v2  ;;  %v8083_v37 = vld [vmem:[%s9038_s24 + $0xf0] sm:$0xff]  }
0x170e   :  { %v3948_v46 = vpack.c.bf16 %v3938_v43, %v3937_v44  ;;  %v3936_v45 = vmax.f32 %v3924_v62, 0.0  ;;  %v9149_v13 = vpop.permute.xlu0 %4478  ;;  %v9154_v60 = vpop.permute.xlu1 %4403  ;;  %v8084_v43 = vld [vmem:[%s9038_s24 + $0xf8] sm:$0xff]  }
0x1710   :  { %v3947_v42 = vpack.c.bf16 %v3936_v45, %v3935_v49  ;;  %7663 = vmatprep.subr.bf16.mxu1 %v3948_v46 }
0x1711   :  { %7664 = vmatpush3.bf16.msra.mxu1 %v3948_v46 }
0x1712   :  { %7665 = vmatprep.subr.bf16.mxu1 %v3947_v42  ;;  %v9156_v44 = vpop.permute.xlu0 %4398  ;;  %v9160_v2 = vpop.permute.xlu1 %4283 }
0x1715   :  { %7666 = vmatpush3.bf16.msra.mxu1 %v3947_v42 }
0x1716   :  { %7671 = vmatprep.subr.bf16.mxu1 %v8927_v36  ;;  %v9162_v62 = vpop.permute.xlu0 %4278  ;;  %v9165_v49 = vpop.permute.xlu1 %4203 }
0x1718   :  { %7668 = vmatmul.mubr.msk.bf16.vlgmr.msra.gmra.mxu1 %vm3466_vm4, %v8052_v50 }
0x1719   :  { %7672 = vmatpush3.bf16.msra.mxu1 %v8927_v36  ;;  %7675 = vmatprep.mubr.msk.bf16.mxu1 %vm3466_vm4, %v8053_v38  ;;  %v8058_v36 = vld [vmem:[%s9038_s24 + $0x28] sm:$0xff]  }
0x171a   :  { %7673 = vmatprep.subr.bf16.mxu1 %v8930_v8  ;;  %v9167_v46 = vpop.permute.xlu0 %4198  ;;  %v9169_v45 = vpop.permute.xlu1 %4473 }
0x171d   :  { %7674 = vmatpush3.bf16.msra.mxu1 %v8930_v8  ;;  %v8060_v8 = vld [vmem:[%s9038_s24 + $0x38] sm:$0xff]   ;;  %s6924_s24 = sld [smem:[%s9715_s0 + %s8189_s21]]  }
0x171e   :  { %v9171_v42 = vpop.permute.xlu0 %4468  ;;  %v9173_v50 = vpop.permute.xlu1 %4393 }
0x1720   :  { %7676 = vmatmul.mubr.msk.bf16.vlgmr.msra.gmra.mxu1 %vm3466_vm4, %v8054_v22 }
0x1721   :  { %7679 = vmatprep.mubr.msk.bf16.mxu1 %vm3466_vm4, %v8055_v58 }
0x1722   :  { %v9175_v38 = vpop.permute.xlu0 %4388  ;;  %v9177_v22 = vpop.permute.xlu1 %4273 }
0x1726   :  { %v9179_v58 = vpop.permute.xlu0 %4268 }
0x1728   :  { %7680 = vmatmul.mubr.msk.bf16.gmra.mxu1 %vm3466_vm4, %v8056_v57  ;;  %v9181_v57 = vpop.permute.xlu1 %4193 }
0x1729   :  { %7683 = vmatprep.mubr.msk.bf16.mxu1 %vm3466_vm4, %v8057_v41 }
0x172a   :  { %v9183_v41 = vpop.permute.xlu0 %4188 }
0x1730   :  { %7684 = vmatmul.mubr.msk.bf16.gmra.mxu1 %vm3466_vm4, %v8058_v36  ;;  %v9185_v36 = vpop.permute.xlu1 %4463 }
0x1731   :  { %7687 = vmatprep.mubr.msk.bf16.mxu1 %vm3466_vm4, %v8059_v30  ;;  %v9187_v30 = vpop.permute.xlu0 %4458 }
0x1738   :  { %7688 = vmatmul.mubr.msk.bf16.gmra.mxu1 %vm3466_vm4, %v8060_v8  ;;  %v9189_v8 = vpop.permute.xlu1 %4383 }
0x1739   :  { %7691 = vmatprep.mubr.msk.bf16.mxu1 %vm3466_vm4, %v8061_v16  ;;  %v9191_v16 = vpop.permute.xlu0 %4378 }
0x1740   :  { %7692 = vmatmul.mubr.msk.bf16.gmra.mxu1 %vm3466_vm4, %v8062_v29  ;;  %v9193_v29 = vpop.permute.xlu1 %4263 }
0x1741   :  { %7695 = vmatprep.mubr.msk.bf16.mxu1 %vm3466_vm4, %v8063_v40  ;;  %v9195_v40 = vpop.permute.xlu0 %4258 }
0x1748   :  { %7696 = vmatmul.mubr.msk.bf16.gmra.mxu1 %vm3466_vm4, %v8064_v39  ;;  %v4184_v39 = vpop.permute.xlu1 %4183 }
0x1749   :  { %7699 = vmatprep.mubr.msk.bf16.mxu1 %vm3466_vm4, %v8065_v59  ;;  %v4179_v59 = vpop.permute.xlu0 %4178 }
0x1750   :  { %7700 = vmatmul.mubr.msk.bf16.gmra.mxu1 %vm3466_vm4, %v8066_v6  ;;  %v9197_v6 = vpop.permute.xlu1 %4453 }
0x1751   :  { %7703 = vmatprep.mubr.msk.bf16.mxu1 %vm3466_vm4, %v8067_v51  ;;  %v9199_v51 = vpop.permute.xlu0 %4448 }
0x1758   :  { %7704 = vmatmul.mubr.msk.bf16.gmra.mxu1 %vm3466_vm4, %v8068_v4 }
0x1759   :  { %7707 = vmatprep.mubr.msk.bf16.mxu1 %vm3466_vm4, %v8069_v33  ;;  %v9201_v33 = vpop.permute.xlu1 %4373 }
0x1760   :  { %7708 = vmatmul.mubr.msk.bf16.gmra.mxu1 %vm3466_vm4, %v8070_v35  ;;  %v9203_v35 = vpop.permute.xlu0 %4368 }
0x1761   :  { %7711 = vmatprep.mubr.msk.bf16.mxu1 %vm3466_vm4, %v8071_v54 }
0x1768   :  { %7712 = vmatmul.mubr.msk.bf16.gmra.mxu1 %vm3466_vm4, %v8072_v21  ;;  %v9856_v21 = vld [vmem:[#allocation26_spill] sm:$0xff] }
0x1769   :  { %7715 = vmatprep.mubr.msk.bf16.mxu1 %vm3466_vm4, %v8073_v18 }
0x1770   :  { %7716 = vmatmul.mubr.msk.bf16.gmra.mxu1 %vm3466_vm4, %v8074_v12  ;;  %v9857_v12 = vld [vmem:[#allocation28_spill] sm:$0xff] }
0x1771   :  { %7719 = vmatprep.mubr.msk.bf16.mxu1 %vm3466_vm4, %v8075_v24 }
0x1778   :  { %7720 = vmatmul.mubr.msk.bf16.gmra.mxu1 %vm3466_vm4, %v8076_v23  ;;  %v9858_v23 = vld [vmem:[#allocation25_spill] sm:$0xff] }
0x1779   :  { %7723 = vmatprep.mubr.msk.bf16.mxu1 %vm3466_vm4, %v8077_v15 }
0x1780   :  { %7724 = vmatmul.mubr.msk.bf16.gmra.mxu1 %vm3466_vm4, %v8078_v1 }
0x1781   :  { %7727 = vmatprep.mubr.msk.bf16.mxu1 %vm3466_vm4, %v8079_v63  ;;  %v9208_v63 = vpop.permute.xlu1 %4253 }
0x1788   :  { %7728 = vmatmul.mubr.msk.bf16.gmra.mxu1 %vm3466_vm4, %v8080_v56  ;;  %v9210_v56 = vpop.permute.xlu0 %4248 }
0x1789   :  { %7731 = vmatprep.mubr.msk.bf16.mxu1 %vm3466_vm4, %v8081_v10 }
0x1790   :  { %7732 = vmatmul.mubr.msk.bf16.gmra.mxu1 %vm3466_vm4, %v8082_v11 }
0x1791   :  { %7735 = vmatprep.mubr.msk.bf16.mxu1 %vm3466_vm4, %v8083_v37  ;;  %v9859_v37 = vld [vmem:[#allocation27_spill] sm:$0xff] }
0x1798   :  { %7736 = vmatmul.mubr.msk.bf16.gmra.mxu1 %vm3466_vm4, %v8084_v43 }
0x17d8   :  { %v7669_v4 = vpop.f32.mrf.mxu1 }
0x17d9   :  { %v4028_v18 = vadd.f32 %v7669_v4, %v9856_v21 }
0x17da   :  { %v4019_v54 = vpop.f32.mrf.mxu1 }
0x17db   :  { %v4020_v24 = vadd.f32 %v4019_v54, %v9857_v12  ;;  %v4036_v10 = vmax.f32 %v4028_v18, 0.0 }
0x17dc   :  { %v7670_v52 = vpop.f32.mrf.mxu1 }
0x17dd   :  { %v4031_v15 = vadd.f32 %v7670_v52, %v9858_v23  ;;  %v4034_v17 = vmax.f32 %v4020_v24, 0.0  ;;  %v9213_v52 = vpop.f32.mrf.mxu0  ;;  %v4174_v23 = vpop.permute.xlu1 %4173 }
0x17de   :  { %v4022_v1 = vpop.f32.mrf.mxu1  ;;  %9860 = vst [vmem:[#allocation8_spill] sm:$0xff] %v9213_v52 }
0x17df   :  { %v4037_v11 = vmax.f32 %v4031_v15, 0.0  ;;  %v4023_v43 = vadd.f32 %v4022_v1, %v9859_v37  ;;  %v8087_v1 = vld [vmem:[%s9101_s2 + $0x8] sm:$0xff]   ;;  %v4169_v37 = vpop.permute.xlu0 %4168 }
0x17e0   :  { %v7677_v9 = vpop.f32.mrf.mxu1 }
0x17e1   :  { %v5313_v34 = vpack.c.bf16 %v4037_v11, %v4036_v10  ;;  %v4035_v4 = vmax.f32 %v4023_v43, 0.0  ;;  %v9215_v18 = vadd.f32 %v7677_v9, %v4179_v59  ;;  %v8086_v43 = vld [vmem:[%s9094_s28 + $0x8] sm:$0xff]  }
0x17e2   :  { %v4776_v21 = vpop.f32.mrf.mxu1 }
0x17e3   :  { %v5312_v54 = vpack.c.bf16 %v4035_v4, %v4034_v17  ;;  %7763 = vmatprep.subr.bf16.mxu0 %v5313_v34  ;;  %9861 = vst [vmem:[#allocation10_spill] sm:$0xff] %v9215_v18  ;;  %v9220_v10 = vadd.f32 %v4776_v21, %v4169_v37  ;;  %v7762_v4 = vpop.f32.mrf.mxu0  ;;  %v9866_v37 = vld [vmem:[#allocation34_spill] sm:$0xff] }
0x17e4   :  { %v7678_v12 = vpop.f32.mrf.mxu1  ;;  %7764 = vmatpush3.bf16.msra.mxu0 %v5313_v34  ;;  %v5298_v17 = vadd.f32 %v7761_v5, %v9866_v37  ;;  %v9270_v37 = vpop.permute.xlu0 %4438 }
0x17e5   :  { %v9217_v15 = vadd.f32 %v7678_v12, %v4184_v39  ;;  %7765 = vmatprep.subr.bf16.mxu0 %v5312_v54  ;;  %9863 = vst [vmem:[#allocation11_spill] sm:$0xff] %v9220_v10  ;;  %v8088_v39 = vld [vmem:[%s9101_s2] sm:$0xff]   ;;  %v9865_v12 = vld [vmem:[#allocation33_spill] sm:$0xff] }
0x17e6   :  { %v4779_v24 = vpop.f32.mrf.mxu1  ;;  %v5301_v47 = vadd.f32 %v7762_v4, %v9865_v12 }
0x17e7   :  { %9862 = vst [vmem:[#allocation7_spill] sm:$0xff] %v9217_v15  ;;  %v9224_v11 = vadd.f32 %v4779_v24, %v4174_v23 }
0x17e8   :  { %v7681_v34 = vpop.f32.mrf.mxu1  ;;  %7766 = vmatpush3.bf16.msra.mxu0 %v5312_v54  ;;  %v9239_v9 = vpack.c.bf16 %v5301_v47, %v5298_v17 }
0x17e9   :  { %9864 = vst [vmem:[#allocation12_spill] sm:$0xff] %v9224_v11  ;;  %7771 = vmatprep.subr.bf16.mxu0 %v8087_v1  ;;  %v9234_v23 = vadd.f32 %v7681_v34, %v9167_v46 }
0x17ea   :  { %v4792_v59 = vpop.f32.mrf.mxu1  ;;  %9869 = vst [vmem:[#allocation16_spill] sm:$0xff] %v9239_v9 }
0x17eb   :  { %7768 = vmatmul.mubr.msk.bf16.vlgmr.msra.gmra.mxu0 %vm3466_vm4, %v8086_v43  ;;  %9867 = vst [vmem:[#allocation14_spill] sm:$0xff] %v9234_v23  ;;  %v9242_v10 = vadd.f32 %v4792_v59, %v9183_v41 }
0x17ec   :  { %v7682_v21 = vpop.f32.mrf.mxu1  ;;  %7772 = vmatpush3.bf16.msra.mxu0 %v8087_v1 }
0x17ed   :  { %v9237_v24 = vadd.f32 %v7682_v21, %v9165_v49  ;;  %7773 = vmatprep.subr.bf16.mxu0 %v8088_v39  ;;  %9870 = vst [vmem:[#allocation13_spill] sm:$0xff] %v9242_v10  ;;  %v9894_v10 = vld [vmem:[#allocation49_spill] sm:$0xff] }
0x17ee   :  { %v4795_v54 = vpop.f32.mrf.mxu1 }
0x17ef   :  { %9868 = vst [vmem:[#allocation15_spill] sm:$0xff] %v9237_v24  ;;  %v9247_v1 = vadd.f32 %v4795_v54, %v9181_v57 }
0x17f0   :  { %v7685_v5 = vpop.f32.mrf.mxu1  ;;  %7774 = vmatpush3.bf16.msra.mxu0 %v8088_v39 }
0x17f1   :  { %9871 = vst [vmem:[#allocation20_spill] sm:$0xff] %v9247_v1  ;;  %7779 = vmatprep.subr.bf16.mxu0 %v9239_v9  ;;  %v9253_v47 = vadd.f32 %v7685_v5, %v9128_v25  ;;  %v9268_v25 = vpop.permute.xlu1 %4443 }
0x17f2   :  { %v4808_v49 = vpop.f32.mrf.mxu1 }
0x17f3   :  { %9872 = vst [vmem:[#allocation18_spill] sm:$0xff] %v9253_v47  ;;  %v9259_v34 = vadd.f32 %v4808_v49, %v9142_v0 }
0x17f4   :  { %v7686_v4 = vpop.f32.mrf.mxu1 }
0x17f5   :  { %v9256_v41 = vadd.f32 %v7686_v4, %v9126_v3  ;;  %9874 = vst [vmem:[#allocation17_spill] sm:$0xff] %v9259_v34  ;;  %v9286_v46 = vpop.permute.xlu1 %4363 }
0x17f6   :  { %v4811_v17 = vpop.f32.mrf.mxu1 }
0x17f7   :  { %9873 = vst [vmem:[#allocation19_spill] sm:$0xff] %v9256_v41  ;;  %v9264_v39 = vadd.f32 %v4811_v17, %v9140_v61 }
0x17f8   :  { %v7689_v59 = vpop.f32.mrf.mxu1 }
0x17f9   :  { %9875 = vst [vmem:[#allocation46_spill] sm:$0xff] %v9264_v39  ;;  %v9273_v54 = vadd.f32 %v7689_v59, %v9088_v20  ;;  %v9290_v59 = vpop.permute.xlu0 %4358  ;;  %v9298_v12 = vpop.permute.xlu1 %4433 }
0x17fa   :  { %v4824_v21 = vpop.f32.mrf.mxu1 }
0x17fb   :  { %9876 = vst [vmem:[#allocation45_spill] sm:$0xff] %v9273_v54  ;;  %v9279_v61 = vadd.f32 %v4824_v21, %v9114_v31 }
0x17fc   :  { %v7690_v3 = vpop.f32.mrf.mxu1 }
0x17fd   :  { %v9276_v0 = vadd.f32 %v7690_v3, %v9086_v53  ;;  %9878 = vst [vmem:[#allocation47_spill] sm:$0xff] %v9279_v61  ;;  %v9308_v20 = vpop.permute.xlu0 %4428 }
0x17fe   :  { %v4827_v5 = vpop.f32.mrf.mxu1 }
0x17ff   :  { %9877 = vst [vmem:[#allocation48_spill] sm:$0xff] %v9276_v0  ;;  %v9284_v4 = vadd.f32 %v4827_v5, %v9112_v32 }
0x1800   :  { %v7693_v17 = vpop.f32.mrf.mxu1 }
0x1801   :  { %9879 = vst [vmem:[#allocation42_spill] sm:$0xff] %v9284_v4  ;;  %v9293_v43 = vadd.f32 %v7693_v17, %v9195_v40 }
0x1802   :  { %v4840_v53 = vpop.f32.mrf.mxu1 }
0x1803   :  { %9880 = vst [vmem:[#allocation41_spill] sm:$0xff] %v9293_v43  ;;  %v9301_v32 = vadd.f32 %v4840_v53, %v9210_v56  ;;  %v4349_v53 = vpop.permute.xlu0 %4348 }
0x1804   :  { %v7694_v3 = vpop.f32.mrf.mxu1 }
0x1805   :  { %v9296_v31 = vadd.f32 %v7694_v3, %v9193_v29  ;;  %9882 = vst [vmem:[#allocation43_spill] sm:$0xff] %v9301_v32  ;;  %v4354_v3 = vpop.permute.xlu1 %4353 }
0x1806   :  { %v4843_v21 = vpop.f32.mrf.mxu1 }
0x1807   :  { %9881 = vst [vmem:[#allocation44_spill] sm:$0xff] %v9296_v31  ;;  %v9306_v57 = vadd.f32 %v4843_v21, %v9208_v63 }
0x1808   :  { %v7697_v49 = vpop.f32.mrf.mxu1 }
0x1809   :  { %9883 = vst [vmem:[#allocation38_spill] sm:$0xff] %v9306_v57  ;;  %v9313_v11 = vadd.f32 %v7697_v49, %v9162_v62  ;;  %v9328_v49 = vpop.permute.xlu1 %4423 }
0x180a   :  { %v4856_v29 = vpop.f32.mrf.mxu1 }
0x180b   :  { %9884 = vst [vmem:[#allocation37_spill] sm:$0xff] %v9313_v11  ;;  %v9319_v63 = vadd.f32 %v4856_v29, %v9179_v58 }
0x180c   :  { %v7698_v17 = vpop.f32.mrf.mxu1 }
0x180d   :  { %v9316_v56 = vadd.f32 %v7698_v17, %v9160_v2  ;;  %9886 = vst [vmem:[#allocation39_spill] sm:$0xff] %v9319_v63  ;;  %v9330_v2 = vpop.permute.xlu0 %4418  ;;  %v4344_v15 = vpop.permute.xlu1 %4343 }
0x180e   :  { %v4859_v5 = vpop.f32.mrf.mxu1 }
0x180f   :  { %9885 = vst [vmem:[#allocation40_spill] sm:$0xff] %v9316_v56  ;;  %v9324_v18 = vadd.f32 %v4859_v5, %v9177_v22 }
0x1810   :  { %v7701_v40 = vpop.f32.mrf.mxu1 }
0x1811   :  { %9887 = vst [vmem:[#allocation22_spill] sm:$0xff] %v9324_v18  ;;  %v9333_v57 = vadd.f32 %v7701_v40, %v9121_v27  ;;  %v4339_v27 = vpop.permute.xlu0 %4338  ;;  %v9354_v1 = vpop.permute.xlu1 %4413 }
0x1812   :  { %v4872_v62 = vpop.f32.mrf.mxu1 }
0x1813   :  { %9888 = vst [vmem:[#allocation24_spill] sm:$0xff] %v9333_v57  ;;  %v9339_v22 = vadd.f32 %v4872_v62, %v9135_v7 }
0x1814   :  { %v7702_v17 = vpop.f32.mrf.mxu1 }
0x1815   :  { %v9336_v58 = vadd.f32 %v7702_v17, %v9119_v28  ;;  %9890 = vst [vmem:[#allocation23_spill] sm:$0xff] %v9339_v22  ;;  %v9892_v28 = vld [vmem:[#allocation50_spill] sm:$0xff]  ;;  %v9364_v5 = vpop.permute.xlu0 %4408 }
0x1816   :  { %v4875_v29 = vpop.f32.mrf.mxu1 }
0x1817   :  { %9889 = vst [vmem:[#allocation21_spill] sm:$0xff] %v9336_v58  ;;  %v9344_v32 = vadd.f32 %v4875_v29, %v9133_v26 }
0x1818   :  { %v7705_v21 = vpop.f32.mrf.mxu1 }
0x1819   :  { %9891 = vst [vmem:[#allocation26_spill] sm:$0xff] %v9344_v32  ;;  %v9349_v17 = vadd.f32 %v7705_v21, %v9892_v28  ;;  %v4334_v28 = vpop.permute.xlu1 %4333 }
0x181a   :  { %v4888_v40 = vpop.f32.mrf.mxu1 }
0x181b   :  { %9893 = vst [vmem:[#allocation28_spill] sm:$0xff] %v9349_v17  ;;  %v9357_v26 = vadd.f32 %v4888_v40, %v9105_v55  ;;  %v4329_v55 = vpop.permute.xlu0 %4328 }
0x181c   :  { %v7706_v31 = vpop.f32.mrf.mxu1 }
0x181d   :  { %v9352_v7 = vadd.f32 %v7706_v31, %v9894_v10  ;;  %9896 = vst [vmem:[#allocation27_spill] sm:$0xff] %v9357_v26 }
0x181e   :  { %v4891_v62 = vpop.f32.mrf.mxu1 }
0x181f   :  { %9895 = vst [vmem:[#allocation25_spill] sm:$0xff] %v9352_v7  ;;  %v9362_v43 = vadd.f32 %v4891_v62, %v9103_v19 }
0x1820   :  { %v7709_v63 = vpop.f32.mrf.mxu1 }
0x1821   :  { %9897 = vst [vmem:[#allocation33_spill] sm:$0xff] %v9362_v43  ;;  %v9368_v18 = vadd.f32 %v7709_v63, %v4339_v27 }
0x1822   :  { %v4904_v10 = vpop.f32.mrf.mxu1 }
0x1823   :  { %9898 = vst [vmem:[#allocation34_spill] sm:$0xff] %v9368_v18  ;;  %v9372_v24 = vadd.f32 %v4904_v10, %v4329_v55 }
0x1824   :  { %v7710_v31 = vpop.f32.mrf.mxu1 }
0x1825   :  { %v9370_v23 = vadd.f32 %v7710_v31, %v4344_v15  ;;  %9899 = vst [vmem:[#allocation50_spill] sm:$0xff] %v9372_v24 }
0x1826   :  { %v4907_v40 = vpop.f32.mrf.mxu1 }
0x1827   :  { %v9376_v62 = vadd.f32 %v4907_v40, %v4334_v28 }
0x1828   :  { %v7713_v29 = vpop.f32.mrf.mxu1 }
0x1829   :  { %9900 = vst [vmem:[#allocation49_spill] sm:$0xff] %v9376_v62  ;;  %v9381_v63 = vadd.f32 %v7713_v29, %v9290_v59 }
0x182a   :  { %v4920_v11 = vpop.f32.mrf.mxu1 }
0x182b   :  { %v9386_v10 = vadd.f32 %v4920_v11, %v4349_v53 }
0x182c   :  { %v7714_v56 = vpop.f32.mrf.mxu1 }
0x182d   :  { %v9384_v15 = vadd.f32 %v7714_v56, %v9286_v46 }
0x182e   :  { %v4923_v27 = vpop.f32.mrf.mxu1 }
0x182f   :  { %v9390_v28 = vadd.f32 %v4923_v27, %v4354_v3 }
0x1830   :  { %v7717_v55 = vpop.f32.mrf.mxu1 }
0x1832   :  { %v4936_v21 = vpop.f32.mrf.mxu1 }
0x1834   :  { %v7718_v19 = vpop.f32.mrf.mxu1 }
0x1836   :  { %v4939_v34 = vpop.f32.mrf.mxu1 }
0x1838   :  { %v7721_v59 = vpop.f32.mrf.mxu1 }
0x1839   :  { %v4961_v0 = vadd.f32 %v7721_v59, %v9156_v44  ;;  %v8089_v59 = vld [vmem:[%s9399_s6] sm:$0xff]  }
0x183a   :  { %v4952_v29 = vpop.f32.mrf.mxu1 }
0x183c   :  { %v7722_v39 = vpop.f32.mrf.mxu1 }
0x183d   :  { %v4964_v4 = vadd.f32 %v7722_v39, %v9154_v60  ;;  %v4953_v60 = vadd.f32 %v4952_v29, %v9175_v38  ;;  %v9903_v39 = vld [vmem:[#allocation34_spill] sm:$0xff]  ;;  %v9913_v29 = vld [vmem:[#allocation36_spill] sm:$0xff] }
0x183e   :  { %v4955_v46 = vpop.f32.mrf.mxu1 }
0x183f   :  { %v5513_v52 = vpack.c.bf16 %v4964_v4, %v4961_v0  ;;  %v4956_v24 = vadd.f32 %v4955_v46, %v9173_v50  ;;  %v9906_v0 = vld [vmem:[#allocation50_spill] sm:$0xff]  ;;  %v8104_v4 = vld [vmem:[%s9430_s10 + $0x2c] ss:$16 sps:$4 sm:$0xff]   ;;  %v9914_v46 = vld [vmem:[#allocation8_spill] sm:$0xff] }
0x1840   :  { %v7725_v56 = vpop.f32.mrf.mxu1 }
0x1841   :  { %v5512_v44 = vpack.c.bf16 %v4956_v24, %v4953_v60  ;;  %v9901_v24 = vpack.c.bf16 %v9384_v15, %v9381_v63  ;;  %v9910_v63 = vld [vmem:[#allocation29_spill] sm:$0xff] }
0x1842   :  { %v9394_v22 = vpop.f32.mrf.mxu1  ;;  %v9917_v60 = vld [vmem:[#allocation9_spill] sm:$0xff] }
0x1844   :  { %v7726_v11 = vpop.f32.mrf.mxu1 }
0x1846   :  { %v4971_v53 = vpop.f32.mrf.mxu1 }
0x1848   :  { %v7729_v32 = vpop.f32.mrf.mxu1 }
0x184a   :  { %v4984_v31 = vpop.f32.mrf.mxu1 }
0x184c   :  { %v7730_v3 = vpop.f32.mrf.mxu1 }
0x184d   :  { %v4996_v38 = vadd.f32 %v7730_v3, %v9268_v25  ;;  %v8096_v25 = vld [vmem:[%s9430_s10 + $0x8] ss:$16 sps:$4 sm:$0xff]   ;;  %v9915_v3 = vld [vmem:[#allocation16_spill] sm:$0xff] }
0x184e   :  { %v4987_v27 = vpop.f32.mrf.mxu1 }
0x1850   :  { %v7733_v40 = vpop.f32.mrf.mxu1 }
0x1852   :  { %v5000_v47 = vpop.f32.mrf.mxu1 }
0x1853   :  { %v5001_v50 = vadd.f32 %v5000_v47, %v9199_v51  ;;  %v4985_v51 = vadd.f32 %v4984_v31, %v9308_v20  ;;  %v8102_v20 = vld [vmem:[%s9430_s10 + $0x28] ss:$16 sps:$4 sm:$0xff]  }
0x1854   :  { %v7734_v41 = vpop.f32.mrf.mxu1 }
0x1855   :  { %v5012_v62 = vadd.f32 %v7734_v41, %v9185_v36  ;;  %v4972_v41 = vadd.f32 %v4971_v53, %v9354_v1 }
0x1856   :  { %v5003_v57 = vpop.f32.mrf.mxu1 }
0x1858   :  { %v7737_v58 = vpop.f32.mrf.mxu1 }
0x1859   :  { %v5025_v43 = vadd.f32 %v7737_v58, %v9149_v13  ;;  %v4948_v13 = vadd.f32 %v7718_v19, %v9189_v8  ;;  %v4993_v8 = vadd.f32 %v7729_v32, %v9270_v37  ;;  %v8098_v37 = vld [vmem:[%s9430_s10 + $0xc] ss:$16 sps:$4 sm:$0xff]   ;;  %v5292_v58 = vpop.f32.mrf.mxu0  ;;  %v9909_v19 = vld [vmem:[#allocation30_spill] sm:$0xff] }
0x185a   :  { %v5016_v61 = vpop.f32.mrf.mxu1  ;;  %5804 = vmatprep.mubr.bf16.mxu1 %v8098_v37  ;;  %v8110_v32 = vld [vmem:[%s9430_s10 + $0x4c] ss:$16 sps:$4 sm:$0xff]   ;;  %v9943_v37 = vld [vmem:[#allocation46_spill] sm:$0xff] }
0x185b   :  { %v5017_v7 = vadd.f32 %v5016_v61, %v9171_v42 }
0x185c   :  { %v7738_v26 = vpop.f32.mrf.mxu1 }
0x185d   :  { %v5028_v54 = vadd.f32 %v7738_v26, %v9147_v14  ;;  %v5009_v14 = vadd.f32 %v7733_v40, %v9187_v30  ;;  %v4937_v30 = vadd.f32 %v4936_v21, %v9203_v35  ;;  %v4977_v35 = vadd.f32 %v7725_v56, %v9330_v2  ;;  %v8116_v2 = vld [vmem:[%s9430_s10 + $0x6c] ss:$16 sps:$4 sm:$0xff]  }
0x185e   :  { %v5019_v17 = vpop.f32.mrf.mxu1  ;;  %v5290_v56 = vadd.f32 %v9914_v46, %v9913_v29  ;;  %v8101_v46 = vld [vmem:[%s9430_s10 + $0x24] ss:$16 sps:$4 sm:$0xff]  }
0x185f   :  { %v5521_v48 = vpack.c.bf16 %v5028_v54, %v5025_v43  ;;  %v5020_v9 = vadd.f32 %v5019_v17, %v9169_v45  ;;  %v5519_v42 = vpack.c.bf16 %v5012_v62, %v5009_v14  ;;  %v5004_v43 = vadd.f32 %v5003_v57, %v9197_v6  ;;  %v9905_v54 = vld [vmem:[#allocation49_spill] sm:$0xff]  ;;  %v9918_v14 = vld [vmem:[#allocation3_spill] sm:$0xff] }
0x1860   :  { %v4945_v45 = vadd.f32 %v7717_v55, %v9191_v16  ;;  %v5517_v6 = vpack.c.bf16 %v4996_v38, %v4993_v8  ;;  %v4988_v16 = vadd.f32 %v4987_v27, %v9298_v12  ;;  %v4969_v57 = vadd.f32 %v9394_v22, %v9364_v5  ;;  %v9916_v27 = vld [vmem:[#allocation5_spill] sm:$0xff]  ;;  %v9925_v38 = vld [vmem:[#allocation48_spill] sm:$0xff] }
0x1861   :  { %v5520_v18 = vpack.c.bf16 %v5020_v9, %v5017_v7  ;;  %7499 = vmatprep.subr.bf16.mxu1 %v5521_v48  ;;  %v4940_v48 = vadd.f32 %v4939_v34, %v9201_v33  ;;  %v4980_v9 = vadd.f32 %v7726_v11, %v9328_v49  ;;  %v9902_v34 = vpack.c.bf16 %v9390_v28, %v9386_v10  ;;  %v8108_v49 = vld [vmem:[%s9430_s10 + $0x48] ss:$16 sps:$4 sm:$0xff]   ;;  %v9912_v28 = vld [vmem:[#allocation32_spill] sm:$0xff] }
0x1862   :  { %7500 = vmatpush3.bf16.msra.mxu1 %v5513_v52  ;;  %v5511_v36 = vpack.c.bf16 %v4948_v13, %v4945_v45  ;;  %v5518_v52 = vpack.c.bf16 %v5004_v43, %v5001_v50  ;;  %v5516_v33 = vpack.c.bf16 %v4988_v16, %v4985_v51  ;;  %v5514_v1 = vpack.c.bf16 %v4972_v41, %v4969_v57  ;;  %v9908_v7 = vld [vmem:[#allocation31_spill] sm:$0xff]  ;;  %v9919_v13 = vld [vmem:[#allocation6_spill] sm:$0xff]  ;;  %v8091_v45 = vld [vmem:[%s9399_s6 + $0x10] sm:$0xff]  }
0x1863   :  { %7501 = vmatprep.subr.bf16.mxu1 %v5520_v18  ;;  %v5510_v18 = vpack.c.bf16 %v4940_v48, %v4937_v30  ;;  %v5515_v47 = vpack.c.bf16 %v4980_v9, %v4977_v35  ;;  %v9904_v12 = vpack.c.bf16 %v9370_v23, %v9903_v39  ;;  %v9907_v61 = vpack.c.bf16 %v9905_v54, %v9906_v0  ;;  %v8114_v23 = vld [vmem:[%s9430_s10 + $0x68] ss:$16 sps:$4 sm:$0xff]   ;;  %v9931_v51 = vld [vmem:[#allocation42_spill] sm:$0xff] }
0x1864   :  { %v9911_v10 = vld [vmem:[#allocation35_spill] sm:$0xff]  ;;  %v9922_v50 = vld [vmem:[#allocation25_spill] sm:$0xff]  ;;  %v9938_v57 = vld [vmem:[#allocation18_spill] sm:$0xff] }
0x1865   :  { %v5293_v31 = vadd.f32 %v5292_v58, %v9911_v10  ;;  %v8090_v43 = vld [vmem:[%s9399_s6 + $0x8] sm:$0xff]   ;;  %v9928_v8 = vld [vmem:[#allocation33_spill] sm:$0xff]  ;;  %v9940_v39 = vld [vmem:[#allocation26_spill] sm:$0xff] }
0x1866   :  { %7502 = vmatpush3.bf16.msra.mxu1 %v5512_v44  ;;  %v9920_v44 = vld [vmem:[#allocation2_spill] sm:$0xff]  ;;  %v8092_v16 = vld [vmem:[%s9399_s6 + $0x18] sm:$0xff]   ;;  %v9932_v9 = vld [vmem:[#allocation47_spill] sm:$0xff] }
0x1867   :  { %7503 = vmatprep.subr.bf16.mxu1 %v5519_v42  ;;  %v5536_v53 = vpack.c.bf16 %v5293_v31, %v5290_v56  ;;  %v9921_v42 = vld [vmem:[#allocation4_spill] sm:$0xff]  ;;  %v9934_v35 = vld [vmem:[#allocation21_spill] sm:$0xff]  ;;  %v9953_v58 = vld [vmem:[#allocation39_spill] sm:$0xff] }
0x1868   :  { %v9944_v54 = vld [vmem:[#allocation17_spill] sm:$0xff]  ;;  %v9964_v10 = vld [vmem:[#allocation38_spill] sm:$0xff]  ;;  %v9965_v31 = vld [vmem:[#allocation43_spill] sm:$0xff] }
0x1869   :  { %v9945_v0 = vpack.c.bf16 %v9943_v37, %v9944_v54  ;;  %v8099_v56 = vld [vmem:[%s9430_s10 + $0x20] ss:$16 sps:$4 sm:$0xff]  }
0x186a   :  { %7504 = vmatpush3.bf16.msra.mxu1 %v5511_v36  ;;  %v9923_v36 = vld [vmem:[#allocation28_spill] sm:$0xff] }
0x186b   :  { %7505 = vmatprep.subr.bf16.mxu1 %v5518_v52  ;;  %v9924_v48 = vpack.c.bf16 %v9922_v50, %v9923_v36  ;;  %v9926_v52 = vld [vmem:[#allocation45_spill] sm:$0xff] }
0x186c   :  { %v9927_v30 = vpack.c.bf16 %v9925_v38, %v9926_v52 }
0x186e   :  { %7506 = vmatpush3.bf16.msra.mxu1 %v5510_v18  ;;  %v9929_v18 = vld [vmem:[#allocation27_spill] sm:$0xff] }
0x186f   :  { %7507 = vmatprep.subr.bf16.mxu1 %v5517_v6  ;;  %v9930_v6 = vpack.c.bf16 %v9928_v8, %v9929_v18  ;;  %v8119_v8 = vld [vmem:[%s9533_s14 + $0x10] sm:$0xff]   ;;  %v8120_v18 = vld [vmem:[%s9533_s14 + $0x18] sm:$0xff]  }
0x1872   :  { %7508 = vmatpush3.bf16.msra.mxu1 %v9901_v24  ;;  %v8095_v24 = vld [vmem:[%s9430_s10 + $0x4] ss:$16 sps:$4 sm:$0xff]  }
0x1873   :  { %7509 = vmatprep.subr.bf16.mxu1 %v5516_v33  ;;  %v9933_v33 = vpack.c.bf16 %v9931_v51, %v9932_v9  ;;  %v8128_v51 = vld [vmem:[%s9543_s18] sm:$0xff]   ;;  %v9565_v9 = vld [vmem:[%s9561_s22 + $0x8] sm:$0xff]  }
0x1876   :  { %7510 = vmatpush3.bf16.msra.mxu1 %v9902_v34  ;;  %v9937_v34 = vld [vmem:[#allocation19_spill] sm:$0xff] }
0x1877   :  { %7511 = vmatprep.subr.bf16.mxu1 %v5515_v47  ;;  %v9935_v47 = vld [vmem:[#allocation24_spill] sm:$0xff] }
0x1878   :  { %v9936_v41 = vpack.c.bf16 %v9934_v35, %v9935_v47 }
0x187a   :  { %7512 = vmatpush3.bf16.msra.mxu1 %v9904_v12  ;;  %v9941_v12 = vld [vmem:[#allocation23_spill] sm:$0xff] }
0x187b   :  { %7513 = vmatprep.subr.bf16.mxu1 %v5514_v1  ;;  %v9939_v1 = vpack.c.bf16 %v9937_v34, %v9938_v57 }
0x187e   :  { %7514 = vmatpush3.bf16.msra.mxu1 %v9907_v61  ;;  %v9946_v61 = vld [vmem:[#allocation40_spill] sm:$0xff] }
0x1881   :  { %5805 = vmatmul.mubr.bf16.vlgmr.msra.gmra.mxu1 %v8096_v25  ;;  %v9942_v25 = vpack.c.bf16 %v9940_v39, %v9941_v12 }
0x1882   :  { %5812 = vmatprep.mubr.bf16.mxu1 %v8104_v4  ;;  %v9947_v4 = vld [vmem:[#allocation37_spill] sm:$0xff] }
0x1889   :  { %5813 = vmatmul.mubr.bf16.gmra.mxu1 %v8102_v20  ;;  %v9948_v20 = vpack.c.bf16 %v9946_v61, %v9947_v4 }
0x188a   :  { %5820 = vmatprep.mubr.bf16.mxu1 %v8110_v32  ;;  %v9949_v32 = vld [vmem:[#allocation15_spill] sm:$0xff] }
0x1891   :  { %5821 = vmatmul.mubr.bf16.gmra.mxu1 %v8108_v49  ;;  %v9950_v49 = vld [vmem:[#allocation14_spill] sm:$0xff] }
0x1892   :  { %5828 = vmatprep.mubr.bf16.mxu1 %v8116_v2  ;;  %v9951_v2 = vpack.c.bf16 %v9949_v32, %v9950_v49 }
0x1899   :  { %5829 = vmatmul.mubr.bf16.gmra.mxu1 %v8114_v23  ;;  %v9952_v23 = vld [vmem:[#allocation22_spill] sm:$0xff] }
0x18ab   :  { %v7769_v22 = vpop.f32.mrf.mxu0 }
0x18ac   :  { %v5393_v55 = vadd.f32 %v7769_v22, %v9912_v28  ;;  %v9954_v22 = vpack.c.bf16 %v9952_v23, %v9953_v58  ;;  %v9966_v28 = vpack.c.bf16 %v9964_v10, %v9965_v31 }
0x18ad   :  { %v5384_v5 = vpop.f32.mrf.mxu0 }
0x18ae   :  { %v5385_v62 = vadd.f32 %v5384_v5, %v9909_v19  ;;  %v9955_v5 = vld [vmem:[#allocation20_spill] sm:$0xff] }
0x18af   :  { %v7770_v17 = vpop.f32.mrf.mxu0 }
0x18b0   :  { %v5396_v26 = vadd.f32 %v7770_v17, %v9908_v7  ;;  %v9956_v17 = vld [vmem:[#allocation13_spill] sm:$0xff] }
0x18b1   :  { %v5387_v21 = vpop.f32.mrf.mxu0  ;;  %v9957_v7 = vpack.c.bf16 %v9955_v5, %v9956_v17 }
0x18b2   :  { %v5388_v15 = vadd.f32 %v5387_v21, %v9910_v63  ;;  %v5400_v11 = vpack.c.bf16 %v5396_v26, %v5393_v55  ;;  %v9958_v26 = vld [vmem:[#allocation44_spill] sm:$0xff]  ;;  %v9959_v21 = vld [vmem:[#allocation41_spill] sm:$0xff]  ;;  %v9962_v63 = vld [vmem:[#allocation10_spill] sm:$0xff] }
0x18b3   :  { %v9960_v19 = vpack.c.bf16 %v9958_v26, %v9959_v21  ;;  %v8093_v55 = vld [vmem:[%s9430_s10] ss:$16 sps:$4 sm:$0xff]  }
0x18b4   :  { %v5399_v40 = vpack.c.bf16 %v5388_v15, %v5385_v62  ;;  %v9961_v62 = vld [vmem:[#allocation7_spill] sm:$0xff] }
0x18b5   :  { %v9963_v15 = vpack.c.bf16 %v9961_v62, %v9962_v63 }
0x18b6   :  { %7775 = vmatprep.mubr.msk.bf16.mxu0 %vm3466_vm4, %v5399_v40  ;;  %v9967_v40 = vld [vmem:[#allocation12_spill] sm:$0xff] }
0x18b7   :  { %7776 = vmatmul.mubr.msk.bf16.vlgmr.msra.gmra.mxu0 %vm3466_vm4, %v5400_v11  ;;  %v8107_v11 = vld [vmem:[%s9430_s10 + $0x44] ss:$16 sps:$4 sm:$0xff]  }
0x18b8   :  { %7780 = vmatpush3.bf16.msra.mxu0 %v9915_v3  ;;  %7795 = vmatprep.mubr.bf16.mxu0 %v8089_v59  ;;  %v9968_v59 = vld [vmem:[#allocation11_spill] sm:$0xff]  ;;  %v8113_v3 = vld [vmem:[%s9430_s10 + $0x64] ss:$16 sps:$4 sm:$0xff]  }
0x18b9   :  { %7781 = vmatprep.subr.bf16.mxu0 %v5536_v53  ;;  %v9969_v29 = vpack.c.bf16 %v9967_v40, %v9968_v59  ;;  %v5961_v40 = vpop.permute.xlu0 %5960 }
0x18bc   :  { %7782 = vmatpush3.bf16.msra.mxu0 %v5536_v53  ;;  %v8105_v53 = vld [vmem:[%s9430_s10 + $0x40] ss:$16 sps:$4 sm:$0xff]  }
0x18bd   :  { %7783 = vmatprep.subr.bf16.mxu0 %v9916_v27 }
0x18c0   :  { %7784 = vmatpush3.bf16.msra.mxu0 %v9916_v27  ;;  %v8111_v27 = vld [vmem:[%s9430_s10 + $0x60] ss:$16 sps:$4 sm:$0xff]  }
0x18c1   :  { %7785 = vmatprep.subr.bf16.mxu0 %v9917_v60 }
0x18c4   :  { %7786 = vmatpush3.bf16.msra.mxu0 %v9917_v60  ;;  %v8117_v60 = vld [vmem:[%s9533_s14] sm:$0xff]  }
0x18c5   :  { %7787 = vmatprep.subr.bf16.mxu0 %v9918_v14 }
0x18c8   :  { %7788 = vmatpush3.bf16.msra.mxu0 %v9918_v14  ;;  %v8121_v14 = vld [vmem:[%s9543_s18 + $0x38] sm:$0xff]  }
0x18c9   :  { %7789 = vmatprep.subr.bf16.mxu0 %v9919_v13  ;;  %7815 = vmatprep.subr.bf16.mxu1 %v8121_v14 }
0x18ca   :  { %7816 = vmatpush3.bf16.msra.mxu1 %v8121_v14 }
0x18cc   :  { %7790 = vmatpush3.bf16.msra.mxu0 %v9919_v13  ;;  %v8122_v13 = vld [vmem:[%s9543_s18 + $0x30] sm:$0xff]  }
0x18cd   :  { %7791 = vmatprep.subr.bf16.mxu0 %v9920_v44  ;;  %7817 = vmatprep.subr.bf16.mxu1 %v8122_v13 }
0x18ce   :  { %7818 = vmatpush3.bf16.msra.mxu1 %v8122_v13 }
0x18d0   :  { %7792 = vmatpush3.bf16.msra.mxu0 %v9920_v44  ;;  %v8123_v44 = vld [vmem:[%s9543_s18 + $0x28] sm:$0xff]  }
0x18d1   :  { %7793 = vmatprep.subr.bf16.mxu0 %v9921_v42  ;;  %7819 = vmatprep.subr.bf16.mxu1 %v8123_v44 }
0x18d2   :  { %7820 = vmatpush3.bf16.msra.mxu1 %v8123_v44 }
0x18d4   :  { %7794 = vmatpush3.bf16.msra.mxu0 %v9921_v42  ;;  %v8124_v42 = vld [vmem:[%s9543_s18 + $0x20] sm:$0xff]  }
0x18d5   :  { %7459 = vmatprep.subr.bf16.mxu0 %v9924_v48  ;;  %7821 = vmatprep.subr.bf16.mxu1 %v8124_v42 }
0x18d6   :  { %7822 = vmatpush3.bf16.msra.mxu1 %v8124_v42 }
0x18d7   :  { %7796 = vmatmul.mubr.bf16.vlgmr.msra.gmra.mxu0 %v8090_v43  ;;  %v8125_v43 = vld [vmem:[%s9543_s18 + $0x18] sm:$0xff]  }
0x18d8   :  { %7460 = vmatpush3.bf16.msra.mxu0 %v9927_v30  ;;  %7799 = vmatprep.mubr.bf16.mxu0 %v8091_v45  ;;  %v8118_v30 = vld [vmem:[%s9533_s14 + $0x8] sm:$0xff]  }
0x18d9   :  { %7461 = vmatprep.subr.bf16.mxu0 %v9930_v6  ;;  %7823 = vmatprep.subr.bf16.mxu1 %v8125_v43  ;;  %v8126_v6 = vld [vmem:[%s9543_s18 + $0x10] sm:$0xff]  }
0x18da   :  { %7824 = vmatpush3.bf16.msra.mxu1 %v8125_v43 }
0x18db   :  { %7825 = vmatprep.subr.bf16.mxu1 %v8126_v6 }
0x18dc   :  { %7462 = vmatpush3.bf16.msra.mxu0 %v9933_v33 }
0x18dd   :  { %7463 = vmatprep.subr.bf16.mxu0 %v9936_v41 }
0x18de   :  { %7826 = vmatpush3.bf16.msra.mxu1 %v8126_v6 }
0x18df   :  { %7800 = vmatmul.mubr.bf16.gmra.mxu0 %v8092_v16  ;;  %v8127_v16 = vld [vmem:[%s9543_s18 + $0x8] sm:$0xff]  }
0x18e0   :  { %7464 = vmatpush3.bf16.msra.mxu0 %v9939_v1  ;;  %5739 = vmatprep.mubr.bf16.mxu0 %v8095_v24 }
0x18e1   :  { %7465 = vmatprep.subr.bf16.mxu0 %v9942_v25  ;;  %7827 = vmatprep.subr.bf16.mxu1 %v8127_v16 }
0x18e2   :  { %7828 = vmatpush3.bf16.msra.mxu1 %v8127_v16 }
0x18e3   :  { %7829 = vmatprep.subr.bf16.mxu1 %v8128_v51 }
0x18e4   :  { %7466 = vmatpush3.bf16.msra.mxu0 %v9945_v0 }
0x18e5   :  { %7467 = vmatprep.subr.bf16.mxu0 %v9948_v20 }
0x18e6   :  { %7830 = vmatpush3.bf16.msra.mxu1 %v8128_v51 }
0x18e7   :  { %7855 = vmatprep.subr.bf16.mxu1 %v9565_v9 }
0x18e8   :  { %7468 = vmatpush3.bf16.msra.mxu0 %v9951_v2 }
0x18e9   :  { %7469 = vmatprep.subr.bf16.mxu0 %v9954_v22 }
0x18ec   :  { %7470 = vmatpush3.bf16.msra.mxu0 %v9957_v7 }
0x18ed   :  { %7471 = vmatprep.subr.bf16.mxu0 %v9960_v19 }
0x18f0   :  { %7472 = vmatpush3.bf16.msra.mxu0 %v9963_v15 }
0x18f1   :  { %7473 = vmatprep.subr.bf16.mxu0 %v9966_v28 }
0x18f4   :  { %7474 = vmatpush3.bf16.msra.mxu0 %v9969_v29 }
0x18f7   :  { %5740 = vmatmul.mubr.bf16.vlgmr.msra.gmra.mxu0 %v8093_v55 }
0x18f8   :  { %5747 = vmatprep.mubr.bf16.mxu0 %v8101_v46 }
0x18ff   :  { %5748 = vmatmul.mubr.bf16.gmra.mxu0 %v8099_v56 }
0x1900   :  { %5755 = vmatprep.mubr.bf16.mxu0 %v8107_v11  ;;  %v5966_v11 = vpop.permute.xlu1 %5965 }
0x1907   :  { %5756 = vmatmul.mubr.bf16.gmra.mxu0 %v8105_v53 }
0x1908   :  { %5763 = vmatprep.mubr.bf16.mxu0 %v8113_v3 }
0x190f   :  { %5764 = vmatmul.mubr.bf16.gmra.mxu0 %v8111_v27 }
0x1910   :  { %7807 = vmatprep.mubr.msk.bf16.mxu0 %vm3466_vm4, %v8117_v60 }
0x1941   :  { %v7515_v25 = vpop.f32.mrf.mxu1 }
0x1943   :  { %v7516_v54 = vpop.f32.mrf.mxu1 }
0x1944   :  { %v7517_v3 = vadd.f32 %v7516_v54, %v7515_v25 }
0x1945   :  { %v7518_v61 = vpop.f32.mrf.mxu1 }
0x1947   :  { %v7519_v20 = vpop.f32.mrf.mxu1 }
0x1949   :  { %v7521_v49 = vpop.f32.mrf.mxu1 }
0x194b   :  { %v7522_v23 = vpop.f32.mrf.mxu1 }
0x194c   :  { %v7523_v14 = vadd.f32 %v7522_v23, %v7521_v49 }
0x194d   :  { %v7524_v22 = vpop.f32.mrf.mxu1 }
0x194f   :  { %v7525_v17 = vpop.f32.mrf.mxu1 }
0x1950   :  { %v7526_v43 = vadd.f32 %v7525_v17, %v7524_v22 }
0x1951   :  { %v7527_v26 = vpop.f32.mrf.mxu1 }
0x1953   :  { %v7528_v19 = vpop.f32.mrf.mxu1 }
0x1954   :  { %v7529_v25 = vadd.f32 %v7528_v19, %v7527_v26 }
0x1955   :  { %v7530_v63 = vpop.f32.mrf.mxu1 }
0x1957   :  { %v7531_v10 = vpop.f32.mrf.mxu1 }
0x1959   :  { %v7533_v28 = vpop.f32.mrf.mxu1 }
0x195b   :  { %v7534_v56 = vpop.f32.mrf.mxu1 }
0x195c   :  { %v7535_v6 = vadd.f32 %v7534_v56, %v7533_v28 }
0x1977   :  { %v7777_v45 = vpop.f32.mrf.mxu0 }
0x1979   :  { %v5457_v50 = vpop.f32.mrf.mxu0 }
0x197b   :  { %v7778_v36 = vpop.f32.mrf.mxu0 }
0x197c   :  { %v5473_v48 = vpack.c.bf16 %v7778_v36, %v7777_v45  ;;  %v7536_v45 = vpop.f32.mrf.mxu1 }
0x197d   :  { %v5460_v38 = vpop.f32.mrf.mxu0 }
0x197e   :  { %v5472_v52 = vpack.c.bf16 %v5460_v38, %v5457_v50  ;;  %7803 = vmatprep.subr.bf16.mxu0 %v5473_v48  ;;  %v5971_v50 = vpop.permute.xlu0 %5970  ;;  %v7520_v38 = vadd.f32 %v7519_v20, %v7518_v61 }
0x197f   :  { %7804 = vmatpush3.bf16.msra.mxu0 %v5473_v48 }
0x1980   :  { %7805 = vmatprep.subr.bf16.mxu0 %v5472_v52 }
0x1982   :  { %v5981_v61 = vpop.permute.xlu0 %5980 }
0x1983   :  { %7806 = vmatpush3.bf16.msra.mxu0 %v5472_v52 }
0x1986   :  { %7808 = vmatmul.mubr.msk.bf16.vlgmr.msra.gmra.mxu0 %vm3466_vm4, %v8118_v30 }
0x1987   :  { %7811 = vmatprep.mubr.msk.bf16.mxu0 %vm3466_vm4, %v8119_v8  ;;  %v5976_v8 = vpop.permute.xlu1 %5975 }
0x198b   :  { %v5986_v22 = vpop.permute.xlu1 %5985 }
0x198e   :  { %7812 = vmatmul.mubr.msk.bf16.gmra.mxu0 %vm3466_vm4, %v8120_v18 }
0x1997   :  { %v7797_v33 = vpop.f32.mrf.mxu0 }
0x1999   :  { %v5596_v24 = vpop.f32.mrf.mxu0 }
0x199b   :  { %v7798_v35 = vpop.f32.mrf.mxu0 }
0x199d   :  { %v5599_v47 = vpop.f32.mrf.mxu0 }
0x199f   :  { %v7801_v41 = vpop.f32.mrf.mxu0 }
0x19a1   :  { %v9568_v34 = vpop.f32.mrf.mxu0 }
0x19a3   :  { %v9570_v57 = vpop.f32.mrf.mxu0 }
0x19a5   :  { %v9572_v1 = vpop.f32.mrf.mxu0 }
0x19b7   :  { %v7475_v39 = vpop.f32.mrf.mxu0 }
0x19b9   :  { %v7476_v12 = vpop.f32.mrf.mxu0 }
0x19ba   :  { %v7477_v55 = vadd.f32 %v7476_v12, %v7475_v39  ;;  %v7537_v39 = vpop.f32.mrf.mxu1 }
0x19bb   :  { %v7478_v37 = vpop.f32.mrf.mxu0  ;;  %v7538_v20 = vadd.f32 %v7537_v39, %v7536_v45 }
0x19bc   :  { %v5742_v53 = vadd.f32 %v7477_v55, %v5596_v24 }
0x19bd   :  { %v7479_v0 = vpop.f32.mrf.mxu0 }
0x19be   :  { %v7480_v27 = vadd.f32 %v7479_v0, %v7478_v37  ;;  %v5807_v30 = vadd.f32 %v7517_v3, %v5742_v53  ;;  %v5996_v53 = vpop.permute.xlu1 %5995  ;;  %v8130_v3 = vld [vmem:[%s9561_s22] sm:$0xff]  }
0x19bf   :  { %v7481_v4 = vpop.f32.mrf.mxu0 }
0x19c0   :  { %v5745_v48 = vadd.f32 %v7480_v27, %v5599_v47 }
0x19c1   :  { %v7482_v32 = vpop.f32.mrf.mxu0 }
0x19c2   :  { %v7483_v59 = vadd.f32 %v7482_v32, %v7481_v4  ;;  %v5810_v47 = vadd.f32 %v7520_v38, %v5745_v48 }
0x19c3   :  { %v7484_v2 = vpop.f32.mrf.mxu0 }
0x19c4   :  { %v5750_v60 = vadd.f32 %v7797_v33, %v7483_v59 }
0x19c5   :  { %v7485_v58 = vpop.f32.mrf.mxu0 }
0x19c6   :  { %v7486_v46 = vadd.f32 %v7485_v58, %v7484_v2  ;;  %v5815_v16 = vadd.f32 %v7523_v14, %v5750_v60 }
0x19c7   :  { %v7487_v5 = vpop.f32.mrf.mxu0 }
0x19c8   :  { %v5753_v42 = vadd.f32 %v7798_v35, %v7486_v46 }
0x19c9   :  { %v7488_v7 = vpop.f32.mrf.mxu0 }
0x19ca   :  { %v7489_v52 = vadd.f32 %v7488_v7, %v7487_v5  ;;  %v5818_v12 = vadd.f32 %v7526_v43, %v5753_v42  ;;  %v7532_v5 = vadd.f32 %v7531_v10, %v7530_v63 }
0x19cb   :  { %v7490_v21 = vpop.f32.mrf.mxu0 }
0x19cc   :  { %v5758_v54 = vadd.f32 %v7489_v52, %v9568_v34 }
0x19cd   :  { %v7491_v62 = vpop.f32.mrf.mxu0 }
0x19ce   :  { %v7492_v0 = vadd.f32 %v7491_v62, %v7490_v21  ;;  %v5823_v21 = vadd.f32 %v7529_v25, %v5758_v54  ;;  %v8133_v25 = vld [vmem:[%s6912_s25 + $0x10] sm:$0xff]  }
0x19cf   :  { %v7493_v15 = vpop.f32.mrf.mxu0 }
0x19d0   :  { %v5761_v26 = vadd.f32 %v7492_v0, %v9572_v1 }
0x19d1   :  { %v7494_v31 = vpop.f32.mrf.mxu0 }
0x19d2   :  { %v7495_v13 = vadd.f32 %v7494_v31, %v7493_v15  ;;  %v5826_v63 = vadd.f32 %v7532_v5, %v5761_v26 }
0x19d3   :  { %v7496_v29 = vpop.f32.mrf.mxu0 }
0x19d4   :  { %v5766_v18 = vadd.f32 %v7801_v41, %v7495_v13 }
0x19d5   :  { %v7497_v44 = vpop.f32.mrf.mxu0 }
0x19d6   :  { %v7498_v24 = vadd.f32 %v7497_v44, %v7496_v29  ;;  %v5831_v49 = vadd.f32 %v7535_v6, %v5766_v18 }
0x19d8   :  { %v5769_v41 = vadd.f32 %v9570_v57, %v7498_v24  ;;  %v5991_v57 = vpop.permute.xlu0 %5990 }
0x19da   :  { %v5834_v59 = vadd.f32 %v7538_v20, %v5769_v41 }
0x19dc   :  { %v6170_v54 = vpop.permute.xlu0 %6169 }
0x1a46   :  { %v7809_v36 = vpop.f32.mrf.mxu0 }
0x1a47   :  { %v5944_v37 = vadd.f32 %v7809_v36, %v5815_v16 }
0x1a48   :  { %v5911_v51 = vpop.f32.mrf.mxu0 }
0x1a49   :  { %v5942_v33 = vadd.f32 %v5911_v51, %v5807_v30  ;;  %v6000_v17 = vadd.f32 %v5971_v50, %v5944_v37  ;;  %v8134_v37 = vld [vmem:[%s6912_s25 + $0x18] sm:$0xff]  }
0x1a4a   :  { %v7810_v35 = vpop.f32.mrf.mxu0 }
0x1a4b   :  { %v5945_v4 = vadd.f32 %v7810_v35, %v5818_v12  ;;  %v5998_v2 = vadd.f32 %v5961_v40, %v5942_v33  ;;  %v6008_v40 = vmax.f32 %v6000_v17, 0.0  ;;  %v8132_v12 = vld [vmem:[%s6912_s25 + $0x8] sm:$0xff]   ;;  %v6175_v35 = vpop.permute.xlu1 %6174 }
0x1a4c   :  { %v5914_v32 = vpop.f32.mrf.mxu0 }
0x1a4d   :  { %v6001_v23 = vadd.f32 %v5976_v8, %v5945_v4  ;;  %v5943_v58 = vadd.f32 %v5914_v32, %v5810_v47  ;;  %v6006_v31 = vmax.f32 %v5998_v2, 0.0  ;;  %v6180_v47 = vpop.permute.xlu0 %6179 }
0x1a4e   :  { %v7813_v7 = vpop.f32.mrf.mxu0 }
0x1a4f   :  { %v5999_v19 = vadd.f32 %v5966_v11, %v5943_v58  ;;  %v5948_v34 = vadd.f32 %v7813_v7, %v5831_v49  ;;  %v6009_v62 = vmax.f32 %v6001_v23, 0.0  ;;  %v6185_v0 = vpop.permute.xlu1 %6184 }
0x1a50   :  { %v5927_v15 = vpop.f32.mrf.mxu0 }
0x1a51   :  { %v6007_v28 = vmax.f32 %v5999_v19, 0.0  ;;  %v5946_v55 = vadd.f32 %v5927_v15, %v5823_v21  ;;  %v6004_v46 = vadd.f32 %v5991_v57, %v5948_v34  ;;  %v9579_v1 = vpack.c.bf16 %v6009_v62, %v6008_v40  ;;  %v6190_v58 = vpop.permute.xlu0 %6189 }
0x1a52   :  { %v7814_v29 = vpop.f32.mrf.mxu0 }
0x1a53   :  { %v5949_v56 = vadd.f32 %v7814_v29, %v5834_v59  ;;  %v9577_v10 = vpack.c.bf16 %v6007_v28, %v6006_v31  ;;  %v6002_v27 = vadd.f32 %v5981_v61, %v5946_v55  ;;  %v6012_v13 = vmax.f32 %v6004_v46, 0.0  ;;  %v6195_v41 = vpop.permute.xlu1 %6194 }
0x1a54   :  { %v5930_v11 = vpop.f32.mrf.mxu0 }
0x1a55   :  { %v6005_v60 = vadd.f32 %v5996_v53, %v5949_v56  ;;  %v5947_v14 = vadd.f32 %v5930_v11, %v5826_v63  ;;  %7831 = vmatprep.mubr.bf16.mxu1 %v9577_v10  ;;  %v6010_v43 = vmax.f32 %v6002_v27, 0.0  ;;  %v6200_v28 = vpop.permute.xlu0 %6199 }
0x1a56   :  { %7832 = vmatmul.mubr.bf16.vlgmr.msra.gmra.mxu1 %v9579_v1 }
0x1a57   :  { %v6013_v44 = vmax.f32 %v6005_v60, 0.0  ;;  %v6003_v42 = vadd.f32 %v5986_v22, %v5947_v14  ;;  %7856 = vmatpush3.bf16.msra.mxu1 %v9565_v9  ;;  %v8131_v9 = vld [vmem:[%s6912_s25] sm:$0xff]   ;;  %v6205_v62 = vpop.permute.xlu1 %6204  ;;  %v8136_v60 = vld [vmem:[%s9602_s30 + $0x8] sm:$0x3f]  }
0x1a58   :  { %7857 = vmatprep.subr.bf16.mxu1 %v8130_v3  ;;  %7847 = vmatprep.mubr.msk.bf16.mxu0 %vm3879_vm6, %v8131_v9  ;;  %v8137_v14 = vld [vmem:[%s9634_s4] sm:$0xff]  }
0x1a59   :  { %v6011_v45 = vmax.f32 %v6003_v42, 0.0  ;;  %v9585_v50 = vpack.c.bf16 %v6013_v44, %v6012_v13 }
0x1a5b   :  { %7858 = vmatpush3.bf16.msra.mxu1 %v8130_v3  ;;  %v9587_v36 = vpack.c.bf16 %v6011_v45, %v6010_v43  ;;  %v8135_v3 = vld [vmem:[%s9602_s30] sm:$0xff]  }
0x1a5c   :  { %7883 = vmatprep.subr.bf16.mxu1 %v9585_v50 }
0x1a5d   :  { %7835 = vmatprep.mubr.bf16.mxu1 %v9587_v36 }
0x1a5e   :  { %7836 = vmatmul.mubr.bf16.gmra.mxu1 %v9585_v50 }
0x1b16   :  { %v7833_v48 = vpop.f32.mrf.mxu1 }
0x1b18   :  { %v6116_v38 = vpop.f32.mrf.mxu1 }
0x1b1a   :  { %v7834_v52 = vpop.f32.mrf.mxu1 }
0x1b1b   :  { %v6148_v39 = vpack.c.bf16 %v7834_v52, %v7833_v48 }
0x1b1c   :  { %v6119_v30 = vpop.f32.mrf.mxu1 }
0x1b1d   :  { %v6147_v33 = vpack.c.bf16 %v6119_v30, %v6116_v38 }
0x1b1e   :  { %v7837_v8 = vpop.f32.mrf.mxu1 }
0x1b20   :  { %v6132_v18 = vpop.f32.mrf.mxu1 }
0x1b22   :  { %v7838_v6 = vpop.f32.mrf.mxu1 }
0x1b23   :  { %v6150_v16 = vpack.c.bf16 %v7838_v6, %v7837_v8 }
0x1b24   :  { %v6135_v51 = vpop.f32.mrf.mxu1 }
0x1b25   :  { %v6149_v24 = vpack.c.bf16 %v6135_v51, %v6132_v18  ;;  %7839 = vmatprep.subr.bf16.mxu0 %v6150_v16 }
0x1b26   :  { %7840 = vmatpush3.bf16.msra.mxu0 %v6150_v16 }
0x1b27   :  { %7841 = vmatprep.subr.bf16.mxu0 %v6149_v24 }
0x1b2a   :  { %7842 = vmatpush3.bf16.msra.mxu0 %v6149_v24 }
0x1b2b   :  { %7843 = vmatprep.subr.bf16.mxu0 %v6148_v39 }
0x1b2e   :  { %7844 = vmatpush3.bf16.msra.mxu0 %v6148_v39 }
0x1b2f   :  { %7845 = vmatprep.subr.bf16.mxu0 %v6147_v33 }
0x1b32   :  { %7846 = vmatpush3.bf16.msra.mxu0 %v6147_v33 }
0x1b35   :  { %7848 = vmatmul.mubr.msk.bf16.vlgmr.msra.gmra.mxu0 %vm3879_vm6, %v8132_v12 }
0x1b36   :  { %7851 = vmatprep.mubr.msk.bf16.mxu0 %vm3879_vm6, %v8133_v25 }
0x1b3d   :  { %7852 = vmatmul.mubr.msk.bf16.gmra.mxu0 %vm3879_vm6, %v8134_v37 }
0x1b3e   :  { %7875 = vmatprep.mubr.msk.bf16.mxu0 %vm3879_vm6, %v8137_v14 }
0x1bf5   :  { %v7849_v4 = vpop.f32.mrf.mxu0 }
0x1bf6   :  { %v6282_v2 = vadd.f32 %v7849_v4, %v6180_v47 }
0x1bf7   :  { %v6273_v61 = vpop.f32.mrf.mxu0 }
0x1bf8   :  { %v6274_v32 = vadd.f32 %v6273_v61, %v6170_v54  ;;  %v6306_v19 = vmax.f32 %v6282_v2, 0.0  ;;  %v8141_v2 = vld [vmem:[%s9641_s8] sm:$0xff]  }
0x1bf9   :  { %v7850_v20 = vpop.f32.mrf.mxu0 }
0x1bfa   :  { %v6285_v49 = vadd.f32 %v7850_v20, %v6185_v0  ;;  %v6304_v7 = vmax.f32 %v6274_v32, 0.0  ;;  %v8138_v32 = vld [vmem:[%s9634_s4 + $0x8] sm:$0xff]  }
0x1bfb   :  { %v6276_v23 = vpop.f32.mrf.mxu0 }
0x1bfc   :  { %v6277_v22 = vadd.f32 %v6276_v23, %v6175_v35  ;;  %v6307_v5 = vmax.f32 %v6285_v49, 0.0  ;;  %v8139_v49 = vld [vmem:[%s9634_s4 + $0x10] sm:$0xff]   ;;  %v8142_v23 = vld [vmem:[%s9641_s8 + $0x8] sm:$0x3f]  }
0x1bfd   :  { %v7853_v17 = vpop.f32.mrf.mxu0 }
0x1bfe   :  { %v6305_v26 = vmax.f32 %v6277_v22, 0.0  ;;  %v9606_v15 = vpack.c.bf16 %v6307_v5, %v6306_v19  ;;  %v6298_v57 = vadd.f32 %v7853_v17, %v6200_v28 }
0x1bff   :  { %v6289_v34 = vpop.f32.mrf.mxu0 }
0x1c00   :  { %v9604_v21 = vpack.c.bf16 %v6305_v26, %v6304_v7  ;;  %v6290_v55 = vadd.f32 %v6289_v34, %v6190_v58  ;;  %v6310_v53 = vmax.f32 %v6298_v57, 0.0  ;;  %v8143_v58 = vld [vmem:[%s9683_s16] sm:$0xff]  }
0x1c01   :  { %v7854_v31 = vpop.f32.mrf.mxu0 }
0x1c02   :  { %v6301_v59 = vadd.f32 %v7854_v31, %v6205_v62  ;;  %7859 = vmatprep.mubr.msk.bf16.mxu1 %vm3466_vm4, %v9604_v21  ;;  %v6308_v56 = vmax.f32 %v6290_v55, 0.0 }
0x1c03   :  { %v6292_v40 = vpop.f32.mrf.mxu0  ;;  %7860 = vmatmul.mubr.msk.bf16.vlgmr.msra.gmra.mxu1 %vm3466_vm4, %v9606_v15 }
0x1c04   :  { %v6293_v29 = vadd.f32 %v6292_v40, %v6195_v41  ;;  %7884 = vmatpush3.bf16.msra.mxu1 %v9585_v50  ;;  %v6311_v46 = vmax.f32 %v6301_v59, 0.0  ;;  %v8140_v41 = vld [vmem:[%s9634_s4 + $0x18] sm:$0xff]  }
0x1c05   :  { %7885 = vmatprep.subr.bf16.mxu1 %v9587_v36 }
0x1c06   :  { %v6309_v63 = vmax.f32 %v6293_v29, 0.0  ;;  %v9618_v27 = vpack.c.bf16 %v6311_v46, %v6310_v53 }
0x1c08   :  { %v9614_v11 = vpack.c.bf16 %v6309_v63, %v6308_v56  ;;  %7886 = vmatpush3.bf16.msra.mxu1 %v9587_v36 }
0x1c09   :  { %7887 = vmatprep.subr.bf16.mxu1 %v9579_v1 }
0x1c0a   :  { %7863 = vmatprep.mubr.msk.bf16.mxu1 %vm3466_vm4, %v9614_v11 }
0x1c0b   :  { %7864 = vmatmul.mubr.msk.bf16.gmra.mxu1 %vm3466_vm4, %v9618_v27 }
0x1c0c   :  { %7888 = vmatpush3.bf16.msra.mxu1 %v9579_v1  ;;  %7891 = vmatprep.mubr.msk.bf16.mxu1 %vm3879_vm6, %v8135_v3  ;;  %v9643_v1 = vpop.permute.xlu0 %6461 }
0x1c0d   :  { %7889 = vmatprep.subr.bf16.mxu1 %v9577_v10 }
0x1c10   :  { %7890 = vmatpush3.bf16.msra.mxu1 %v9577_v10  ;;  %v9645_v10 = vpop.permute.xlu1 %6466  ;;  %v9647_v13 = vpop.permute.xlu0 %6451 }
0x1c13   :  { %7892 = vmatmul.mubr.msk.bf16.vlgmr.msra.gmra.mxu1 %vm3879_vm6, %v8136_v60 }
0x1c14   :  { %v9649_v44 = vpop.permute.xlu1 %6456  ;;  %v9651_v42 = vpop.permute.xlu0 %6441  ;;  %7915 = vmatprep.mubr.msk.bf16.mxu1 %vm3879_vm6, %v8143_v58 }
0x1c18   :  { %v9653_v45 = vpop.permute.xlu1 %6446  ;;  %v9655_v36 = vpop.permute.xlu0 %6431 }
0x1c1c   :  { %v9657_v38 = vpop.permute.xlu1 %6436  ;;  %v6585_v30 = vpop.permute.xlu0 %6584 }
0x1c20   :  { %v6590_v16 = vpop.permute.xlu1 %6589  ;;  %v6595_v39 = vpop.permute.xlu0 %6594 }
0x1c24   :  { %v6600_v54 = vpop.permute.xlu1 %6599  ;;  %v6682_v19 = vpop.permute.xlu0 %6681 }
0x1c28   :  { %v6687_v28 = vpop.permute.xlu1 %6686  ;;  %v6692_v46 = vpop.permute.xlu0 %6691 }
0x1cc3   :  { %v7861_v43 = vpop.f32.mrf.mxu1 }
0x1cc5   :  { %v6378_v50 = vpop.f32.mrf.mxu1 }
0x1cc7   :  { %v7862_v9 = vpop.f32.mrf.mxu1 }
0x1cc8   :  { %v6410_v37 = vpack.c.bf16 %v7862_v9, %v7861_v43 }
0x1cc9   :  { %v6381_v48 = vpop.f32.mrf.mxu1 }
0x1cca   :  { %v6409_v61 = vpack.c.bf16 %v6381_v48, %v6378_v50 }
0x1ccb   :  { %v7865_v52 = vpop.f32.mrf.mxu1 }
0x1ccd   :  { %v6394_v8 = vpop.f32.mrf.mxu1 }
0x1ccf   :  { %v7866_v18 = vpop.f32.mrf.mxu1 }
0x1cd0   :  { %v6412_v6 = vpack.c.bf16 %v7866_v18, %v7865_v52  ;;  %v8144_v18 = vld [vmem:[%s9683_s16 + $0x8] sm:$0x3f]  }
0x1cd1   :  { %v6397_v51 = vpop.f32.mrf.mxu1 }
0x1cd2   :  { %v6411_v24 = vpack.c.bf16 %v6397_v51, %v6394_v8  ;;  %7867 = vmatprep.subr.bf16.mxu0 %v6412_v6 }
0x1cd3   :  { %7868 = vmatpush3.bf16.msra.mxu0 %v6412_v6  ;;  %v7893_v33 = vpop.f32.mrf.mxu1 }
0x1cd4   :  { %v6661_v12 = vadd.f32 %v7893_v33, %v6595_v39  ;;  %7869 = vmatprep.subr.bf16.mxu0 %v6411_v24 }
0x1cd5   :  { %v6652_v25 = vpop.f32.mrf.mxu1 }
0x1cd6   :  { %6669 = vst [vmem:[%s6922_s12 + $0x10] sm:$0xff] %v6661_v12  ;;  %v6653_v35 = vadd.f32 %v6652_v25, %v6585_v30 }
0x1cd7   :  { %7870 = vmatpush3.bf16.msra.mxu0 %v6411_v24  ;;  %v7894_v0 = vpop.f32.mrf.mxu1 }
0x1cd8   :  { %6667 = vst [vmem:[%s6922_s12] sm:$0xff] %v6653_v35  ;;  %v6664_v4 = vadd.f32 %v7894_v0, %v6600_v54  ;;  %7871 = vmatprep.subr.bf16.mxu0 %v6410_v37 }
0x1cd9   :  { %v6655_v47 = vpop.f32.mrf.mxu1 }
0x1cda   :  { %6670 = vst [vmem:[%s6922_s12 + $0x18] sm:$0xf] %v6664_v4  ;;  %v6656_v20 = vadd.f32 %v6655_v47, %v6590_v16 }
0x1cdb   :  { %7872 = vmatpush3.bf16.msra.mxu0 %v6410_v37 }
0x1cdc   :  { %6668 = vst [vmem:[%s6922_s12 + $0x8] sm:$0xff] %v6656_v20  ;;  %7873 = vmatprep.subr.bf16.mxu0 %v6409_v61 }
0x1cdf   :  { %7874 = vmatpush3.bf16.msra.mxu0 %v6409_v61 }
0x1ce0   :  { %7895 = vmatprep.subr.bf16.mxu0 %v9618_v27 }
0x1ce2   :  { %7876 = vmatmul.mubr.msk.bf16.vlgmr.msra.gmra.mxu0 %vm3879_vm6, %v8138_v32 }
0x1ce3   :  { %7896 = vmatpush3.bf16.msra.mxu0 %v9618_v27  ;;  %7879 = vmatprep.mubr.msk.bf16.mxu0 %vm3879_vm6, %v8139_v49 }
0x1ce4   :  { %7897 = vmatprep.subr.bf16.mxu0 %v9614_v11 }
0x1ce7   :  { %7898 = vmatpush3.bf16.msra.mxu0 %v9614_v11 }
0x1ce8   :  { %7899 = vmatprep.subr.bf16.mxu0 %v9606_v15 }
0x1cea   :  { %7880 = vmatmul.mubr.msk.bf16.gmra.mxu0 %vm3879_vm6, %v8140_v41 }
0x1ceb   :  { %7900 = vmatpush3.bf16.msra.mxu0 %v9606_v15  ;;  %7903 = vmatprep.mubr.msk.bf16.mxu0 %vm3879_vm6, %v8141_v2 }
0x1cec   :  { %7901 = vmatprep.subr.bf16.mxu0 %v9604_v21 }
0x1cef   :  { %7902 = vmatpush3.bf16.msra.mxu0 %v9604_v21 }
0x1cf2   :  { %7904 = vmatmul.mubr.msk.bf16.vlgmr.msra.gmra.mxu0 %vm3879_vm6, %v8142_v23 }
0x1da2   :  { %v7877_v22 = vpop.f32.mrf.mxu0 }
0x1da3   :  { %v6544_v56 = vadd.f32 %v7877_v22, %v9651_v42 }
0x1da4   :  { %v6535_v5 = vpop.f32.mrf.mxu0 }
0x1da5   :  { %v6568_v42 = vmax.f32 %v6544_v56, 0.0 }
0x1da6   :  { %v7878_v17 = vpop.f32.mrf.mxu0 }
0x1da7   :  { %v6547_v59 = vadd.f32 %v7878_v17, %v9653_v45  ;;  %v6536_v45 = vadd.f32 %v6535_v5, %v9655_v36  ;;  %v6784_v36 = vpop.permute.xlu0 %6783 }
0x1da8   :  { %v6538_v7 = vpop.f32.mrf.mxu0 }
0x1da9   :  { %v6569_v14 = vmax.f32 %v6547_v59, 0.0  ;;  %v6566_v30 = vmax.f32 %v6536_v45, 0.0 }
0x1daa   :  { %v7881_v26 = vpop.f32.mrf.mxu0 }
0x1dab   :  { %v6560_v21 = vadd.f32 %v7881_v26, %v9643_v1  ;;  %v6539_v1 = vadd.f32 %v6538_v7, %v9657_v38  ;;  %v6778_v48 = vpack.c.bf16 %v6569_v14, %v6568_v42  ;;  %v6794_v16 = vpop.permute.xlu0 %6793 }
0x1dac   :  { %v6551_v34 = vpop.f32.mrf.mxu0 }
0x1dad   :  { %v6552_v15 = vadd.f32 %v6551_v34, %v9647_v13  ;;  %v6572_v57 = vmax.f32 %v6560_v21, 0.0  ;;  %v6567_v38 = vmax.f32 %v6539_v1, 0.0 }
0x1dae   :  { %v7882_v62 = vpop.f32.mrf.mxu0 }
0x1daf   :  { %v6563_v31 = vadd.f32 %v7882_v62, %v9645_v10  ;;  %v6570_v53 = vmax.f32 %v6552_v15, 0.0  ;;  %v6777_v8 = vpack.c.bf16 %v6567_v38, %v6566_v30 }
0x1db0   :  { %v6554_v55 = vpop.f32.mrf.mxu0 }
0x1db1   :  { %v6573_v40 = vmax.f32 %v6563_v31, 0.0  ;;  %v6555_v29 = vadd.f32 %v6554_v55, %v9649_v44  ;;  %v6697_v44 = vpop.permute.xlu1 %6696 }
0x1db2   :  { %v7905_v63 = vpop.f32.mrf.mxu0 }
0x1db3   :  { %v6780_v11 = vpack.c.bf16 %v6573_v40, %v6572_v57  ;;  %v6571_v3 = vmax.f32 %v6555_v29, 0.0  ;;  %v6758_v27 = vadd.f32 %v7905_v63, %v6692_v46 }
0x1db4   :  { %v6749_v60 = vpop.f32.mrf.mxu0 }
0x1db5   :  { %v6779_v10 = vpack.c.bf16 %v6571_v3, %v6570_v53  ;;  %6766 = vst.msk [vmem:[%s9691_s20 + $0x10] sm:$0xff] %vm3466_vm4, %v6758_v27  ;;  %v6750_v13 = vadd.f32 %v6749_v60, %v6682_v19  ;;  %7907 = vmatprep.subr.bf16.mxu1 %v6780_v11  ;;  %v6789_v6 = vpop.permute.xlu1 %6788 }
0x1db6   :  { %v7906_v43 = vpop.f32.mrf.mxu0  ;;  %7908 = vmatpush3.bf16.msra.mxu1 %v6780_v11 }
0x1db7   :  { %6764 = vst.msk [vmem:[%s9691_s20] sm:$0xff] %vm3466_vm4, %v6750_v13  ;;  %v6761_v50 = vadd.f32 %v7906_v43, %v6697_v44  ;;  %7909 = vmatprep.subr.bf16.mxu1 %v6779_v10 }
0x1db8   :  { %v6752_v9 = vpop.f32.mrf.mxu0 }
0x1db9   :  { %6768 = vst.msk [vmem:[%s9691_s20 + $0x18] sm:$0xf] %vm6767_vm7, %v6761_v50  ;;  %v6753_v52 = vadd.f32 %v6752_v9, %v6687_v28  ;;  %v6799_v12 = vpop.permute.xlu1 %6798 }
0x1dba   :  { %7910 = vmatpush3.bf16.msra.mxu1 %v6779_v10 }
0x1dbb   :  { %6765 = vst.msk [vmem:[%s9691_s20 + $0x8] sm:$0xff] %vm3466_vm4, %v6753_v52  ;;  %7911 = vmatprep.subr.bf16.mxu1 %v6778_v48 }
0x1dbe   :  { %7912 = vmatpush3.bf16.msra.mxu1 %v6778_v48 }
0x1dbf   :  { %7913 = vmatprep.subr.bf16.mxu1 %v6777_v8 }
0x1dc2   :  { %7914 = vmatpush3.bf16.msra.mxu1 %v6777_v8 }
0x1dc5   :  { %7916 = vmatmul.mubr.msk.bf16.vlgmr.msra.gmra.mxu1 %vm3879_vm6, %v8144_v18 }
0x1e85   :  { %v7917_v51 = vpop.f32.mrf.mxu1 }
0x1e86   :  { %v6860_v24 = vadd.f32 %v7917_v51, %v6794_v16 }
0x1e87   :  { %v6851_v39 = vpop.f32.mrf.mxu1 }
0x1e88   :  { %6868 = vst.msk [vmem:[%s6924_s24 + $0x10] sm:$0xff] %vm203_vm1, %v6860_v24  ;;  %v6852_v33 = vadd.f32 %v6851_v39, %v6784_v36 }
0x1e89   :  { %v7918_v25 = vpop.f32.mrf.mxu1 }
0x1e8a   :  { %6866 = vst.msk [vmem:[%s6924_s24] sm:$0xff] %vm203_vm1, %v6852_v33  ;;  %v6863_v37 = vadd.f32 %v7918_v25, %v6799_v12 }
0x1e8b   :  { %v6854_v35 = vpop.f32.mrf.mxu1 }
0x1e8c   :  { %6870 = vst.msk [vmem:[%s6924_s24 + $0x18] sm:$0xf] %vm6869_vm8, %v6863_v37  ;;  %v6855_v54 = vadd.f32 %v6854_v35, %v6789_v6 }
0x1e8e   :  { %6867 = vst.msk [vmem:[%s6924_s24 + $0x8] sm:$0xff] %vm203_vm1, %v6855_v54 }

</bundles_post_ra>
